<compile_context>
chip_gen: v6e
topology: v6e:2x2x1
jax: 0.10.0
libtpu: 0.0.40
codegen_flags: <defaults>
</compile_context>

<pallas_src>
import functools

import jax
import jax.numpy as jnp
from jax.experimental import pallas as pl
from jax.experimental.pallas import tpu as pltpu

LANE = 128
_VMEM_LIMIT = 32 * 1024 * 1024   # raise v5e's 16 MiB scoped default; OK on v6e/v7x


# --------------------------------------------------------------------------
# helpers (same semantics as the PyTorch reference)
# --------------------------------------------------------------------------
def _make_divisible(ch, divisor=8, min_ch=None):
    if min_ch is None:
        min_ch = divisor
    new_ch = max(min_ch, int(ch + divisor / 2) // divisor * divisor)
    if new_ch < 0.9 * ch:
        new_ch += divisor
    return new_ch


def _rup(x, m):
    return ((x + m - 1) // m) * m


def _pad_c(c):
    # Small-C activations keep their real channel count in HBM (full-dim last
    # block is legal; saves DMA bytes).  C >= 64 rounds up to 128 lanes.
    return c if c < 64 else _rup(c, LANE)


class Cfg:
    """Mirror of InvertedResidualConfig (plain python config)."""

    def __init__(self, input_c, kernel, expanded_c, out_c, use_se, activation,
                 stride, width_multi):
        self.input_c = _make_divisible(input_c * width_multi, 8)
        self.kernel = kernel
        self.expanded_c = _make_divisible(expanded_c * width_multi, 8)
        self.out_c = _make_divisible(out_c * width_multi, 8)
        self.use_se = use_se
        self.use_hs = activation == "HS"
        self.stride = stride


def _act(x, act):
    if act == "none":
        return x
    if act == "relu":
        return jnp.maximum(x, 0.0)
    if act == "hardswish":
        return x * jnp.clip(x + 3.0, 0.0, 6.0) * (1.0 / 6.0)
    raise ValueError(act)


def _cparams(*sems):
    return pltpu.CompilerParams(dimension_semantics=sems,
                                vmem_limit_bytes=_VMEM_LIMIT)


_VMEM = pl.BlockSpec(memory_space=pltpu.MemorySpace.VMEM)


# --------------------------------------------------------------------------
# 1x1 conv kernels
# --------------------------------------------------------------------------
def _pw_flat_kernel(x_ref, w_ref, b_ref, *rest, act, has_res):
    # Batch collapsed into M:  x:(TM,K) bf16 @ w:(K,N) bf16 + b -> act [+res]
    o_ref = rest[-1]
    y = jnp.dot(x_ref[...], w_ref[...], preferred_element_type=jnp.float32)
    y = _act(y + b_ref[...], act)
    if has_res:
        y = y + rest[0][...].astype(jnp.float32)
    o_ref[...] = y.astype(o_ref.dtype)


def pointwise_flat(x2d, w, b, act, residual=None, tm_cap=1024):
    """x:(M,K)bf16 @ w:(K,N)bf16 + b, activation, optional residual."""
    M, K = x2d.shape
    Nout = w.shape[1]
    TM = min(tm_cap, M)
    in_specs = [pl.BlockSpec((TM, K), lambda i: (i, 0)),
                pl.BlockSpec((K, Nout), lambda i: (0, 0)),
                pl.BlockSpec((1, Nout), lambda i: (0, 0))]
    args = [x2d, w, b]
    if residual is not None:
        in_specs.append(pl.BlockSpec((TM, Nout), lambda i: (i, 0)))
        args.append(residual)
    return pl.pallas_call(
        functools.partial(_pw_flat_kernel, act=act,
                          has_res=residual is not None),
        out_shape=jax.ShapeDtypeStruct((M, Nout), jnp.bfloat16),
        grid=(pl.cdiv(M, TM),),
        in_specs=in_specs,
        out_specs=pl.BlockSpec((TM, Nout), lambda i: (i, 0)),
        compiler_params=_cparams("parallel"),
    )(*args)


def _pw_se_kernel(x_ref, w_ref, b_ref, scale_ref, *rest, act, has_res):
    # Projection with fused per-sample SE scale (on input) and residual add.
    o_ref = rest[-1]
    x = (x_ref[0].astype(jnp.float32) * scale_ref[0]).astype(jnp.bfloat16)
    y = jnp.dot(x, w_ref[...], preferred_element_type=jnp.float32)
    y = _act(y + b_ref[...], act)
    if has_res:
        y = y + rest[0][0].astype(jnp.float32)
    o_ref[0] = y.astype(o_ref.dtype)


def pointwise(x, w, b, act, scale=None, residual=None):
    """1x1 conv.  x:(N,H,W,Cin) bf16 -> (N,H,W,Cout) bf16.

    Without an SE scale, batch is collapsed into the matmul M dimension.
    With an SE scale the grid is (N, HW-tiles) with scale + residual fused.
    """
    N, H, W, Cin = x.shape
    Cout = w.shape[1]
    HW = H * W
    if scale is None:
        res2d = None if residual is None else residual.reshape(N * HW, Cout)
        y = pointwise_flat(x.reshape(N * HW, Cin), w, b, act, residual=res2d)
        return y.reshape(N, H, W, Cout)

    TM = min(1024, HW)
    in_specs = [
        pl.BlockSpec((1, TM, Cin), lambda n, m: (n, m, 0)),
        pl.BlockSpec((Cin, Cout), lambda n, m: (0, 0)),
        pl.BlockSpec((1, Cout), lambda n, m: (0, 0)),
        pl.BlockSpec((1, 1, Cin), lambda n, m: (n, 0, 0)),
    ]
    args = [x.reshape(N, HW, Cin), w, b, scale]
    if residual is not None:
        in_specs.append(pl.BlockSpec((1, TM, Cout), lambda n, m: (n, m, 0)))
        args.append(residual.reshape(N, HW, Cout))
    out = pl.pallas_call(
        functools.partial(_pw_se_kernel, act=act,
                          has_res=residual is not None),
        out_shape=jax.ShapeDtypeStruct((N, HW, Cout), jnp.bfloat16),
        grid=(N, pl.cdiv(HW, TM)),
        in_specs=in_specs,
        out_specs=pl.BlockSpec((1, TM, Cout), lambda n, m: (n, m, 0)),
        compiler_params=_cparams("parallel", "parallel"),
    )(*args)
    return out.reshape(N, H, W, Cout)


# --------------------------------------------------------------------------
# depthwise conv kernel (row-strip tiled, optional fused SE pool)
# --------------------------------------------------------------------------
def _dw_kernel(x_ref, w_ref, b_ref, *out_refs, k, stride, TH, Ho, Wo, act,
               emit_pool):
    # x_ref: (1, P, Hs, Ws, C) full phase-decomposed padded image (resident
    #        across the strip axis).  out: (1, TH, Wo, C) output row strip,
    #        plus optionally a (1,1,1,C) masked partial channel sum (SE pool).
    o_ref = out_refs[0]
    t = pl.program_id(1)
    row0 = t * TH                      # first output row handled by this strip
    C = o_ref.shape[-1]
    acc = jnp.zeros((TH, Wo, C), jnp.float32)
    for kh in range(k):
        for kw in range(k):
            ph = (kh % stride) * stride + (kw % stride)
            r0 = kh // stride
            c0 = kw // stride
            tap = x_ref[0, ph, pl.ds(row0 + r0, TH), pl.ds(c0, Wo), :]
            acc = acc + tap.astype(jnp.float32) * w_ref[kh * k + kw]
    y = _act(acc + b_ref[...], act)
    o_ref[0] = y.astype(o_ref.dtype)
    if emit_pool:
        # Mask rows past the real output height (partial last strip) before
        # reducing; emit this strip's contribution to the SE channel sum.
        pool_ref = out_refs[1]
        rows = jax.lax.broadcasted_iota(jnp.int32, (TH, Wo, C), 0)
        valid = rows < (Ho - row0)
        pool_ref[0] = jnp.sum(jnp.where(valid, y, 0.0), axis=(0, 1),
                              keepdims=True)


def depthwise(x, w, b, k, stride, act, emit_pool=False):
    """Depthwise conv.  x:(N,H,W,C) bf16, w:(k*k,1,C) f32, b:(1,C) f32."""
    N, H, W, C = x.shape
    pad = (k - 1) // 2
    Hp, Wp = H + 2 * pad, W + 2 * pad
    Ho = (Hp - k) // stride + 1
    Wo = (Wp - k) // stride + 1
    TH = min(Ho, 16)                         # output rows per strip
    n_strips = (Ho + TH - 1) // TH
    r0max = (k - 1) // stride
    hs_req = n_strips * TH + r0max           # rows needed so in-kernel dynamic
                                             # slices never run off the buffer

    # TODO(synk): the halo pad + stride-2 phase split still cost extra HBM
    # passes in XLA glue; folding them into the producing kernel's out_spec
    # (or fusing the whole inverted-residual block) is the remaining
    # bandwidth optimization from the review.
    xp = jnp.pad(x, ((0, 0), (pad, pad), (pad, pad), (0, 0)))
    if stride == 1:
        xp = jnp.pad(xp, ((0, 0), (0, hs_req - Hp), (0, 0), (0, 0)))
        phases = xp[:, None]                               # (N,1,hs_req,Wp,C)
    else:
        ws = (Wp + stride - 1) // stride
        slabs = []
        for ph in range(stride):
            for pw in range(stride):
                s = xp[:, ph::stride, pw::stride, :]
                s = jnp.pad(s, ((0, 0), (0, hs_req - s.shape[1]),
                                (0, ws - s.shape[2]), (0, 0)))
                slabs.append(s)
        phases = jnp.stack(slabs, axis=1)                  # (N,s*s,hs_req,ws,C)

    P, Hs_p, Ws_p = phases.shape[1], phases.shape[2], phases.shape[3]
    kern = functools.partial(_dw_kernel, k=k, stride=stride, TH=TH, Ho=Ho,
                             Wo=Wo, act=act, emit_pool=emit_pool)
    in_specs = [
        pl.BlockSpec((1, P, Hs_p, Ws_p, C), lambda n, t: (n, 0, 0, 0, 0)),
        pl.BlockSpec((k * k, 1, C), lambda n, t: (0, 0, 0)),
        pl.BlockSpec((1, C), lambda n, t: (0, 0)),
    ]
    main_shape = jax.ShapeDtypeStruct((N, Ho, Wo, C), jnp.bfloat16)
    main_spec = pl.BlockSpec((1, TH, Wo, C), lambda n, t: (n, t, 0, 0))
    if emit_pool:
        out_shape = (main_shape,
                     jax.ShapeDtypeStruct((N, n_strips, 1, C), jnp.float32))
        out_specs = (main_spec,
                     pl.BlockSpec((1, 1, 1, C), lambda n, t: (n, t, 0, 0)))
    else:
        out_shape = main_shape
        out_specs = main_spec
    return pl.pallas_call(
        kern,
        out_shape=out_shape,
        grid=(N, n_strips),
        in_specs=in_specs,
        out_specs=out_specs,
        compiler_params=_cparams("parallel", "parallel"),
    )(phases, w, b)


# --------------------------------------------------------------------------
# SqueezeExcitation: tiny fc1/relu/fc2/hsigmoid on the fused pool partials
# --------------------------------------------------------------------------
def _se_kernel(pool_ref, w1_ref, b1_ref, w2_ref, b2_ref, o_ref, *, inv_hw):
    pooled = jnp.sum(pool_ref[0, :, 0, :], axis=0, keepdims=True) * inv_hw
    s = jnp.dot(pooled.astype(jnp.bfloat16), w1_ref[...],
                preferred_element_type=jnp.float32) + b1_ref[...]
    s = jnp.maximum(s, 0.0)
    s = jnp.dot(s.astype(jnp.bfloat16), w2_ref[...],
                preferred_element_type=jnp.float32) + b2_ref[...]
    o_ref[0] = jnp.clip(s + 3.0, 0.0, 6.0) * (1.0 / 6.0)


def se_scale(pool_partials, w1, b1, w2, b2, hw):
    """(N,S,1,C) per-strip partial sums -> (N,1,C) f32 channel scale."""
    N, S, _, C = pool_partials.shape
    Cs = w1.shape[1]
    return pl.pallas_call(
        functools.partial(_se_kernel, inv_hw=1.0 / hw),
        out_shape=jax.ShapeDtypeStruct((N, 1, C), jnp.float32),
        grid=(N,),
        in_specs=[
            pl.BlockSpec((1, S, 1, C), lambda n: (n, 0, 0, 0)),
            pl.BlockSpec((C, Cs), lambda n: (0, 0)),
            pl.BlockSpec((1, Cs), lambda n: (0, 0)),
            pl.BlockSpec((Cs, C), lambda n: (0, 0)),
            pl.BlockSpec((1, C), lambda n: (0, 0)),
        ],
        out_specs=pl.BlockSpec((1, 1, C), lambda n: (n, 0, 0)),
        compiler_params=_cparams("parallel"),
    )(pool_partials, w1, b1, w2, b2)


# --------------------------------------------------------------------------
# classifier head: fused global-avg-pool + Linear + Hardswish + Linear
# --------------------------------------------------------------------------
def _head_kernel(x_ref, w1_ref, b1_ref, w2_ref, b2_ref, o_ref, *, inv_hw):
    x = x_ref[...].astype(jnp.float32)                   # (N, HW, C)
    pooled = jnp.sum(x, axis=1) * inv_hw                 # (N, C)
    h = jnp.dot(pooled.astype(jnp.bfloat16), w1_ref[...],
                preferred_element_type=jnp.float32) + b1_ref[...]
    h = h * jnp.clip(h + 3.0, 0.0, 6.0) * (1.0 / 6.0)
    # TODO(synk): nn.Dropout(p=0.2) is identity in eval mode; train-mode dropout not implemented.
    o_ref[...] = jnp.dot(h.astype(jnp.bfloat16), w2_ref[...],
                         preferred_element_type=jnp.float32) + b2_ref[...]


def head_apply(x, w1, b1, w2, b2):
    N, H, W, C = x.shape
    HW = H * W
    NC = w2.shape[1]
    # TODO(synk): if batch/resolution grows, tile this over N with a grid.
    return pl.pallas_call(
        functools.partial(_head_kernel, inv_hw=1.0 / HW),
        out_shape=jax.ShapeDtypeStruct((N, NC), jnp.float32),
        in_specs=[_VMEM] * 5,
        out_specs=_VMEM,
        compiler_params=pltpu.CompilerParams(vmem_limit_bytes=_VMEM_LIMIT),
    )(x.reshape(N, HW, C), w1, b1, w2, b2)


# --------------------------------------------------------------------------
# first conv (Cin=3): im2col in glue, K padding built into the concatenate
# --------------------------------------------------------------------------
def conv2d_first(x, w_flat, b, k=3, stride=2):
    N, H, W, Cin = x.shape
    pad = (k - 1) // 2
    xp = jnp.pad(x, ((0, 0), (pad, pad), (pad, pad), (0, 0)))
    Ho = (H + 2 * pad - k) // stride + 1
    Wo = (W + 2 * pad - k) // stride + 1
    Kp = w_flat.shape[0]
    cols = []
    for kh in range(k):
        for kw in range(k):
            cols.append(xp[:, kh:kh + stride * Ho:stride,
                           kw:kw + stride * Wo:stride, :])
    if Kp > k * k * Cin:   # zero-pad K inside the concat (no extra pad pass)
        cols.append(jnp.zeros((N, Ho, Wo, Kp - k * k * Cin), x.dtype))
    patches = jnp.concatenate(cols, axis=-1).reshape(N * Ho * Wo, Kp)
    y = pointwise_flat(patches, w_flat, b, act="hardswish")
    return y.reshape(N, Ho, Wo, w_flat.shape[1])


# --------------------------------------------------------------------------
# parameter initialization (deterministic, synthetic)
# --------------------------------------------------------------------------
def _conv_bn_params(key, cin, cout, k, groups=1, eps=1e-3):
    """Conv (kaiming fan_out, bias=False) + BatchNorm folded (eval stats)."""
    k1, k2 = jax.random.split(key)
    fan_out = max(1, cout * k * k // groups)
    w = jax.random.normal(k1, (k, k, cin // groups, cout), jnp.float32) \
        * jnp.sqrt(2.0 / fan_out)
    gamma = jax.random.normal(k2, (cout,), jnp.float32)   # nn.init.normal_(bn.weight)
    beta = jnp.zeros((cout,), jnp.float32)
    mean = jnp.zeros((cout,), jnp.float32)
    var = jnp.ones((cout,), jnp.float32)
    scale = gamma / jnp.sqrt(var + eps)
    return w * scale, (beta - mean * scale).reshape(1, cout)


def _pad2d(a, rows, cols, dtype):
    return jnp.pad(a, ((0, rows - a.shape[0]), (0, cols - a.shape[1]))).astype(dtype)


def init_params(key, cfgs, last_channel, num_classes, eps=1e-3):
    keys = iter(jax.random.split(key, 64))
    params = {}

    c0 = cfgs[0].input_c
    c0p = _pad_c(c0)
    w, b = _conv_bn_params(next(keys), 3, c0, 3, eps=eps)
    params["first_w"] = _pad2d(w.reshape(3 * 3 * 3, c0), 32, c0p, jnp.bfloat16)
    params["first_b"] = _pad2d(b, 1, c0p, jnp.float32)

    blocks = []
    for cfg in cfgs:
        p = {}
        cin_p = _pad_c(cfg.input_c)
        cexp_p = _pad_c(cfg.expanded_c)
        cout_p = _pad_c(cfg.out_c)
        if cfg.expanded_c != cfg.input_c:
            w, b = _conv_bn_params(next(keys), cfg.input_c, cfg.expanded_c, 1, eps=eps)
            p["exp_w"] = _pad2d(w.reshape(cfg.input_c, cfg.expanded_c),
                                cin_p, cexp_p, jnp.bfloat16)
            p["exp_b"] = _pad2d(b, 1, cexp_p, jnp.float32)
        w, b = _conv_bn_params(next(keys), cfg.expanded_c, cfg.expanded_c,
                               cfg.kernel, groups=cfg.expanded_c, eps=eps)
        w = w.reshape(cfg.kernel * cfg.kernel, 1, cfg.expanded_c)
        p["dw_w"] = jnp.pad(w, ((0, 0), (0, 0),
                                (0, cexp_p - cfg.expanded_c))).astype(jnp.float32)
        p["dw_b"] = _pad2d(b, 1, cexp_p, jnp.float32)
        if cfg.use_se:
            squeeze_c = _make_divisible(cfg.expanded_c // 4, 8)
            cs_p = _pad_c(squeeze_c)
            k1, k2 = jax.random.split(next(keys))
            w1 = jax.random.normal(k1, (cfg.expanded_c, squeeze_c),
                                   jnp.float32) * jnp.sqrt(2.0 / squeeze_c)
            w2 = jax.random.normal(k2, (squeeze_c, cfg.expanded_c),
                                   jnp.float32) * jnp.sqrt(2.0 / cfg.expanded_c)
            p["se_w1"] = _pad2d(w1, cexp_p, cs_p, jnp.bfloat16)   # bf16 MXU path
            p["se_b1"] = jnp.zeros((1, cs_p), jnp.float32)
            p["se_w2"] = _pad2d(w2, cs_p, cexp_p, jnp.bfloat16)
            p["se_b2"] = jnp.zeros((1, cexp_p), jnp.float32)
        w, b = _conv_bn_params(next(keys), cfg.expanded_c, cfg.out_c, 1, eps=eps)
        p["proj_w"] = _pad2d(w.reshape(cfg.expanded_c, cfg.out_c),
                             cexp_p, cout_p, jnp.bfloat16)
        p["proj_b"] = _pad2d(b, 1, cout_p, jnp.float32)
        blocks.append(p)
    params["blocks"] = blocks

    cl_in = cfgs[-1].out_c
    cl_out = 6 * cl_in
    cl_in_p, cl_out_p = _pad_c(cl_in), _pad_c(cl_out)
    w, b = _conv_bn_params(next(keys), cl_in, cl_out, 1, eps=eps)
    params["last_w"] = _pad2d(w.reshape(cl_in, cl_out), cl_in_p, cl_out_p, jnp.bfloat16)
    params["last_b"] = _pad2d(b, 1, cl_out_p, jnp.float32)

    lc_p = _pad_c(last_channel)
    k1, k2 = jax.random.split(next(keys))
    w1 = jax.random.normal(k1, (cl_out, last_channel), jnp.float32) * 0.01
    w2 = jax.random.normal(k2, (last_channel, num_classes), jnp.float32) * 0.01
    params["cls_w1"] = _pad2d(w1, cl_out_p, lc_p, jnp.bfloat16)
    params["cls_b1"] = jnp.zeros((1, lc_p), jnp.float32)
    params["cls_w2"] = _pad2d(w2, lc_p, num_classes, jnp.bfloat16)
    params["cls_b2"] = jnp.zeros((1, num_classes), jnp.float32)
    return params


# --------------------------------------------------------------------------
# forward pass
# --------------------------------------------------------------------------
def inverted_res_block(x, p, cfg):
    # TODO(synk): at small HW the whole block could be one fused pallas_call
    # keeping the expanded activation resident in VMEM (review item 4).
    act = "hardswish" if cfg.use_hs else "relu"
    out = x
    if cfg.expanded_c != cfg.input_c:
        out = pointwise(out, p["exp_w"], p["exp_b"], act=act)
    if cfg.use_se:
        out, pool = depthwise(out, p["dw_w"], p["dw_b"], cfg.kernel, cfg.stride,
                              act=act, emit_pool=True)
        _, Ho, Wo, _ = out.shape
        scale = se_scale(pool, p["se_w1"], p["se_b1"], p["se_w2"], p["se_b2"],
                         hw=Ho * Wo)
    else:
        out = depthwise(out, p["dw_w"], p["dw_b"], cfg.kernel, cfg.stride, act=act)
        scale = None
    residual = x if (cfg.stride == 1 and cfg.input_c == cfg.out_c) else None
    # SE scale + residual add fused into the projection matmul kernel.
    out = pointwise(out, p["proj_w"], p["proj_b"], act="none",
                    scale=scale, residual=residual)
    return out


def mobilenet_v3_forward(params, x_nchw, *, cfgs, num_classes):
    x = jnp.transpose(x_nchw, (0, 2, 3, 1)).astype(jnp.bfloat16)   # NCHW -> NHWC
    x = conv2d_first(x, params["first_w"], params["first_b"], k=3, stride=2)
    for p, cfg in zip(params["blocks"], cfgs):
        x = inverted_res_block(x, p, cfg)
    x = pointwise(x, params["last_w"], params["last_b"], act="hardswish")
    logits = head_apply(x, params["cls_w1"], params["cls_b1"],
                        params["cls_w2"], params["cls_b2"])
    return logits


# --------------------------------------------------------------------------
# main
# --------------------------------------------------------------------------
if __name__ == "__main__":
    key = jax.random.PRNGKey(0)
    width_multi = 1.0
    # small inverted-residual setting (input_c, k, exp_c, out_c, SE, act, stride)
    cfgs = [
        Cfg(16, 3, 16, 16, False, "RE", 1, width_multi),
        Cfg(16, 3, 64, 24, False, "RE", 2, width_multi),
        Cfg(24, 5, 72, 24, True, "HS", 1, width_multi),
    ]
    last_channel = 64
    num_classes = 10

    pkey, xkey = jax.random.split(key)
    params = init_params(pkey, cfgs, last_channel, num_classes)
    x = jax.random.normal(xkey, (2, 3, 16, 16), jnp.float32)   # NCHW, like PyTorch

    fwd = jax.jit(functools.partial(mobilenet_v3_forward, cfgs=cfgs,
                                    num_classes=num_classes))
    out = fwd(params, x)
    jax.block_until_ready(out)
    assert out.shape == (2, num_classes)
    assert bool(jnp.all(jnp.isfinite(out)))
    print("KERNEL_OK")
</pallas_src>

<mosaic_0001>
module attributes {stable_mosaic.version = 11 : i64} {
  func.func @_pw_flat_kernel(%arg0: i32, %arg1: memref<128x32xbf16, #tpu.memory_space<vmem>>, %arg2: memref<32x16xbf16, #tpu.memory_space<vmem>>, %arg3: memref<1x16xf32, #tpu.memory_space<vmem>>, %arg4: memref<128x16xbf16, #tpu.memory_space<vmem>>) attributes {dimension_semantics = [#tpu.dimension_semantics<parallel>], iteration_bounds = array<i64: 1>, scalar_prefetch = 0 : i64, scratch_operands = 0 : i64, tpu.core_type = #tpu.core_type<tc>, window_params = [{transform_indices = @transform_0, window_bounds = array<i64: 128, 32>}, {pipeline_mode = #tpu.pipeline_mode<synchronous>, transform_indices = @transform_1, window_bounds = array<i64: 32, 16>}, {pipeline_mode = #tpu.pipeline_mode<synchronous>, transform_indices = @transform_2, window_bounds = array<i64: 1, 16>}, {transform_indices = @transform_3, window_bounds = array<i64: 128, 16>}]} {
    %c0 = arith.constant 0 : index
    %c0_0 = arith.constant 0 : index
    %0 = vector.load %arg1[%c0, %c0_0] : memref<128x32xbf16, #tpu.memory_space<vmem>>, vector<128x32xbf16>
    %c0_1 = arith.constant 0 : index
    %c0_2 = arith.constant 0 : index
    %1 = vector.load %arg2[%c0_1, %c0_2] : memref<32x16xbf16, #tpu.memory_space<vmem>>, vector<32x16xbf16>
    %cst = arith.constant dense<0.000000e+00> : vector<128x16xf32>
    %2 = tpu.matmul %0, %1, %cst {dimension_numbers = #tpu.dot_dimension_numbers<[1], [0], [0], [1], [0, 0, 1, 1], [], []>} : vector<128x32xbf16>, vector<32x16xbf16>, vector<128x16xf32> -> vector<128x16xf32>
    %c0_3 = arith.constant 0 : index
    %c0_4 = arith.constant 0 : index
    %3 = vector.load %arg3[%c0_3, %c0_4] : memref<1x16xf32, #tpu.memory_space<vmem>>, vector<1x16xf32>
    %4 = vector.broadcast %3 : vector<1x16xf32> to vector<128x16xf32>
    %5 = arith.addf %2, %4 : vector<128x16xf32>
    %cst_5 = arith.constant 3.000000e+00 : f32
    %6 = vector.broadcast %cst_5 : f32 to vector<128x16xf32>
    %7 = arith.addf %5, %6 : vector<128x16xf32>
    %cst_6 = arith.constant 0.000000e+00 : f32
    %cst_7 = arith.constant 6.000000e+00 : f32
    %8 = vector.broadcast %cst_6 : f32 to vector<128x16xf32>
    %9 = arith.maximumf %8, %7 : vector<128x16xf32>
    %10 = vector.broadcast %cst_7 : f32 to vector<128x16xf32>
    %11 = arith.minimumf %10, %9 : vector<128x16xf32>
    %12 = arith.mulf %5, %11 : vector<128x16xf32>
    %cst_8 = arith.constant 0.166666672 : f32
    %13 = vector.broadcast %cst_8 : f32 to vector<128x16xf32>
    %14 = arith.mulf %12, %13 : vector<128x16xf32>
    %15 = arith.truncf %14 : vector<128x16xf32> to vector<128x16xbf16>
    %c0_9 = arith.constant 0 : index
    %c0_10 = arith.constant 0 : index
    %16 = vector.load %arg4[%c0_9, %c0_10] : memref<128x16xbf16, #tpu.memory_space<vmem>>, vector<128x16xbf16>
    tpu.vector_store %arg4[%c0_9, %c0_10], %15 {strides = array<i32>} : memref<128x16xbf16, #tpu.memory_space<vmem>>, vector<128x16xbf16>,
    return
  }
  func.func @transform_0(%arg0: i32) -> (i32, i32) {
    %c0_i32 = arith.constant 0 : i32
    %c0_i32_0 = arith.constant 0 : i32
    return %arg0, %c0_i32 : i32, i32
  }
  func.func @transform_1(%arg0: i32) -> (i32, i32) {
    %c0_i32 = arith.constant 0 : i32
    %c0_i32_0 = arith.constant 0 : i32
    %c0_i32_1 = arith.constant 0 : i32
    return %c0_i32, %c0_i32_0 : i32, i32
  }
  func.func @transform_2(%arg0: i32) -> (i32, i32) {
    %c0_i32 = arith.constant 0 : i32
    %c0_i32_0 = arith.constant 0 : i32
    %c0_i32_1 = arith.constant 0 : i32
    return %c0_i32, %c0_i32_0 : i32, i32
  }
  func.func @transform_3(%arg0: i32) -> (i32, i32) {
    %c0_i32 = arith.constant 0 : i32
    %c0_i32_0 = arith.constant 0 : i32
    return %arg0, %c0_i32 : i32, i32
  }
}

module attributes {stable_mosaic.version = 11 : i64} {
  func.func @_dw_kernel(%arg0: i32, %arg1: i32, %arg2: memref<1x1x10x10x16xbf16, #tpu.memory_space<vmem>>, %arg3: memref<9x1x16xf32, #tpu.memory_space<vmem>>, %arg4: memref<1x16xf32, #tpu.memory_space<vmem>>, %arg5: memref<1x8x8x16xbf16, #tpu.memory_space<vmem>>) attributes {dimension_semantics = [#tpu.dimension_semantics<parallel>, #tpu.dimension_semantics<parallel>], iteration_bounds = array<i64: 2, 1>, scalar_prefetch = 0 : i64, scratch_operands = 0 : i64, tpu.core_type = #tpu.core_type<tc>, window_params = [{transform_indices = @transform_0, window_bounds = array<i64: 1, 1, 10, 10, 16>}, {pipeline_mode = #tpu.pipeline_mode<synchronous>, transform_indices = @transform_1, window_bounds = array<i64: 9, 1, 16>}, {pipeline_mode = #tpu.pipeline_mode<synchronous>, transform_indices = @transform_2, window_bounds = array<i64: 1, 16>}, {transform_indices = @transform_3, window_bounds = array<i64: 1, 8, 8, 16>}]} {
    %c8_i32 = arith.constant 8 : i32
    %0 = arith.muli %arg1, %c8_i32 : i32
    %cst = arith.constant 0.000000e+00 : f32
    %1 = vector.broadcast %cst : f32 to vector<8x8x16xf32>
    %c0_i32 = arith.constant 0 : i32
    %2 = arith.addi %0, %c0_i32 : i32
    %c0 = arith.constant 0 : index
    %c0_0 = arith.constant 0 : index
    %3 = arith.index_cast %2 : i32 to index
    %c0_1 = arith.constant 0 : index
    %c0_2 = arith.constant 0 : index
    %4 = vector.load %arg2[%c0, %c0_0, %3, %c0_1, %c0_2] : memref<1x1x10x10x16xbf16, #tpu.memory_space<vmem>>, vector<1x1x8x8x16xbf16>
    %5 = vector.shape_cast %4 : vector<1x1x8x8x16xbf16> to vector<8x8x16xbf16>
    %6 = arith.extf %5 : vector<8x8x16xbf16> to vector<8x8x16xf32>
    %c0_3 = arith.constant 0 : index
    %c0_4 = arith.constant 0 : index
    %c0_5 = arith.constant 0 : index
    %7 = vector.load %arg3[%c0_3, %c0_4, %c0_5] : memref<9x1x16xf32, #tpu.memory_space<vmem>>, vector<1x1x16xf32>
    %8 = vector.shape_cast %7 : vector<1x1x16xf32> to vector<1x16xf32>
    %9 = vector.shape_cast %8 : vector<1x16xf32> to vector<1x1x16xf32>
    %10 = vector.broadcast %9 : vector<1x1x16xf32> to vector<8x8x16xf32>
    %11 = arith.mulf %6, %10 : vector<8x8x16xf32>
    %12 = arith.addf %1, %11 : vector<8x8x16xf32>
    %c0_i32_6 = arith.constant 0 : i32
    %13 = arith.addi %0, %c0_i32_6 : i32
    %c0_7 = arith.constant 0 : index
    %c0_8 = arith.constant 0 : index
    %14 = arith.index_cast %13 : i32 to index
    %c1 = arith.constant 1 : index
    %c0_9 = arith.constant 0 : index
    %15 = vector.load %arg2[%c0_7, %c0_8, %14, %c1, %c0_9] : memref<1x1x10x10x16xbf16, #tpu.memory_space<vmem>>, vector<1x1x8x8x16xbf16>
    %16 = vector.shape_cast %15 : vector<1x1x8x8x16xbf16> to vector<8x8x16xbf16>
    %17 = arith.extf %16 : vector<8x8x16xbf16> to vector<8x8x16xf32>
    %c1_10 = arith.constant 1 : index
    %c0_11 = arith.constant 0 : index
    %c0_12 = arith.constant 0 : index
    %18 = vector.load %arg3[%c1_10, %c0_11, %c0_12] : memref<9x1x16xf32, #tpu.memory_space<vmem>>, vector<1x1x16xf32>
    %19 = vector.shape_cast %18 : vector<1x1x16xf32> to vector<1x16xf32>
    %20 = vector.shape_cast %19 : vector<1x16xf32> to vector<1x1x16xf32>
    %21 = vector.broadcast %20 : vector<1x1x16xf32> to vector<8x8x16xf32>
    %22 = arith.mulf %17, %21 : vector<8x8x16xf32>
    %23 = arith.addf %12, %22 : vector<8x8x16xf32>
    %c0_i32_13 = arith.constant 0 : i32
    %24 = arith.addi %0, %c0_i32_13 : i32
    %c0_14 = arith.constant 0 : index
    %c0_15 = arith.constant 0 : index
    %25 = arith.index_cast %24 : i32 to index
    %c2 = arith.constant 2 : index
    %c0_16 = arith.constant 0 : index
    %26 = vector.load %arg2[%c0_14, %c0_15, %25, %c2, %c0_16] : memref<1x1x10x10x16xbf16, #tpu.memory_space<vmem>>, vector<1x1x8x8x16xbf16>
    %27 = vector.shape_cast %26 : vector<1x1x8x8x16xbf16> to vector<8x8x16xbf16>
    %28 = arith.extf %27 : vector<8x8x16xbf16> to vector<8x8x16xf32>
    %c2_17 = arith.constant 2 : index
    %c0_18 = arith.constant 0 : index
    %c0_19 = arith.constant 0 : index
    %29 = vector.load %arg3[%c2_17, %c0_18, %c0_19] : memref<9x1x16xf32, #tpu.memory_space<vmem>>, vector<1x1x16xf32>
    %30 = vector.shape_cast %29 : vector<1x1x16xf32> to vector<1x16xf32>
    %31 = vector.shape_cast %30 : vector<1x16xf32> to vector<1x1x16xf32>
    %32 = vector.broadcast %31 : vector<1x1x16xf32> to vector<8x8x16xf32>
    %33 = arith.mulf %28, %32 : vector<8x8x16xf32>
    %34 = arith.addf %23, %33 : vector<8x8x16xf32>
    %c1_i32 = arith.constant 1 : i32
    %35 = arith.addi %0, %c1_i32 : i32
    %c0_20 = arith.constant 0 : index
    %c0_21 = arith.constant 0 : index
    %36 = arith.index_cast %35 : i32 to index
    %c0_22 = arith.constant 0 : index
    %c0_23 = arith.constant 0 : index
    %37 = vector.load %arg2[%c0_20, %c0_21, %36, %c0_22, %c0_23] : memref<1x1x10x10x16xbf16, #tpu.memory_space<vmem>>, vector<1x1x8x8x16xbf16>
    %38 = vector.shape_cast %37 : vector<1x1x8x8x16xbf16> to vector<8x8x16xbf16>
    %39 = arith.extf %38 : vector<8x8x16xbf16> to vector<8x8x16xf32>
    %c3 = arith.constant 3 : index
    %c0_24 = arith.constant 0 : index
    %c0_25 = arith.constant 0 : index
    %40 = vector.load %arg3[%c3, %c0_24, %c0_25] : memref<9x1x16xf32, #tpu.memory_space<vmem>>, vector<1x1x16xf32>
    %41 = vector.shape_cast %40 : vector<1x1x16xf32> to vector<1x16xf32>
    %42 = vector.shape_cast %41 : vector<1x16xf32> to vector<1x1x16xf32>
    %43 = vector.broadcast %42 : vector<1x1x16xf32> to vector<8x8x16xf32>
    %44 = arith.mulf %39, %43 : vector<8x8x16xf32>
    %45 = arith.addf %34, %44 : vector<8x8x16xf32>
    %c1_i32_26 = arith.constant 1 : i32
    %46 = arith.addi %0, %c1_i32_26 : i32
    %c0_27 = arith.constant 0 : index
    %c0_28 = arith.constant 0 : index
    %47 = arith.index_cast %46 : i32 to index
    %c1_29 = arith.constant 1 : index
    %c0_30 = arith.constant 0 : index
    %48 = vector.load %arg2[%c0_27, %c0_28, %47, %c1_29, %c0_30] : memref<1x1x10x10x16xbf16, #tpu.memory_space<vmem>>, vector<1x1x8x8x16xbf16>
    %49 = vector.shape_cast %48 : vector<1x1x8x8x16xbf16> to vector<8x8x16xbf16>
    %50 = arith.extf %49 : vector<8x8x16xbf16> to vector<8x8x16xf32>
    %c4 = arith.constant 4 : index
    %c0_31 = arith.constant 0 : index
    %c0_32 = arith.constant 0 : index
    %51 = vector.load %arg3[%c4, %c0_31, %c0_32] : memref<9x1x16xf32, #tpu.memory_space<vmem>>, vector<1x1x16xf32>
    %52 = vector.shape_cast %51 : vector<1x1x16xf32> to vector<1x16xf32>
    %53 = vector.shape_cast %52 : vector<1x16xf32> to vector<1x1x16xf32>
    %54 = vector.broadcast %53 : vector<1x1x16xf32> to vector<8x8x16xf32>
    %55 = arith.mulf %50, %54 : vector<8x8x16xf32>
    %56 = arith.addf %45, %55 : vector<8x8x16xf32>
    %c1_i32_33 = arith.constant 1 : i32
    %57 = arith.addi %0, %c1_i32_33 : i32
    %c0_34 = arith.constant 0 : index
    %c0_35 = arith.constant 0 : index
    %58 = arith.index_cast %57 : i32 to index
    %c2_36 = arith.constant 2 : index
    %c0_37 = arith.constant 0 : index
    %59 = vector.load %arg2[%c0_34, %c0_35, %58, %c2_36, %c0_37] : memref<1x1x10x10x16xbf16, #tpu.memory_space<vmem>>, vector<1x1x8x8x16xbf16>
    %60 = vector.shape_cast %59 : vector<1x1x8x8x16xbf16> to vector<8x8x16xbf16>
    %61 = arith.extf %60 : vector<8x8x16xbf16> to vector<8x8x16xf32>
    %c5 = arith.constant 5 : index
    %c0_38 = arith.constant 0 : index
    %c0_39 = arith.constant 0 : index
    %62 = vector.load %arg3[%c5, %c0_38, %c0_39] : memref<9x1x16xf32, #tpu.memory_space<vmem>>, vector<1x1x16xf32>
    %63 = vector.shape_cast %62 : vector<1x1x16xf32> to vector<1x16xf32>
    %64 = vector.shape_cast %63 : vector<1x16xf32> to vector<1x1x16xf32>
    %65 = vector.broadcast %64 : vector<1x1x16xf32> to vector<8x8x16xf32>
    %66 = arith.mulf %61, %65 : vector<8x8x16xf32>
    %67 = arith.addf %56, %66 : vector<8x8x16xf32>
    %c2_i32 = arith.constant 2 : i32
    %68 = arith.addi %0, %c2_i32 : i32
    %c0_40 = arith.constant 0 : index
    %c0_41 = arith.constant 0 : index
    %69 = arith.index_cast %68 : i32 to index
    %c0_42 = arith.constant 0 : index
    %c0_43 = arith.constant 0 : index
    %70 = vector.load %arg2[%c0_40, %c0_41, %69, %c0_42, %c0_43] : memref<1x1x10x10x16xbf16, #tpu.memory_space<vmem>>, vector<1x1x8x8x16xbf16>
    %71 = vector.shape_cast %70 : vector<1x1x8x8x16xbf16> to vector<8x8x16xbf16>
    %72 = arith.extf %71 : vector<8x8x16xbf16> to vector<8x8x16xf32>
    %c6 = arith.constant 6 : index
    %c0_44 = arith.constant 0 : index
    %c0_45 = arith.constant 0 : index
    %73 = vector.load %arg3[%c6, %c0_44, %c0_45] : memref<9x1x16xf32, #tpu.memory_space<vmem>>, vector<1x1x16xf32>
    %74 = vector.shape_cast %73 : vector<1x1x16xf32> to vector<1x16xf32>
    %75 = vector.shape_cast %74 : vector<1x16xf32> to vector<1x1x16xf32>
    %76 = vector.broadcast %75 : vector<1x1x16xf32> to vector<8x8x16xf32>
    %77 = arith.mulf %72, %76 : vector<8x8x16xf32>
    %78 = arith.addf %67, %77 : vector<8x8x16xf32>
    %c2_i32_46 = arith.constant 2 : i32
    %79 = arith.addi %0, %c2_i32_46 : i32
    %c0_47 = arith.constant 0 : index
    %c0_48 = arith.constant 0 : index
    %80 = arith.index_cast %79 : i32 to index
    %c1_49 = arith.constant 1 : index
    %c0_50 = arith.constant 0 : index
    %81 = vector.load %arg2[%c0_47, %c0_48, %80, %c1_49, %c0_50] : memref<1x1x10x10x16xbf16, #tpu.memory_space<vmem>>, vector<1x1x8x8x16xbf16>
    %82 = vector.shape_cast %81 : vector<1x1x8x8x16xbf16> to vector<8x8x16xbf16>
    %83 = arith.extf %82 : vector<8x8x16xbf16> to vector<8x8x16xf32>
    %c7 = arith.constant 7 : index
    %c0_51 = arith.constant 0 : index
    %c0_52 = arith.constant 0 : index
    %84 = vector.load %arg3[%c7, %c0_51, %c0_52] : memref<9x1x16xf32, #tpu.memory_space<vmem>>, vector<1x1x16xf32>
    %85 = vector.shape_cast %84 : vector<1x1x16xf32> to vector<1x16xf32>
    %86 = vector.shape_cast %85 : vector<1x16xf32> to vector<1x1x16xf32>
    %87 = vector.broadcast %86 : vector<1x1x16xf32> to vector<8x8x16xf32>
    %88 = arith.mulf %83, %87 : vector<8x8x16xf32>
    %89 = arith.addf %78, %88 : vector<8x8x16xf32>
    %c2_i32_53 = arith.constant 2 : i32
    %90 = arith.addi %0, %c2_i32_53 : i32
    %c0_54 = arith.constant 0 : index
    %c0_55 = arith.constant 0 : index
    %91 = arith.index_cast %90 : i32 to index
    %c2_56 = arith.constant 2 : index
    %c0_57 = arith.constant 0 : index
    %92 = vector.load %arg2[%c0_54, %c0_55, %91, %c2_56, %c0_57] : memref<1x1x10x10x16xbf16, #tpu.memory_space<vmem>>, vector<1x1x8x8x16xbf16>
    %93 = vector.shape_cast %92 : vector<1x1x8x8x16xbf16> to vector<8x8x16xbf16>
    %94 = arith.extf %93 : vector<8x8x16xbf16> to vector<8x8x16xf32>
    %c8 = arith.constant 8 : index
    %c0_58 = arith.constant 0 : index
    %c0_59 = arith.constant 0 : index
    %95 = vector.load %arg3[%c8, %c0_58, %c0_59] : memref<9x1x16xf32, #tpu.memory_space<vmem>>, vector<1x1x16xf32>
    %96 = vector.shape_cast %95 : vector<1x1x16xf32> to vector<1x16xf32>
    %97 = vector.shape_cast %96 : vector<1x16xf32> to vector<1x1x16xf32>
    %98 = vector.broadcast %97 : vector<1x1x16xf32> to vector<8x8x16xf32>
    %99 = arith.mulf %94, %98 : vector<8x8x16xf32>
    %100 = arith.addf %89, %99 : vector<8x8x16xf32>
    %c0_60 = arith.constant 0 : index
    %c0_61 = arith.constant 0 : index
    %101 = vector.load %arg4[%c0_60, %c0_61] : memref<1x16xf32, #tpu.memory_space<vmem>>, vector<1x16xf32>
    %102 = vector.shape_cast %101 : vector<1x16xf32> to vector<1x1x16xf32>
    %103 = vector.broadcast %102 : vector<1x1x16xf32> to vector<8x8x16xf32>
    %104 = arith.addf %100, %103 : vector<8x8x16xf32>
    %cst_62 = arith.constant 0.000000e+00 : f32
    %105 = vector.broadcast %cst_62 : f32 to vector<8x8x16xf32>
    %106 = arith.maximumf %104, %105 : vector<8x8x16xf32>
    %107 = arith.truncf %106 : vector<8x8x16xf32> to vector<8x8x16xbf16>
    %c0_63 = arith.constant 0 : index
    %c0_64 = arith.constant 0 : index
    %c0_65 = arith.constant 0 : index
    %c0_66 = arith.constant 0 : index
    %108 = vector.load %arg5[%c0_63, %c0_64, %c0_65, %c0_66] : memref<1x8x8x16xbf16, #tpu.memory_space<vmem>>, vector<1x8x8x16xbf16>
    %109 = vector.shape_cast %108 : vector<1x8x8x16xbf16> to vector<8x8x16xbf16>
    %110 = vector.shape_cast %107 : vector<8x8x16xbf16> to vector<1x8x8x16xbf16>
    tpu.vector_store %arg5[%c0_63, %c0_64, %c0_65, %c0_66], %110 {strides = array<i32>} : memref<1x8x8x16xbf16, #tpu.memory_space<vmem>>, vector<1x8x8x16xbf16>,
    return
  }
  func.func @transform_0(%arg0: i32, %arg1: i32) -> (i32, i32, i32, i32, i32) {
    %c0_i32 = arith.constant 0 : i32
    %c0_i32_0 = arith.constant 0 : i32
    %c0_i32_1 = arith.constant 0 : i32
    %c0_i32_2 = arith.constant 0 : i32
    %c0_i32_3 = arith.constant 0 : i32
    return %arg0, %c0_i32, %c0_i32_0, %c0_i32_1, %c0_i32_2 : i32, i32, i32, i32, i32
  }
  func.func @transform_1(%arg0: i32, %arg1: i32) -> (i32, i32, i32) {
    %c0_i32 = arith.constant 0 : i32
    %c0_i32_0 = arith.constant 0 : i32
    %c0_i32_1 = arith.constant 0 : i32
    %c0_i32_2 = arith.constant 0 : i32
    return %c0_i32, %c0_i32_0, %c0_i32_1 : i32, i32, i32
  }
  func.func @transform_2(%arg0: i32, %arg1: i32) -> (i32, i32) {
    %c0_i32 = arith.constant 0 : i32
    %c0_i32_0 = arith.constant 0 : i32
    %c0_i32_1 = arith.constant 0 : i32
    return %c0_i32, %c0_i32_0 : i32, i32
  }
  func.func @transform_3(%arg0: i32, %arg1: i32) -> (i32, i32, i32, i32) {
    %c0_i32 = arith.constant 0 : i32
    %c0_i32_0 = arith.constant 0 : i32
    %c0_i32_1 = arith.constant 0 : i32
    return %arg0, %arg1, %c0_i32, %c0_i32_0 : i32, i32, i32, i32
  }
}

module attributes {stable_mosaic.version = 11 : i64} {
  func.func @_pw_flat_kernel(%arg0: i32, %arg1: memref<128x16xbf16, #tpu.memory_space<vmem>>, %arg2: memref<16x16xbf16, #tpu.memory_space<vmem>>, %arg3: memref<1x16xf32, #tpu.memory_space<vmem>>, %arg4: memref<128x16xbf16, #tpu.memory_space<vmem>>, %arg5: memref<128x16xbf16, #tpu.memory_space<vmem>>) attributes {dimension_semantics = [#tpu.dimension_semantics<parallel>], iteration_bounds = array<i64: 1>, scalar_prefetch = 0 : i64, scratch_operands = 0 : i64, tpu.core_type = #tpu.core_type<tc>, window_params = [{transform_indices = @transform_0, window_bounds = array<i64: 128, 16>}, {pipeline_mode = #tpu.pipeline_mode<synchronous>, transform_indices = @transform_1, window_bounds = array<i64: 16, 16>}, {pipeline_mode = #tpu.pipeline_mode<synchronous>, transform_indices = @transform_2, window_bounds = array<i64: 1, 16>}, {transform_indices = @transform_3, window_bounds = array<i64: 128, 16>}, {transform_indices = @transform_4, window_bounds = array<i64: 128, 16>}]} {
    %c0 = arith.constant 0 : index
    %c0_0 = arith.constant 0 : index
    %0 = vector.load %arg1[%c0, %c0_0] : memref<128x16xbf16, #tpu.memory_space<vmem>>, vector<128x16xbf16>
    %c0_1 = arith.constant 0 : index
    %c0_2 = arith.constant 0 : index
    %1 = vector.load %arg2[%c0_1, %c0_2] : memref<16x16xbf16, #tpu.memory_space<vmem>>, vector<16x16xbf16>
    %cst = arith.constant dense<0.000000e+00> : vector<128x16xf32>
    %2 = tpu.matmul %0, %1, %cst {dimension_numbers = #tpu.dot_dimension_numbers<[1], [0], [0], [1], [0, 0, 1, 1], [], []>} : vector<128x16xbf16>, vector<16x16xbf16>, vector<128x16xf32> -> vector<128x16xf32>
    %c0_3 = arith.constant 0 : index
    %c0_4 = arith.constant 0 : index
    %3 = vector.load %arg3[%c0_3, %c0_4] : memref<1x16xf32, #tpu.memory_space<vmem>>, vector<1x16xf32>
    %4 = vector.broadcast %3 : vector<1x16xf32> to vector<128x16xf32>
    %5 = arith.addf %2, %4 : vector<128x16xf32>
    %c0_5 = arith.constant 0 : index
    %c0_6 = arith.constant 0 : index
    %6 = vector.load %arg4[%c0_5, %c0_6] : memref<128x16xbf16, #tpu.memory_space<vmem>>, vector<128x16xbf16>
    %7 = arith.extf %6 : vector<128x16xbf16> to vector<128x16xf32>
    %8 = arith.addf %5, %7 : vector<128x16xf32>
    %9 = arith.truncf %8 : vector<128x16xf32> to vector<128x16xbf16>
    %c0_7 = arith.constant 0 : index
    %c0_8 = arith.constant 0 : index
    %10 = vector.load %arg5[%c0_7, %c0_8] : memref<128x16xbf16, #tpu.memory_space<vmem>>, vector<128x16xbf16>
    tpu.vector_store %arg5[%c0_7, %c0_8], %9 {strides = array<i32>} : memref<128x16xbf16, #tpu.memory_space<vmem>>, vector<128x16xbf16>,
    return
  }
  func.func @transform_0(%arg0: i32) -> (i32, i32) {
    %c0_i32 = arith.constant 0 : i32
    %c0_i32_0 = arith.constant 0 : i32
    return %arg0, %c0_i32 : i32, i32
  }
  func.func @transform_1(%arg0: i32) -> (i32, i32) {
    %c0_i32 = arith.constant 0 : i32
    %c0_i32_0 = arith.constant 0 : i32
    %c0_i32_1 = arith.constant 0 : i32
    return %c0_i32, %c0_i32_0 : i32, i32
  }
  func.func @transform_2(%arg0: i32) -> (i32, i32) {
    %c0_i32 = arith.constant 0 : i32
    %c0_i32_0 = arith.constant 0 : i32
    %c0_i32_1 = arith.constant 0 : i32
    return %c0_i32, %c0_i32_0 : i32, i32
  }
  func.func @transform_3(%arg0: i32) -> (i32, i32) {
    %c0_i32 = arith.constant 0 : i32
    %c0_i32_0 = arith.constant 0 : i32
    return %arg0, %c0_i32 : i32, i32
  }
  func.func @transform_4(%arg0: i32) -> (i32, i32) {
    %c0_i32 = arith.constant 0 : i32
    %c0_i32_0 = arith.constant 0 : i32
    return %arg0, %c0_i32 : i32, i32
  }
}

module attributes {stable_mosaic.version = 11 : i64} {
  func.func @_pw_flat_kernel(%arg0: i32, %arg1: memref<128x16xbf16, #tpu.memory_space<vmem>>, %arg2: memref<16x128xbf16, #tpu.memory_space<vmem>>, %arg3: memref<1x128xf32, #tpu.memory_space<vmem>>, %arg4: memref<128x128xbf16, #tpu.memory_space<vmem>>) attributes {dimension_semantics = [#tpu.dimension_semantics<parallel>], iteration_bounds = array<i64: 1>, scalar_prefetch = 0 : i64, scratch_operands = 0 : i64, tpu.core_type = #tpu.core_type<tc>, window_params = [{transform_indices = @transform_0, window_bounds = array<i64: 128, 16>}, {pipeline_mode = #tpu.pipeline_mode<synchronous>, transform_indices = @transform_1, window_bounds = array<i64: 16, 128>}, {pipeline_mode = #tpu.pipeline_mode<synchronous>, transform_indices = @transform_2, window_bounds = array<i64: 1, 128>}, {transform_indices = @transform_3, window_bounds = array<i64: 128, 128>}]} {
    %c0 = arith.constant 0 : index
    %c0_0 = arith.constant 0 : index
    %0 = vector.load %arg1[%c0, %c0_0] : memref<128x16xbf16, #tpu.memory_space<vmem>>, vector<128x16xbf16>
    %c0_1 = arith.constant 0 : index
    %c0_2 = arith.constant 0 : index
    %1 = vector.load %arg2[%c0_1, %c0_2] : memref<16x128xbf16, #tpu.memory_space<vmem>>, vector<16x128xbf16>
    %cst = arith.constant dense<0.000000e+00> : vector<128x128xf32>
    %2 = tpu.matmul %0, %1, %cst {dimension_numbers = #tpu.dot_dimension_numbers<[1], [0], [0], [1], [0, 0, 1, 1], [], []>} : vector<128x16xbf16>, vector<16x128xbf16>, vector<128x128xf32> -> vector<128x128xf32>
    %c0_3 = arith.constant 0 : index
    %c0_4 = arith.constant 0 : index
    %3 = vector.load %arg3[%c0_3, %c0_4] : memref<1x128xf32, #tpu.memory_space<vmem>>, vector<1x128xf32>
    %4 = vector.broadcast %3 : vector<1x128xf32> to vector<128x128xf32>
    %5 = arith.addf %2, %4 : vector<128x128xf32>
    %cst_5 = arith.constant 0.000000e+00 : f32
    %6 = vector.broadcast %cst_5 : f32 to vector<128x128xf32>
    %7 = arith.maximumf %5, %6 : vector<128x128xf32>
    %8 = arith.truncf %7 : vector<128x128xf32> to vector<128x128xbf16>
    %c0_6 = arith.constant 0 : index
    %c0_7 = arith.constant 0 : index
    %9 = vector.load %arg4[%c0_6, %c0_7] : memref<128x128xbf16, #tpu.memory_space<vmem>>, vector<128x128xbf16>
    tpu.vector_store %arg4[%c0_6, %c0_7], %8 {strides = array<i32>} : memref<128x128xbf16, #tpu.memory_space<vmem>>, vector<128x128xbf16>,
    return
  }
  func.func @transform_0(%arg0: i32) -> (i32, i32) {
    %c0_i32 = arith.constant 0 : i32
    %c0_i32_0 = arith.constant 0 : i32
    return %arg0, %c0_i32 : i32, i32
  }
  func.func @transform_1(%arg0: i32) -> (i32, i32) {
    %c0_i32 = arith.constant 0 : i32
    %c0_i32_0 = arith.constant 0 : i32
    %c0_i32_1 = arith.constant 0 : i32
    return %c0_i32, %c0_i32_0 : i32, i32
  }
  func.func @transform_2(%arg0: i32) -> (i32, i32) {
    %c0_i32 = arith.constant 0 : i32
    %c0_i32_0 = arith.constant 0 : i32
    %c0_i32_1 = arith.constant 0 : i32
    return %c0_i32, %c0_i32_0 : i32, i32
  }
  func.func @transform_3(%arg0: i32) -> (i32, i32) {
    %c0_i32 = arith.constant 0 : i32
    %c0_i32_0 = arith.constant 0 : i32
    return %arg0, %c0_i32 : i32, i32
  }
}

module attributes {stable_mosaic.version = 11 : i64} {
  func.func @_pw_flat_kernel(%arg0: i32, %arg1: memref<32x128xbf16, #tpu.memory_space<vmem>>, %arg2: memref<128x24xbf16, #tpu.memory_space<vmem>>, %arg3: memref<1x24xf32, #tpu.memory_space<vmem>>, %arg4: memref<32x24xbf16, #tpu.memory_space<vmem>>) attributes {dimension_semantics = [#tpu.dimension_semantics<parallel>], iteration_bounds = array<i64: 1>, scalar_prefetch = 0 : i64, scratch_operands = 0 : i64, tpu.core_type = #tpu.core_type<tc>, window_params = [{transform_indices = @transform_0, window_bounds = array<i64: 32, 128>}, {pipeline_mode = #tpu.pipeline_mode<synchronous>, transform_indices = @transform_1, window_bounds = array<i64: 128, 24>}, {pipeline_mode = #tpu.pipeline_mode<synchronous>, transform_indices = @transform_2, window_bounds = array<i64: 1, 24>}, {transform_indices = @transform_3, window_bounds = array<i64: 32, 24>}]} {
    %c0 = arith.constant 0 : index
    %c0_0 = arith.constant 0 : index
    %0 = vector.load %arg1[%c0, %c0_0] : memref<32x128xbf16, #tpu.memory_space<vmem>>, vector<32x128xbf16>
    %c0_1 = arith.constant 0 : index
    %c0_2 = arith.constant 0 : index
    %1 = vector.load %arg2[%c0_1, %c0_2] : memref<128x24xbf16, #tpu.memory_space<vmem>>, vector<128x24xbf16>
    %cst = arith.constant dense<0.000000e+00> : vector<32x24xf32>
    %2 = tpu.matmul %0, %1, %cst {dimension_numbers = #tpu.dot_dimension_numbers<[1], [0], [0], [1], [0, 0, 1, 1], [], []>} : vector<32x128xbf16>, vector<128x24xbf16>, vector<32x24xf32> -> vector<32x24xf32>
    %c0_3 = arith.constant 0 : index
    %c0_4 = arith.constant 0 : index
    %3 = vector.load %arg3[%c0_3, %c0_4] : memref<1x24xf32, #tpu.memory_space<vmem>>, vector<1x24xf32>
    %4 = vector.broadcast %3 : vector<1x24xf32> to vector<32x24xf32>
    %5 = arith.addf %2, %4 : vector<32x24xf32>
    %6 = arith.truncf %5 : vector<32x24xf32> to vector<32x24xbf16>
    %c0_5 = arith.constant 0 : index
    %c0_6 = arith.constant 0 : index
    %7 = vector.load %arg4[%c0_5, %c0_6] : memref<32x24xbf16, #tpu.memory_space<vmem>>, vector<32x24xbf16>
    tpu.vector_store %arg4[%c0_5, %c0_6], %6 {strides = array<i32>} : memref<32x24xbf16, #tpu.memory_space<vmem>>, vector<32x24xbf16>,
    return
  }
  func.func @transform_0(%arg0: i32) -> (i32, i32) {
    %c0_i32 = arith.constant 0 : i32
    %c0_i32_0 = arith.constant 0 : i32
    return %arg0, %c0_i32 : i32, i32
  }
  func.func @transform_1(%arg0: i32) -> (i32, i32) {
    %c0_i32 = arith.constant 0 : i32
    %c0_i32_0 = arith.constant 0 : i32
    %c0_i32_1 = arith.constant 0 : i32
    return %c0_i32, %c0_i32_0 : i32, i32
  }
  func.func @transform_2(%arg0: i32) -> (i32, i32) {
    %c0_i32 = arith.constant 0 : i32
    %c0_i32_0 = arith.constant 0 : i32
    %c0_i32_1 = arith.constant 0 : i32
    return %c0_i32, %c0_i32_0 : i32, i32
  }
  func.func @transform_3(%arg0: i32) -> (i32, i32) {
    %c0_i32 = arith.constant 0 : i32
    %c0_i32_0 = arith.constant 0 : i32
    return %arg0, %c0_i32 : i32, i32
  }
}

module attributes {stable_mosaic.version = 11 : i64} {
  func.func @_dw_kernel(%arg0: i32, %arg1: i32, %arg2: memref<1x4x5x5x128xbf16, #tpu.memory_space<vmem>>, %arg3: memref<9x1x128xf32, #tpu.memory_space<vmem>>, %arg4: memref<1x128xf32, #tpu.memory_space<vmem>>, %arg5: memref<1x4x4x128xbf16, #tpu.memory_space<vmem>>) attributes {dimension_semantics = [#tpu.dimension_semantics<parallel>, #tpu.dimension_semantics<parallel>], iteration_bounds = array<i64: 2, 1>, scalar_prefetch = 0 : i64, scratch_operands = 0 : i64, tpu.core_type = #tpu.core_type<tc>, window_params = [{transform_indices = @transform_0, window_bounds = array<i64: 1, 4, 5, 5, 128>}, {pipeline_mode = #tpu.pipeline_mode<synchronous>, transform_indices = @transform_1, window_bounds = array<i64: 9, 1, 128>}, {pipeline_mode = #tpu.pipeline_mode<synchronous>, transform_indices = @transform_2, window_bounds = array<i64: 1, 128>}, {transform_indices = @transform_3, window_bounds = array<i64: 1, 4, 4, 128>}]} {
    %c4_i32 = arith.constant 4 : i32
    %0 = arith.muli %arg1, %c4_i32 : i32
    %cst = arith.constant 0.000000e+00 : f32
    %1 = vector.broadcast %cst : f32 to vector<4x4x128xf32>
    %c0_i32 = arith.constant 0 : i32
    %2 = arith.addi %0, %c0_i32 : i32
    %c0 = arith.constant 0 : index
    %c0_0 = arith.constant 0 : index
    %3 = arith.index_cast %2 : i32 to index
    %c0_1 = arith.constant 0 : index
    %c0_2 = arith.constant 0 : index
    %4 = vector.load %arg2[%c0, %c0_0, %3, %c0_1, %c0_2] : memref<1x4x5x5x128xbf16, #tpu.memory_space<vmem>>, vector<1x1x4x4x128xbf16>
    %5 = vector.shape_cast %4 : vector<1x1x4x4x128xbf16> to vector<4x4x128xbf16>
    %6 = arith.extf %5 : vector<4x4x128xbf16> to vector<4x4x128xf32>
    %c0_3 = arith.constant 0 : index
    %c0_4 = arith.constant 0 : index
    %c0_5 = arith.constant 0 : index
    %7 = vector.load %arg3[%c0_3, %c0_4, %c0_5] : memref<9x1x128xf32, #tpu.memory_space<vmem>>, vector<1x1x128xf32>
    %8 = vector.shape_cast %7 : vector<1x1x128xf32> to vector<1x128xf32>
    %9 = vector.shape_cast %8 : vector<1x128xf32> to vector<1x1x128xf32>
    %10 = vector.broadcast %9 : vector<1x1x128xf32> to vector<4x4x128xf32>
    %11 = arith.mulf %6, %10 : vector<4x4x128xf32>
    %12 = arith.addf %1, %11 : vector<4x4x128xf32>
    %c0_i32_6 = arith.constant 0 : i32
    %13 = arith.addi %0, %c0_i32_6 : i32
    %c0_7 = arith.constant 0 : index
    %c1 = arith.constant 1 : index
    %14 = arith.index_cast %13 : i32 to index
    %c0_8 = arith.constant 0 : index
    %c0_9 = arith.constant 0 : index
    %15 = vector.load %arg2[%c0_7, %c1, %14, %c0_8, %c0_9] : memref<1x4x5x5x128xbf16, #tpu.memory_space<vmem>>, vector<1x1x4x4x128xbf16>
    %16 = vector.shape_cast %15 : vector<1x1x4x4x128xbf16> to vector<4x4x128xbf16>
    %17 = arith.extf %16 : vector<4x4x128xbf16> to vector<4x4x128xf32>
    %c1_10 = arith.constant 1 : index
    %c0_11 = arith.constant 0 : index
    %c0_12 = arith.constant 0 : index
    %18 = vector.load %arg3[%c1_10, %c0_11, %c0_12] : memref<9x1x128xf32, #tpu.memory_space<vmem>>, vector<1x1x128xf32>
    %19 = vector.shape_cast %18 : vector<1x1x128xf32> to vector<1x128xf32>
    %20 = vector.shape_cast %19 : vector<1x128xf32> to vector<1x1x128xf32>
    %21 = vector.broadcast %20 : vector<1x1x128xf32> to vector<4x4x128xf32>
    %22 = arith.mulf %17, %21 : vector<4x4x128xf32>
    %23 = arith.addf %12, %22 : vector<4x4x128xf32>
    %c0_i32_13 = arith.constant 0 : i32
    %24 = arith.addi %0, %c0_i32_13 : i32
    %c0_14 = arith.constant 0 : index
    %c0_15 = arith.constant 0 : index
    %25 = arith.index_cast %24 : i32 to index
    %c1_16 = arith.constant 1 : index
    %c0_17 = arith.constant 0 : index
    %26 = vector.load %arg2[%c0_14, %c0_15, %25, %c1_16, %c0_17] : memref<1x4x5x5x128xbf16, #tpu.memory_space<vmem>>, vector<1x1x4x4x128xbf16>
    %27 = vector.shape_cast %26 : vector<1x1x4x4x128xbf16> to vector<4x4x128xbf16>
    %28 = arith.extf %27 : vector<4x4x128xbf16> to vector<4x4x128xf32>
    %c2 = arith.constant 2 : index
    %c0_18 = arith.constant 0 : index
    %c0_19 = arith.constant 0 : index
    %29 = vector.load %arg3[%c2, %c0_18, %c0_19] : memref<9x1x128xf32, #tpu.memory_space<vmem>>, vector<1x1x128xf32>
    %30 = vector.shape_cast %29 : vector<1x1x128xf32> to vector<1x128xf32>
    %31 = vector.shape_cast %30 : vector<1x128xf32> to vector<1x1x128xf32>
    %32 = vector.broadcast %31 : vector<1x1x128xf32> to vector<4x4x128xf32>
    %33 = arith.mulf %28, %32 : vector<4x4x128xf32>
    %34 = arith.addf %23, %33 : vector<4x4x128xf32>
    %c0_i32_20 = arith.constant 0 : i32
    %35 = arith.addi %0, %c0_i32_20 : i32
    %c0_21 = arith.constant 0 : index
    %c2_22 = arith.constant 2 : index
    %36 = arith.index_cast %35 : i32 to index
    %c0_23 = arith.constant 0 : index
    %c0_24 = arith.constant 0 : index
    %37 = vector.load %arg2[%c0_21, %c2_22, %36, %c0_23, %c0_24] : memref<1x4x5x5x128xbf16, #tpu.memory_space<vmem>>, vector<1x1x4x4x128xbf16>
    %38 = vector.shape_cast %37 : vector<1x1x4x4x128xbf16> to vector<4x4x128xbf16>
    %39 = arith.extf %38 : vector<4x4x128xbf16> to vector<4x4x128xf32>
    %c3 = arith.constant 3 : index
    %c0_25 = arith.constant 0 : index
    %c0_26 = arith.constant 0 : index
    %40 = vector.load %arg3[%c3, %c0_25, %c0_26] : memref<9x1x128xf32, #tpu.memory_space<vmem>>, vector<1x1x128xf32>
    %41 = vector.shape_cast %40 : vector<1x1x128xf32> to vector<1x128xf32>
    %42 = vector.shape_cast %41 : vector<1x128xf32> to vector<1x1x128xf32>
    %43 = vector.broadcast %42 : vector<1x1x128xf32> to vector<4x4x128xf32>
    %44 = arith.mulf %39, %43 : vector<4x4x128xf32>
    %45 = arith.addf %34, %44 : vector<4x4x128xf32>
    %c0_i32_27 = arith.constant 0 : i32
    %46 = arith.addi %0, %c0_i32_27 : i32
    %c0_28 = arith.constant 0 : index
    %c3_29 = arith.constant 3 : index
    %47 = arith.index_cast %46 : i32 to index
    %c0_30 = arith.constant 0 : index
    %c0_31 = arith.constant 0 : index
    %48 = vector.load %arg2[%c0_28, %c3_29, %47, %c0_30, %c0_31] : memref<1x4x5x5x128xbf16, #tpu.memory_space<vmem>>, vector<1x1x4x4x128xbf16>
    %49 = vector.shape_cast %48 : vector<1x1x4x4x128xbf16> to vector<4x4x128xbf16>
    %50 = arith.extf %49 : vector<4x4x128xbf16> to vector<4x4x128xf32>
    %c4 = arith.constant 4 : index
    %c0_32 = arith.constant 0 : index
    %c0_33 = arith.constant 0 : index
    %51 = vector.load %arg3[%c4, %c0_32, %c0_33] : memref<9x1x128xf32, #tpu.memory_space<vmem>>, vector<1x1x128xf32>
    %52 = vector.shape_cast %51 : vector<1x1x128xf32> to vector<1x128xf32>
    %53 = vector.shape_cast %52 : vector<1x128xf32> to vector<1x1x128xf32>
    %54 = vector.broadcast %53 : vector<1x1x128xf32> to vector<4x4x128xf32>
    %55 = arith.mulf %50, %54 : vector<4x4x128xf32>
    %56 = arith.addf %45, %55 : vector<4x4x128xf32>
    %c0_i32_34 = arith.constant 0 : i32
    %57 = arith.addi %0, %c0_i32_34 : i32
    %c0_35 = arith.constant 0 : index
    %c2_36 = arith.constant 2 : index
    %58 = arith.index_cast %57 : i32 to index
    %c1_37 = arith.constant 1 : index
    %c0_38 = arith.constant 0 : index
    %59 = vector.load %arg2[%c0_35, %c2_36, %58, %c1_37, %c0_38] : memref<1x4x5x5x128xbf16, #tpu.memory_space<vmem>>, vector<1x1x4x4x128xbf16>
    %60 = vector.shape_cast %59 : vector<1x1x4x4x128xbf16> to vector<4x4x128xbf16>
    %61 = arith.extf %60 : vector<4x4x128xbf16> to vector<4x4x128xf32>
    %c5 = arith.constant 5 : index
    %c0_39 = arith.constant 0 : index
    %c0_40 = arith.constant 0 : index
    %62 = vector.load %arg3[%c5, %c0_39, %c0_40] : memref<9x1x128xf32, #tpu.memory_space<vmem>>, vector<1x1x128xf32>
    %63 = vector.shape_cast %62 : vector<1x1x128xf32> to vector<1x128xf32>
    %64 = vector.shape_cast %63 : vector<1x128xf32> to vector<1x1x128xf32>
    %65 = vector.broadcast %64 : vector<1x1x128xf32> to vector<4x4x128xf32>
    %66 = arith.mulf %61, %65 : vector<4x4x128xf32>
    %67 = arith.addf %56, %66 : vector<4x4x128xf32>
    %c1_i32 = arith.constant 1 : i32
    %68 = arith.addi %0, %c1_i32 : i32
    %c0_41 = arith.constant 0 : index
    %c0_42 = arith.constant 0 : index
    %69 = arith.index_cast %68 : i32 to index
    %c0_43 = arith.constant 0 : index
    %c0_44 = arith.constant 0 : index
    %70 = vector.load %arg2[%c0_41, %c0_42, %69, %c0_43, %c0_44] : memref<1x4x5x5x128xbf16, #tpu.memory_space<vmem>>, vector<1x1x4x4x128xbf16>
    %71 = vector.shape_cast %70 : vector<1x1x4x4x128xbf16> to vector<4x4x128xbf16>
    %72 = arith.extf %71 : vector<4x4x128xbf16> to vector<4x4x128xf32>
    %c6 = arith.constant 6 : index
    %c0_45 = arith.constant 0 : index
    %c0_46 = arith.constant 0 : index
    %73 = vector.load %arg3[%c6, %c0_45, %c0_46] : memref<9x1x128xf32, #tpu.memory_space<vmem>>, vector<1x1x128xf32>
    %74 = vector.shape_cast %73 : vector<1x1x128xf32> to vector<1x128xf32>
    %75 = vector.shape_cast %74 : vector<1x128xf32> to vector<1x1x128xf32>
    %76 = vector.broadcast %75 : vector<1x1x128xf32> to vector<4x4x128xf32>
    %77 = arith.mulf %72, %76 : vector<4x4x128xf32>
    %78 = arith.addf %67, %77 : vector<4x4x128xf32>
    %c1_i32_47 = arith.constant 1 : i32
    %79 = arith.addi %0, %c1_i32_47 : i32
    %c0_48 = arith.constant 0 : index
    %c1_49 = arith.constant 1 : index
    %80 = arith.index_cast %79 : i32 to index
    %c0_50 = arith.constant 0 : index
    %c0_51 = arith.constant 0 : index
    %81 = vector.load %arg2[%c0_48, %c1_49, %80, %c0_50, %c0_51] : memref<1x4x5x5x128xbf16, #tpu.memory_space<vmem>>, vector<1x1x4x4x128xbf16>
    %82 = vector.shape_cast %81 : vector<1x1x4x4x128xbf16> to vector<4x4x128xbf16>
    %83 = arith.extf %82 : vector<4x4x128xbf16> to vector<4x4x128xf32>
    %c7 = arith.constant 7 : index
    %c0_52 = arith.constant 0 : index
    %c0_53 = arith.constant 0 : index
    %84 = vector.load %arg3[%c7, %c0_52, %c0_53] : memref<9x1x128xf32, #tpu.memory_space<vmem>>, vector<1x1x128xf32>
    %85 = vector.shape_cast %84 : vector<1x1x128xf32> to vector<1x128xf32>
    %86 = vector.shape_cast %85 : vector<1x128xf32> to vector<1x1x128xf32>
    %87 = vector.broadcast %86 : vector<1x1x128xf32> to vector<4x4x128xf32>
    %88 = arith.mulf %83, %87 : vector<4x4x128xf32>
    %89 = arith.addf %78, %88 : vector<4x4x128xf32>
    %c1_i32_54 = arith.constant 1 : i32
    %90 = arith.addi %0, %c1_i32_54 : i32
    %c0_55 = arith.constant 0 : index
    %c0_56 = arith.constant 0 : index
    %91 = arith.index_cast %90 : i32 to index
    %c1_57 = arith.constant 1 : index
    %c0_58 = arith.constant 0 : index
    %92 = vector.load %arg2[%c0_55, %c0_56, %91, %c1_57, %c0_58] : memref<1x4x5x5x128xbf16, #tpu.memory_space<vmem>>, vector<1x1x4x4x128xbf16>
    %93 = vector.shape_cast %92 : vector<1x1x4x4x128xbf16> to vector<4x4x128xbf16>
    %94 = arith.extf %93 : vector<4x4x128xbf16> to vector<4x4x128xf32>
    %c8 = arith.constant 8 : index
    %c0_59 = arith.constant 0 : index
    %c0_60 = arith.constant 0 : index
    %95 = vector.load %arg3[%c8, %c0_59, %c0_60] : memref<9x1x128xf32, #tpu.memory_space<vmem>>, vector<1x1x128xf32>
    %96 = vector.shape_cast %95 : vector<1x1x128xf32> to vector<1x128xf32>
    %97 = vector.shape_cast %96 : vector<1x128xf32> to vector<1x1x128xf32>
    %98 = vector.broadcast %97 : vector<1x1x128xf32> to vector<4x4x128xf32>
    %99 = arith.mulf %94, %98 : vector<4x4x128xf32>
    %100 = arith.addf %89, %99 : vector<4x4x128xf32>
    %c0_61 = arith.constant 0 : index
    %c0_62 = arith.constant 0 : index
    %101 = vector.load %arg4[%c0_61, %c0_62] : memref<1x128xf32, #tpu.memory_space<vmem>>, vector<1x128xf32>
    %102 = vector.shape_cast %101 : vector<1x128xf32> to vector<1x1x128xf32>
    %103 = vector.broadcast %102 : vector<1x1x128xf32> to vector<4x4x128xf32>
    %104 = arith.addf %100, %103 : vector<4x4x128xf32>
    %cst_63 = arith.constant 0.000000e+00 : f32
    %105 = vector.broadcast %cst_63 : f32 to vector<4x4x128xf32>
    %106 = arith.maximumf %104, %105 : vector<4x4x128xf32>
    %107 = arith.truncf %106 : vector<4x4x128xf32> to vector<4x4x128xbf16>
    %c0_64 = arith.constant 0 : index
    %c0_65 = arith.constant 0 : index
    %c0_66 = arith.constant 0 : index
    %c0_67 = arith.constant 0 : index
    %108 = vector.load %arg5[%c0_64, %c0_65, %c0_66, %c0_67] : memref<1x4x4x128xbf16, #tpu.memory_space<vmem>>, vector<1x4x4x128xbf16>
    %109 = vector.shape_cast %108 : vector<1x4x4x128xbf16> to vector<4x4x128xbf16>
    %110 = vector.shape_cast %107 : vector<4x4x128xbf16> to vector<1x4x4x128xbf16>
    tpu.vector_store %arg5[%c0_64, %c0_65, %c0_66, %c0_67], %110 {strides = array<i32>} : memref<1x4x4x128xbf16, #tpu.memory_space<vmem>>, vector<1x4x4x128xbf16>,
    return
  }
  func.func @transform_0(%arg0: i32, %arg1: i32) -> (i32, i32, i32, i32, i32) {
    %c0_i32 = arith.constant 0 : i32
    %c0_i32_0 = arith.constant 0 : i32
    %c0_i32_1 = arith.constant 0 : i32
    %c0_i32_2 = arith.constant 0 : i32
    %c0_i32_3 = arith.constant 0 : i32
    return %arg0, %c0_i32, %c0_i32_0, %c0_i32_1, %c0_i32_2 : i32, i32, i32, i32, i32
  }
  func.func @transform_1(%arg0: i32, %arg1: i32) -> (i32, i32, i32) {
    %c0_i32 = arith.constant 0 : i32
    %c0_i32_0 = arith.constant 0 : i32
    %c0_i32_1 = arith.constant 0 : i32
    %c0_i32_2 = arith.constant 0 : i32
    return %c0_i32, %c0_i32_0, %c0_i32_1 : i32, i32, i32
  }
  func.func @transform_2(%arg0: i32, %arg1: i32) -> (i32, i32) {
    %c0_i32 = arith.constant 0 : i32
    %c0_i32_0 = arith.constant 0 : i32
    %c0_i32_1 = arith.constant 0 : i32
    return %c0_i32, %c0_i32_0 : i32, i32
  }
  func.func @transform_3(%arg0: i32, %arg1: i32) -> (i32, i32, i32, i32) {
    %c0_i32 = arith.constant 0 : i32
    %c0_i32_0 = arith.constant 0 : i32
    %c0_i32_1 = arith.constant 0 : i32
    return %arg0, %arg1, %c0_i32, %c0_i32_0 : i32, i32, i32, i32
  }
}

module attributes {stable_mosaic.version = 11 : i64} {
  func.func @_pw_flat_kernel(%arg0: i32, %arg1: memref<32x24xbf16, #tpu.memory_space<vmem>>, %arg2: memref<24x128xbf16, #tpu.memory_space<vmem>>, %arg3: memref<1x128xf32, #tpu.memory_space<vmem>>, %arg4: memref<32x128xbf16, #tpu.memory_space<vmem>>) attributes {dimension_semantics = [#tpu.dimension_semantics<parallel>], iteration_bounds = array<i64: 1>, scalar_prefetch = 0 : i64, scratch_operands = 0 : i64, tpu.core_type = #tpu.core_type<tc>, window_params = [{transform_indices = @transform_0, window_bounds = array<i64: 32, 24>}, {pipeline_mode = #tpu.pipeline_mode<synchronous>, transform_indices = @transform_1, window_bounds = array<i64: 24, 128>}, {pipeline_mode = #tpu.pipeline_mode<synchronous>, transform_indices = @transform_2, window_bounds = array<i64: 1, 128>}, {transform_indices = @transform_3, window_bounds = array<i64: 32, 128>}]} {
    %c0 = arith.constant 0 : index
    %c0_0 = arith.constant 0 : index
    %0 = vector.load %arg1[%c0, %c0_0] : memref<32x24xbf16, #tpu.memory_space<vmem>>, vector<32x24xbf16>
    %c0_1 = arith.constant 0 : index
    %c0_2 = arith.constant 0 : index
    %1 = vector.load %arg2[%c0_1, %c0_2] : memref<24x128xbf16, #tpu.memory_space<vmem>>, vector<24x128xbf16>
    %cst = arith.constant dense<0.000000e+00> : vector<32x128xf32>
    %2 = tpu.matmul %0, %1, %cst {dimension_numbers = #tpu.dot_dimension_numbers<[1], [0], [0], [1], [0, 0, 1, 1], [], []>} : vector<32x24xbf16>, vector<24x128xbf16>, vector<32x128xf32> -> vector<32x128xf32>
    %c0_3 = arith.constant 0 : index
    %c0_4 = arith.constant 0 : index
    %3 = vector.load %arg3[%c0_3, %c0_4] : memref<1x128xf32, #tpu.memory_space<vmem>>, vector<1x128xf32>
    %4 = vector.broadcast %3 : vector<1x128xf32> to vector<32x128xf32>
    %5 = arith.addf %2, %4 : vector<32x128xf32>
    %cst_5 = arith.constant 3.000000e+00 : f32
    %6 = vector.broadcast %cst_5 : f32 to vector<32x128xf32>
    %7 = arith.addf %5, %6 : vector<32x128xf32>
    %cst_6 = arith.constant 0.000000e+00 : f32
    %cst_7 = arith.constant 6.000000e+00 : f32
    %8 = vector.broadcast %cst_6 : f32 to vector<32x128xf32>
    %9 = arith.maximumf %8, %7 : vector<32x128xf32>
    %10 = vector.broadcast %cst_7 : f32 to vector<32x128xf32>
    %11 = arith.minimumf %10, %9 : vector<32x128xf32>
    %12 = arith.mulf %5, %11 : vector<32x128xf32>
    %cst_8 = arith.constant 0.166666672 : f32
    %13 = vector.broadcast %cst_8 : f32 to vector<32x128xf32>
    %14 = arith.mulf %12, %13 : vector<32x128xf32>
    %15 = arith.truncf %14 : vector<32x128xf32> to vector<32x128xbf16>
    %c0_9 = arith.constant 0 : index
    %c0_10 = arith.constant 0 : index
    %16 = vector.load %arg4[%c0_9, %c0_10] : memref<32x128xbf16, #tpu.memory_space<vmem>>, vector<32x128xbf16>
    tpu.vector_store %arg4[%c0_9, %c0_10], %15 {strides = array<i32>} : memref<32x128xbf16, #tpu.memory_space<vmem>>, vector<32x128xbf16>,
    return
  }
  func.func @transform_0(%arg0: i32) -> (i32, i32) {
    %c0_i32 = arith.constant 0 : i32
    %c0_i32_0 = arith.constant 0 : i32
    return %arg0, %c0_i32 : i32, i32
  }
  func.func @transform_1(%arg0: i32) -> (i32, i32) {
    %c0_i32 = arith.constant 0 : i32
    %c0_i32_0 = arith.constant 0 : i32
    %c0_i32_1 = arith.constant 0 : i32
    return %c0_i32, %c0_i32_0 : i32, i32
  }
  func.func @transform_2(%arg0: i32) -> (i32, i32) {
    %c0_i32 = arith.constant 0 : i32
    %c0_i32_0 = arith.constant 0 : i32
    %c0_i32_1 = arith.constant 0 : i32
    return %c0_i32, %c0_i32_0 : i32, i32
  }
  func.func @transform_3(%arg0: i32) -> (i32, i32) {
    %c0_i32 = arith.constant 0 : i32
    %c0_i32_0 = arith.constant 0 : i32
    return %arg0, %c0_i32 : i32, i32
  }
}

module attributes {stable_mosaic.version = 11 : i64} {
  func.func @_dw_kernel(%arg0: i32, %arg1: i32, %arg2: memref<1x1x8x8x128xbf16, #tpu.memory_space<vmem>>, %arg3: memref<25x1x128xf32, #tpu.memory_space<vmem>>, %arg4: memref<1x128xf32, #tpu.memory_space<vmem>>, %arg5: memref<1x4x4x128xbf16, #tpu.memory_space<vmem>>, %arg6: memref<1x1x1x128xf32, #tpu.memory_space<vmem>>) attributes {dimension_semantics = [#tpu.dimension_semantics<parallel>, #tpu.dimension_semantics<parallel>], iteration_bounds = array<i64: 2, 1>, scalar_prefetch = 0 : i64, scratch_operands = 0 : i64, tpu.core_type = #tpu.core_type<tc>, window_params = [{transform_indices = @transform_0, window_bounds = array<i64: 1, 1, 8, 8, 128>}, {pipeline_mode = #tpu.pipeline_mode<synchronous>, transform_indices = @transform_1, window_bounds = array<i64: 25, 1, 128>}, {pipeline_mode = #tpu.pipeline_mode<synchronous>, transform_indices = @transform_2, window_bounds = array<i64: 1, 128>}, {transform_indices = @transform_3, window_bounds = array<i64: 1, 4, 4, 128>}, {transform_indices = @transform_4, window_bounds = array<i64: 1, 1, 1, 128>}]} {
    %c4_i32 = arith.constant 4 : i32
    %0 = arith.muli %arg1, %c4_i32 : i32
    %cst = arith.constant 0.000000e+00 : f32
    %1 = vector.broadcast %cst : f32 to vector<4x4x128xf32>
    %c0_i32 = arith.constant 0 : i32
    %2 = arith.addi %0, %c0_i32 : i32
    %c0 = arith.constant 0 : index
    %c0_0 = arith.constant 0 : index
    %3 = arith.index_cast %2 : i32 to index
    %c0_1 = arith.constant 0 : index
    %c0_2 = arith.constant 0 : index
    %4 = vector.load %arg2[%c0, %c0_0, %3, %c0_1, %c0_2] : memref<1x1x8x8x128xbf16, #tpu.memory_space<vmem>>, vector<1x1x4x4x128xbf16>
    %5 = vector.shape_cast %4 : vector<1x1x4x4x128xbf16> to vector<4x4x128xbf16>
    %6 = arith.extf %5 : vector<4x4x128xbf16> to vector<4x4x128xf32>
    %c0_3 = arith.constant 0 : index
    %c0_4 = arith.constant 0 : index
    %c0_5 = arith.constant 0 : index
    %7 = vector.load %arg3[%c0_3, %c0_4, %c0_5] : memref<25x1x128xf32, #tpu.memory_space<vmem>>, vector<1x1x128xf32>
    %8 = vector.shape_cast %7 : vector<1x1x128xf32> to vector<1x128xf32>
    %9 = vector.shape_cast %8 : vector<1x128xf32> to vector<1x1x128xf32>
    %10 = vector.broadcast %9 : vector<1x1x128xf32> to vector<4x4x128xf32>
    %11 = arith.mulf %6, %10 : vector<4x4x128xf32>
    %12 = arith.addf %1, %11 : vector<4x4x128xf32>
    %c0_i32_6 = arith.constant 0 : i32
    %13 = arith.addi %0, %c0_i32_6 : i32
    %c0_7 = arith.constant 0 : index
    %c0_8 = arith.constant 0 : index
    %14 = arith.index_cast %13 : i32 to index
    %c1 = arith.constant 1 : index
    %c0_9 = arith.constant 0 : index
    %15 = vector.load %arg2[%c0_7, %c0_8, %14, %c1, %c0_9] : memref<1x1x8x8x128xbf16, #tpu.memory_space<vmem>>, vector<1x1x4x4x128xbf16>
    %16 = vector.shape_cast %15 : vector<1x1x4x4x128xbf16> to vector<4x4x128xbf16>
    %17 = arith.extf %16 : vector<4x4x128xbf16> to vector<4x4x128xf32>
    %c1_10 = arith.constant 1 : index
    %c0_11 = arith.constant 0 : index
    %c0_12 = arith.constant 0 : index
    %18 = vector.load %arg3[%c1_10, %c0_11, %c0_12] : memref<25x1x128xf32, #tpu.memory_space<vmem>>, vector<1x1x128xf32>
    %19 = vector.shape_cast %18 : vector<1x1x128xf32> to vector<1x128xf32>
    %20 = vector.shape_cast %19 : vector<1x128xf32> to vector<1x1x128xf32>
    %21 = vector.broadcast %20 : vector<1x1x128xf32> to vector<4x4x128xf32>
    %22 = arith.mulf %17, %21 : vector<4x4x128xf32>
    %23 = arith.addf %12, %22 : vector<4x4x128xf32>
    %c0_i32_13 = arith.constant 0 : i32
    %24 = arith.addi %0, %c0_i32_13 : i32
    %c0_14 = arith.constant 0 : index
    %c0_15 = arith.constant 0 : index
    %25 = arith.index_cast %24 : i32 to index
    %c2 = arith.constant 2 : index
    %c0_16 = arith.constant 0 : index
    %26 = vector.load %arg2[%c0_14, %c0_15, %25, %c2, %c0_16] : memref<1x1x8x8x128xbf16, #tpu.memory_space<vmem>>, vector<1x1x4x4x128xbf16>
    %27 = vector.shape_cast %26 : vector<1x1x4x4x128xbf16> to vector<4x4x128xbf16>
    %28 = arith.extf %27 : vector<4x4x128xbf16> to vector<4x4x128xf32>
    %c2_17 = arith.constant 2 : index
    %c0_18 = arith.constant 0 : index
    %c0_19 = arith.constant 0 : index
    %29 = vector.load %arg3[%c2_17, %c0_18, %c0_19] : memref<25x1x128xf32, #tpu.memory_space<vmem>>, vector<1x1x128xf32>
    %30 = vector.shape_cast %29 : vector<1x1x128xf32> to vector<1x128xf32>
    %31 = vector.shape_cast %30 : vector<1x128xf32> to vector<1x1x128xf32>
    %32 = vector.broadcast %31 : vector<1x1x128xf32> to vector<4x4x128xf32>
    %33 = arith.mulf %28, %32 : vector<4x4x128xf32>
    %34 = arith.addf %23, %33 : vector<4x4x128xf32>
    %c0_i32_20 = arith.constant 0 : i32
    %35 = arith.addi %0, %c0_i32_20 : i32
    %c0_21 = arith.constant 0 : index
    %c0_22 = arith.constant 0 : index
    %36 = arith.index_cast %35 : i32 to index
    %c3 = arith.constant 3 : index
    %c0_23 = arith.constant 0 : index
    %37 = vector.load %arg2[%c0_21, %c0_22, %36, %c3, %c0_23] : memref<1x1x8x8x128xbf16, #tpu.memory_space<vmem>>, vector<1x1x4x4x128xbf16>
    %38 = vector.shape_cast %37 : vector<1x1x4x4x128xbf16> to vector<4x4x128xbf16>
    %39 = arith.extf %38 : vector<4x4x128xbf16> to vector<4x4x128xf32>
    %c3_24 = arith.constant 3 : index
    %c0_25 = arith.constant 0 : index
    %c0_26 = arith.constant 0 : index
    %40 = vector.load %arg3[%c3_24, %c0_25, %c0_26] : memref<25x1x128xf32, #tpu.memory_space<vmem>>, vector<1x1x128xf32>
    %41 = vector.shape_cast %40 : vector<1x1x128xf32> to vector<1x128xf32>
    %42 = vector.shape_cast %41 : vector<1x128xf32> to vector<1x1x128xf32>
    %43 = vector.broadcast %42 : vector<1x1x128xf32> to vector<4x4x128xf32>
    %44 = arith.mulf %39, %43 : vector<4x4x128xf32>
    %45 = arith.addf %34, %44 : vector<4x4x128xf32>
    %c0_i32_27 = arith.constant 0 : i32
    %46 = arith.addi %0, %c0_i32_27 : i32
    %c0_28 = arith.constant 0 : index
    %c0_29 = arith.constant 0 : index
    %47 = arith.index_cast %46 : i32 to index
    %c4 = arith.constant 4 : index
    %c0_30 = arith.constant 0 : index
    %48 = vector.load %arg2[%c0_28, %c0_29, %47, %c4, %c0_30] : memref<1x1x8x8x128xbf16, #tpu.memory_space<vmem>>, vector<1x1x4x4x128xbf16>
    %49 = vector.shape_cast %48 : vector<1x1x4x4x128xbf16> to vector<4x4x128xbf16>
    %50 = arith.extf %49 : vector<4x4x128xbf16> to vector<4x4x128xf32>
    %c4_31 = arith.constant 4 : index
    %c0_32 = arith.constant 0 : index
    %c0_33 = arith.constant 0 : index
    %51 = vector.load %arg3[%c4_31, %c0_32, %c0_33] : memref<25x1x128xf32, #tpu.memory_space<vmem>>, vector<1x1x128xf32>
    %52 = vector.shape_cast %51 : vector<1x1x128xf32> to vector<1x128xf32>
    %53 = vector.shape_cast %52 : vector<1x128xf32> to vector<1x1x128xf32>
    %54 = vector.broadcast %53 : vector<1x1x128xf32> to vector<4x4x128xf32>
    %55 = arith.mulf %50, %54 : vector<4x4x128xf32>
    %56 = arith.addf %45, %55 : vector<4x4x128xf32>
    %c1_i32 = arith.constant 1 : i32
    %57 = arith.addi %0, %c1_i32 : i32
    %c0_34 = arith.constant 0 : index
    %c0_35 = arith.constant 0 : index
    %58 = arith.index_cast %57 : i32 to index
    %c0_36 = arith.constant 0 : index
    %c0_37 = arith.constant 0 : index
    %59 = vector.load %arg2[%c0_34, %c0_35, %58, %c0_36, %c0_37] : memref<1x1x8x8x128xbf16, #tpu.memory_space<vmem>>, vector<1x1x4x4x128xbf16>
    %60 = vector.shape_cast %59 : vector<1x1x4x4x128xbf16> to vector<4x4x128xbf16>
    %61 = arith.extf %60 : vector<4x4x128xbf16> to vector<4x4x128xf32>
    %c5 = arith.constant 5 : index
    %c0_38 = arith.constant 0 : index
    %c0_39 = arith.constant 0 : index
    %62 = vector.load %arg3[%c5, %c0_38, %c0_39] : memref<25x1x128xf32, #tpu.memory_space<vmem>>, vector<1x1x128xf32>
    %63 = vector.shape_cast %62 : vector<1x1x128xf32> to vector<1x128xf32>
    %64 = vector.shape_cast %63 : vector<1x128xf32> to vector<1x1x128xf32>
    %65 = vector.broadcast %64 : vector<1x1x128xf32> to vector<4x4x128xf32>
    %66 = arith.mulf %61, %65 : vector<4x4x128xf32>
    %67 = arith.addf %56, %66 : vector<4x4x128xf32>
    %c1_i32_40 = arith.constant 1 : i32
    %68 = arith.addi %0, %c1_i32_40 : i32
    %c0_41 = arith.constant 0 : index
    %c0_42 = arith.constant 0 : index
    %69 = arith.index_cast %68 : i32 to index
    %c1_43 = arith.constant 1 : index
    %c0_44 = arith.constant 0 : index
    %70 = vector.load %arg2[%c0_41, %c0_42, %69, %c1_43, %c0_44] : memref<1x1x8x8x128xbf16, #tpu.memory_space<vmem>>, vector<1x1x4x4x128xbf16>
    %71 = vector.shape_cast %70 : vector<1x1x4x4x128xbf16> to vector<4x4x128xbf16>
    %72 = arith.extf %71 : vector<4x4x128xbf16> to vector<4x4x128xf32>
    %c6 = arith.constant 6 : index
    %c0_45 = arith.constant 0 : index
    %c0_46 = arith.constant 0 : index
    %73 = vector.load %arg3[%c6, %c0_45, %c0_46] : memref<25x1x128xf32, #tpu.memory_space<vmem>>, vector<1x1x128xf32>
    %74 = vector.shape_cast %73 : vector<1x1x128xf32> to vector<1x128xf32>
    %75 = vector.shape_cast %74 : vector<1x128xf32> to vector<1x1x128xf32>
    %76 = vector.broadcast %75 : vector<1x1x128xf32> to vector<4x4x128xf32>
    %77 = arith.mulf %72, %76 : vector<4x4x128xf32>
    %78 = arith.addf %67, %77 : vector<4x4x128xf32>
    %c1_i32_47 = arith.constant 1 : i32
    %79 = arith.addi %0, %c1_i32_47 : i32
    %c0_48 = arith.constant 0 : index
    %c0_49 = arith.constant 0 : index
    %80 = arith.index_cast %79 : i32 to index
    %c2_50 = arith.constant 2 : index
    %c0_51 = arith.constant 0 : index
    %81 = vector.load %arg2[%c0_48, %c0_49, %80, %c2_50, %c0_51] : memref<1x1x8x8x128xbf16, #tpu.memory_space<vmem>>, vector<1x1x4x4x128xbf16>
    %82 = vector.shape_cast %81 : vector<1x1x4x4x128xbf16> to vector<4x4x128xbf16>
    %83 = arith.extf %82 : vector<4x4x128xbf16> to vector<4x4x128xf32>
    %c7 = arith.constant 7 : index
    %c0_52 = arith.constant 0 : index
    %c0_53 = arith.constant 0 : index
    %84 = vector.load %arg3[%c7, %c0_52, %c0_53] : memref<25x1x128xf32, #tpu.memory_space<vmem>>, vector<1x1x128xf32>
    %85 = vector.shape_cast %84 : vector<1x1x128xf32> to vector<1x128xf32>
    %86 = vector.shape_cast %85 : vector<1x128xf32> to vector<1x1x128xf32>
    %87 = vector.broadcast %86 : vector<1x1x128xf32> to vector<4x4x128xf32>
    %88 = arith.mulf %83, %87 : vector<4x4x128xf32>
    %89 = arith.addf %78, %88 : vector<4x4x128xf32>
    %c1_i32_54 = arith.constant 1 : i32
    %90 = arith.addi %0, %c1_i32_54 : i32
    %c0_55 = arith.constant 0 : index
    %c0_56 = arith.constant 0 : index
    %91 = arith.index_cast %90 : i32 to index
    %c3_57 = arith.constant 3 : index
    %c0_58 = arith.constant 0 : index
    %92 = vector.load %arg2[%c0_55, %c0_56, %91, %c3_57, %c0_58] : memref<1x1x8x8x128xbf16, #tpu.memory_space<vmem>>, vector<1x1x4x4x128xbf16>
    %93 = vector.shape_cast %92 : vector<1x1x4x4x128xbf16> to vector<4x4x128xbf16>
    %94 = arith.extf %93 : vector<4x4x128xbf16> to vector<4x4x128xf32>
    %c8 = arith.constant 8 : index
    %c0_59 = arith.constant 0 : index
    %c0_60 = arith.constant 0 : index
    %95 = vector.load %arg3[%c8, %c0_59, %c0_60] : memref<25x1x128xf32, #tpu.memory_space<vmem>>, vector<1x1x128xf32>
    %96 = vector.shape_cast %95 : vector<1x1x128xf32> to vector<1x128xf32>
    %97 = vector.shape_cast %96 : vector<1x128xf32> to vector<1x1x128xf32>
    %98 = vector.broadcast %97 : vector<1x1x128xf32> to vector<4x4x128xf32>
    %99 = arith.mulf %94, %98 : vector<4x4x128xf32>
    %100 = arith.addf %89, %99 : vector<4x4x128xf32>
    %c1_i32_61 = arith.constant 1 : i32
    %101 = arith.addi %0, %c1_i32_61 : i32
    %c0_62 = arith.constant 0 : index
    %c0_63 = arith.constant 0 : index
    %102 = arith.index_cast %101 : i32 to index
    %c4_64 = arith.constant 4 : index
    %c0_65 = arith.constant 0 : index
    %103 = vector.load %arg2[%c0_62, %c0_63, %102, %c4_64, %c0_65] : memref<1x1x8x8x128xbf16, #tpu.memory_space<vmem>>, vector<1x1x4x4x128xbf16>
    %104 = vector.shape_cast %103 : vector<1x1x4x4x128xbf16> to vector<4x4x128xbf16>
    %105 = arith.extf %104 : vector<4x4x128xbf16> to vector<4x4x128xf32>
    %c9 = arith.constant 9 : index
    %c0_66 = arith.constant 0 : index
    %c0_67 = arith.constant 0 : index
    %106 = vector.load %arg3[%c9, %c0_66, %c0_67] : memref<25x1x128xf32, #tpu.memory_space<vmem>>, vector<1x1x128xf32>
    %107 = vector.shape_cast %106 : vector<1x1x128xf32> to vector<1x128xf32>
    %108 = vector.shape_cast %107 : vector<1x128xf32> to vector<1x1x128xf32>
    %109 = vector.broadcast %108 : vector<1x1x128xf32> to vector<4x4x128xf32>
    %110 = arith.mulf %105, %109 : vector<4x4x128xf32>
    %111 = arith.addf %100, %110 : vector<4x4x128xf32>
    %c2_i32 = arith.constant 2 : i32
    %112 = arith.addi %0, %c2_i32 : i32
    %c0_68 = arith.constant 0 : index
    %c0_69 = arith.constant 0 : index
    %113 = arith.index_cast %112 : i32 to index
    %c0_70 = arith.constant 0 : index
    %c0_71 = arith.constant 0 : index
    %114 = vector.load %arg2[%c0_68, %c0_69, %113, %c0_70, %c0_71] : memref<1x1x8x8x128xbf16, #tpu.memory_space<vmem>>, vector<1x1x4x4x128xbf16>
    %115 = vector.shape_cast %114 : vector<1x1x4x4x128xbf16> to vector<4x4x128xbf16>
    %116 = arith.extf %115 : vector<4x4x128xbf16> to vector<4x4x128xf32>
    %c10 = arith.constant 10 : index
    %c0_72 = arith.constant 0 : index
    %c0_73 = arith.constant 0 : index
    %117 = vector.load %arg3[%c10, %c0_72, %c0_73] : memref<25x1x128xf32, #tpu.memory_space<vmem>>, vector<1x1x128xf32>
    %118 = vector.shape_cast %117 : vector<1x1x128xf32> to vector<1x128xf32>
    %119 = vector.shape_cast %118 : vector<1x128xf32> to vector<1x1x128xf32>
    %120 = vector.broadcast %119 : vector<1x1x128xf32> to vector<4x4x128xf32>
    %121 = arith.mulf %116, %120 : vector<4x4x128xf32>
    %122 = arith.addf %111, %121 : vector<4x4x128xf32>
    %c2_i32_74 = arith.constant 2 : i32
    %123 = arith.addi %0, %c2_i32_74 : i32
    %c0_75 = arith.constant 0 : index
    %c0_76 = arith.constant 0 : index
    %124 = arith.index_cast %123 : i32 to index
    %c1_77 = arith.constant 1 : index
    %c0_78 = arith.constant 0 : index
    %125 = vector.load %arg2[%c0_75, %c0_76, %124, %c1_77, %c0_78] : memref<1x1x8x8x128xbf16, #tpu.memory_space<vmem>>, vector<1x1x4x4x128xbf16>
    %126 = vector.shape_cast %125 : vector<1x1x4x4x128xbf16> to vector<4x4x128xbf16>
    %127 = arith.extf %126 : vector<4x4x128xbf16> to vector<4x4x128xf32>
    %c11 = arith.constant 11 : index
    %c0_79 = arith.constant 0 : index
    %c0_80 = arith.constant 0 : index
    %128 = vector.load %arg3[%c11, %c0_79, %c0_80] : memref<25x1x128xf32, #tpu.memory_space<vmem>>, vector<1x1x128xf32>
    %129 = vector.shape_cast %128 : vector<1x1x128xf32> to vector<1x128xf32>
    %130 = vector.shape_cast %129 : vector<1x128xf32> to vector<1x1x128xf32>
    %131 = vector.broadcast %130 : vector<1x1x128xf32> to vector<4x4x128xf32>
    %132 = arith.mulf %127, %131 : vector<4x4x128xf32>
    %133 = arith.addf %122, %132 : vector<4x4x128xf32>
    %c2_i32_81 = arith.constant 2 : i32
    %134 = arith.addi %0, %c2_i32_81 : i32
    %c0_82 = arith.constant 0 : index
    %c0_83 = arith.constant 0 : index
    %135 = arith.index_cast %134 : i32 to index
    %c2_84 = arith.constant 2 : index
    %c0_85 = arith.constant 0 : index
    %136 = vector.load %arg2[%c0_82, %c0_83, %135, %c2_84, %c0_85] : memref<1x1x8x8x128xbf16, #tpu.memory_space<vmem>>, vector<1x1x4x4x128xbf16>
    %137 = vector.shape_cast %136 : vector<1x1x4x4x128xbf16> to vector<4x4x128xbf16>
    %138 = arith.extf %137 : vector<4x4x128xbf16> to vector<4x4x128xf32>
    %c12 = arith.constant 12 : index
    %c0_86 = arith.constant 0 : index
    %c0_87 = arith.constant 0 : index
    %139 = vector.load %arg3[%c12, %c0_86, %c0_87] : memref<25x1x128xf32, #tpu.memory_space<vmem>>, vector<1x1x128xf32>
    %140 = vector.shape_cast %139 : vector<1x1x128xf32> to vector<1x128xf32>
    %141 = vector.shape_cast %140 : vector<1x128xf32> to vector<1x1x128xf32>
    %142 = vector.broadcast %141 : vector<1x1x128xf32> to vector<4x4x128xf32>
    %143 = arith.mulf %138, %142 : vector<4x4x128xf32>
    %144 = arith.addf %133, %143 : vector<4x4x128xf32>
    %c2_i32_88 = arith.constant 2 : i32
    %145 = arith.addi %0, %c2_i32_88 : i32
    %c0_89 = arith.constant 0 : index
    %c0_90 = arith.constant 0 : index
    %146 = arith.index_cast %145 : i32 to index
    %c3_91 = arith.constant 3 : index
    %c0_92 = arith.constant 0 : index
    %147 = vector.load %arg2[%c0_89, %c0_90, %146, %c3_91, %c0_92] : memref<1x1x8x8x128xbf16, #tpu.memory_space<vmem>>, vector<1x1x4x4x128xbf16>
    %148 = vector.shape_cast %147 : vector<1x1x4x4x128xbf16> to vector<4x4x128xbf16>
    %149 = arith.extf %148 : vector<4x4x128xbf16> to vector<4x4x128xf32>
    %c13 = arith.constant 13 : index
    %c0_93 = arith.constant 0 : index
    %c0_94 = arith.constant 0 : index
    %150 = vector.load %arg3[%c13, %c0_93, %c0_94] : memref<25x1x128xf32, #tpu.memory_space<vmem>>, vector<1x1x128xf32>
    %151 = vector.shape_cast %150 : vector<1x1x128xf32> to vector<1x128xf32>
    %152 = vector.shape_cast %151 : vector<1x128xf32> to vector<1x1x128xf32>
    %153 = vector.broadcast %152 : vector<1x1x128xf32> to vector<4x4x128xf32>
    %154 = arith.mulf %149, %153 : vector<4x4x128xf32>
    %155 = arith.addf %144, %154 : vector<4x4x128xf32>
    %c2_i32_95 = arith.constant 2 : i32
    %156 = arith.addi %0, %c2_i32_95 : i32
    %c0_96 = arith.constant 0 : index
    %c0_97 = arith.constant 0 : index
    %157 = arith.index_cast %156 : i32 to index
    %c4_98 = arith.constant 4 : index
    %c0_99 = arith.constant 0 : index
    %158 = vector.load %arg2[%c0_96, %c0_97, %157, %c4_98, %c0_99] : memref<1x1x8x8x128xbf16, #tpu.memory_space<vmem>>, vector<1x1x4x4x128xbf16>
    %159 = vector.shape_cast %158 : vector<1x1x4x4x128xbf16> to vector<4x4x128xbf16>
    %160 = arith.extf %159 : vector<4x4x128xbf16> to vector<4x4x128xf32>
    %c14 = arith.constant 14 : index
    %c0_100 = arith.constant 0 : index
    %c0_101 = arith.constant 0 : index
    %161 = vector.load %arg3[%c14, %c0_100, %c0_101] : memref<25x1x128xf32, #tpu.memory_space<vmem>>, vector<1x1x128xf32>
    %162 = vector.shape_cast %161 : vector<1x1x128xf32> to vector<1x128xf32>
    %163 = vector.shape_cast %162 : vector<1x128xf32> to vector<1x1x128xf32>
    %164 = vector.broadcast %163 : vector<1x1x128xf32> to vector<4x4x128xf32>
    %165 = arith.mulf %160, %164 : vector<4x4x128xf32>
    %166 = arith.addf %155, %165 : vector<4x4x128xf32>
    %c3_i32 = arith.constant 3 : i32
    %167 = arith.addi %0, %c3_i32 : i32
    %c0_102 = arith.constant 0 : index
    %c0_103 = arith.constant 0 : index
    %168 = arith.index_cast %167 : i32 to index
    %c0_104 = arith.constant 0 : index
    %c0_105 = arith.constant 0 : index
    %169 = vector.load %arg2[%c0_102, %c0_103, %168, %c0_104, %c0_105] : memref<1x1x8x8x128xbf16, #tpu.memory_space<vmem>>, vector<1x1x4x4x128xbf16>
    %170 = vector.shape_cast %169 : vector<1x1x4x4x128xbf16> to vector<4x4x128xbf16>
    %171 = arith.extf %170 : vector<4x4x128xbf16> to vector<4x4x128xf32>
    %c15 = arith.constant 15 : index
    %c0_106 = arith.constant 0 : index
    %c0_107 = arith.constant 0 : index
    %172 = vector.load %arg3[%c15, %c0_106, %c0_107] : memref<25x1x128xf32, #tpu.memory_space<vmem>>, vector<1x1x128xf32>
    %173 = vector.shape_cast %172 : vector<1x1x128xf32> to vector<1x128xf32>
    %174 = vector.shape_cast %173 : vector<1x128xf32> to vector<1x1x128xf32>
    %175 = vector.broadcast %174 : vector<1x1x128xf32> to vector<4x4x128xf32>
    %176 = arith.mulf %171, %175 : vector<4x4x128xf32>
    %177 = arith.addf %166, %176 : vector<4x4x128xf32>
    %c3_i32_108 = arith.constant 3 : i32
    %178 = arith.addi %0, %c3_i32_108 : i32
    %c0_109 = arith.constant 0 : index
    %c0_110 = arith.constant 0 : index
    %179 = arith.index_cast %178 : i32 to index
    %c1_111 = arith.constant 1 : index
    %c0_112 = arith.constant 0 : index
    %180 = vector.load %arg2[%c0_109, %c0_110, %179, %c1_111, %c0_112] : memref<1x1x8x8x128xbf16, #tpu.memory_space<vmem>>, vector<1x1x4x4x128xbf16>
    %181 = vector.shape_cast %180 : vector<1x1x4x4x128xbf16> to vector<4x4x128xbf16>
    %182 = arith.extf %181 : vector<4x4x128xbf16> to vector<4x4x128xf32>
    %c16 = arith.constant 16 : index
    %c0_113 = arith.constant 0 : index
    %c0_114 = arith.constant 0 : index
    %183 = vector.load %arg3[%c16, %c0_113, %c0_114] : memref<25x1x128xf32, #tpu.memory_space<vmem>>, vector<1x1x128xf32>
    %184 = vector.shape_cast %183 : vector<1x1x128xf32> to vector<1x128xf32>
    %185 = vector.shape_cast %184 : vector<1x128xf32> to vector<1x1x128xf32>
    %186 = vector.broadcast %185 : vector<1x1x128xf32> to vector<4x4x128xf32>
    %187 = arith.mulf %182, %186 : vector<4x4x128xf32>
    %188 = arith.addf %177, %187 : vector<4x4x128xf32>
    %c3_i32_115 = arith.constant 3 : i32
    %189 = arith.addi %0, %c3_i32_115 : i32
    %c0_116 = arith.constant 0 : index
    %c0_117 = arith.constant 0 : index
    %190 = arith.index_cast %189 : i32 to index
    %c2_118 = arith.constant 2 : index
    %c0_119 = arith.constant 0 : index
    %191 = vector.load %arg2[%c0_116, %c0_117, %190, %c2_118, %c0_119] : memref<1x1x8x8x128xbf16, #tpu.memory_space<vmem>>, vector<1x1x4x4x128xbf16>
    %192 = vector.shape_cast %191 : vector<1x1x4x4x128xbf16> to vector<4x4x128xbf16>
    %193 = arith.extf %192 : vector<4x4x128xbf16> to vector<4x4x128xf32>
    %c17 = arith.constant 17 : index
    %c0_120 = arith.constant 0 : index
    %c0_121 = arith.constant 0 : index
    %194 = vector.load %arg3[%c17, %c0_120, %c0_121] : memref<25x1x128xf32, #tpu.memory_space<vmem>>, vector<1x1x128xf32>
    %195 = vector.shape_cast %194 : vector<1x1x128xf32> to vector<1x128xf32>
    %196 = vector.shape_cast %195 : vector<1x128xf32> to vector<1x1x128xf32>
    %197 = vector.broadcast %196 : vector<1x1x128xf32> to vector<4x4x128xf32>
    %198 = arith.mulf %193, %197 : vector<4x4x128xf32>
    %199 = arith.addf %188, %198 : vector<4x4x128xf32>
    %c3_i32_122 = arith.constant 3 : i32
    %200 = arith.addi %0, %c3_i32_122 : i32
    %c0_123 = arith.constant 0 : index
    %c0_124 = arith.constant 0 : index
    %201 = arith.index_cast %200 : i32 to index
    %c3_125 = arith.constant 3 : index
    %c0_126 = arith.constant 0 : index
    %202 = vector.load %arg2[%c0_123, %c0_124, %201, %c3_125, %c0_126] : memref<1x1x8x8x128xbf16, #tpu.memory_space<vmem>>, vector<1x1x4x4x128xbf16>
    %203 = vector.shape_cast %202 : vector<1x1x4x4x128xbf16> to vector<4x4x128xbf16>
    %204 = arith.extf %203 : vector<4x4x128xbf16> to vector<4x4x128xf32>
    %c18 = arith.constant 18 : index
    %c0_127 = arith.constant 0 : index
    %c0_128 = arith.constant 0 : index
    %205 = vector.load %arg3[%c18, %c0_127, %c0_128] : memref<25x1x128xf32, #tpu.memory_space<vmem>>, vector<1x1x128xf32>
    %206 = vector.shape_cast %205 : vector<1x1x128xf32> to vector<1x128xf32>
    %207 = vector.shape_cast %206 : vector<1x128xf32> to vector<1x1x128xf32>
    %208 = vector.broadcast %207 : vector<1x1x128xf32> to vector<4x4x128xf32>
    %209 = arith.mulf %204, %208 : vector<4x4x128xf32>
    %210 = arith.addf %199, %209 : vector<4x4x128xf32>
    %c3_i32_129 = arith.constant 3 : i32
    %211 = arith.addi %0, %c3_i32_129 : i32
    %c0_130 = arith.constant 0 : index
    %c0_131 = arith.constant 0 : index
    %212 = arith.index_cast %211 : i32 to index
    %c4_132 = arith.constant 4 : index
    %c0_133 = arith.constant 0 : index
    %213 = vector.load %arg2[%c0_130, %c0_131, %212, %c4_132, %c0_133] : memref<1x1x8x8x128xbf16, #tpu.memory_space<vmem>>, vector<1x1x4x4x128xbf16>
    %214 = vector.shape_cast %213 : vector<1x1x4x4x128xbf16> to vector<4x4x128xbf16>
    %215 = arith.extf %214 : vector<4x4x128xbf16> to vector<4x4x128xf32>
    %c19 = arith.constant 19 : index
    %c0_134 = arith.constant 0 : index
    %c0_135 = arith.constant 0 : index
    %216 = vector.load %arg3[%c19, %c0_134, %c0_135] : memref<25x1x128xf32, #tpu.memory_space<vmem>>, vector<1x1x128xf32>
    %217 = vector.shape_cast %216 : vector<1x1x128xf32> to vector<1x128xf32>
    %218 = vector.shape_cast %217 : vector<1x128xf32> to vector<1x1x128xf32>
    %219 = vector.broadcast %218 : vector<1x1x128xf32> to vector<4x4x128xf32>
    %220 = arith.mulf %215, %219 : vector<4x4x128xf32>
    %221 = arith.addf %210, %220 : vector<4x4x128xf32>
    %c4_i32_136 = arith.constant 4 : i32
    %222 = arith.addi %0, %c4_i32_136 : i32
    %c0_137 = arith.constant 0 : index
    %c0_138 = arith.constant 0 : index
    %223 = arith.index_cast %222 : i32 to index
    %c0_139 = arith.constant 0 : index
    %c0_140 = arith.constant 0 : index
    %224 = vector.load %arg2[%c0_137, %c0_138, %223, %c0_139, %c0_140] : memref<1x1x8x8x128xbf16, #tpu.memory_space<vmem>>, vector<1x1x4x4x128xbf16>
    %225 = vector.shape_cast %224 : vector<1x1x4x4x128xbf16> to vector<4x4x128xbf16>
    %226 = arith.extf %225 : vector<4x4x128xbf16> to vector<4x4x128xf32>
    %c20 = arith.constant 20 : index
    %c0_141 = arith.constant 0 : index
    %c0_142 = arith.constant 0 : index
    %227 = vector.load %arg3[%c20, %c0_141, %c0_142] : memref<25x1x128xf32, #tpu.memory_space<vmem>>, vector<1x1x128xf32>
    %228 = vector.shape_cast %227 : vector<1x1x128xf32> to vector<1x128xf32>
    %229 = vector.shape_cast %228 : vector<1x128xf32> to vector<1x1x128xf32>
    %230 = vector.broadcast %229 : vector<1x1x128xf32> to vector<4x4x128xf32>
    %231 = arith.mulf %226, %230 : vector<4x4x128xf32>
    %232 = arith.addf %221, %231 : vector<4x4x128xf32>
    %c4_i32_143 = arith.constant 4 : i32
    %233 = arith.addi %0, %c4_i32_143 : i32
    %c0_144 = arith.constant 0 : index
    %c0_145 = arith.constant 0 : index
    %234 = arith.index_cast %233 : i32 to index
    %c1_146 = arith.constant 1 : index
    %c0_147 = arith.constant 0 : index
    %235 = vector.load %arg2[%c0_144, %c0_145, %234, %c1_146, %c0_147] : memref<1x1x8x8x128xbf16, #tpu.memory_space<vmem>>, vector<1x1x4x4x128xbf16>
    %236 = vector.shape_cast %235 : vector<1x1x4x4x128xbf16> to vector<4x4x128xbf16>
    %237 = arith.extf %236 : vector<4x4x128xbf16> to vector<4x4x128xf32>
    %c21 = arith.constant 21 : index
    %c0_148 = arith.constant 0 : index
    %c0_149 = arith.constant 0 : index
    %238 = vector.load %arg3[%c21, %c0_148, %c0_149] : memref<25x1x128xf32, #tpu.memory_space<vmem>>, vector<1x1x128xf32>
    %239 = vector.shape_cast %238 : vector<1x1x128xf32> to vector<1x128xf32>
    %240 = vector.shape_cast %239 : vector<1x128xf32> to vector<1x1x128xf32>
    %241 = vector.broadcast %240 : vector<1x1x128xf32> to vector<4x4x128xf32>
    %242 = arith.mulf %237, %241 : vector<4x4x128xf32>
    %243 = arith.addf %232, %242 : vector<4x4x128xf32>
    %c4_i32_150 = arith.constant 4 : i32
    %244 = arith.addi %0, %c4_i32_150 : i32
    %c0_151 = arith.constant 0 : index
    %c0_152 = arith.constant 0 : index
    %245 = arith.index_cast %244 : i32 to index
    %c2_153 = arith.constant 2 : index
    %c0_154 = arith.constant 0 : index
    %246 = vector.load %arg2[%c0_151, %c0_152, %245, %c2_153, %c0_154] : memref<1x1x8x8x128xbf16, #tpu.memory_space<vmem>>, vector<1x1x4x4x128xbf16>
    %247 = vector.shape_cast %246 : vector<1x1x4x4x128xbf16> to vector<4x4x128xbf16>
    %248 = arith.extf %247 : vector<4x4x128xbf16> to vector<4x4x128xf32>
    %c22 = arith.constant 22 : index
    %c0_155 = arith.constant 0 : index
    %c0_156 = arith.constant 0 : index
    %249 = vector.load %arg3[%c22, %c0_155, %c0_156] : memref<25x1x128xf32, #tpu.memory_space<vmem>>, vector<1x1x128xf32>
    %250 = vector.shape_cast %249 : vector<1x1x128xf32> to vector<1x128xf32>
    %251 = vector.shape_cast %250 : vector<1x128xf32> to vector<1x1x128xf32>
    %252 = vector.broadcast %251 : vector<1x1x128xf32> to vector<4x4x128xf32>
    %253 = arith.mulf %248, %252 : vector<4x4x128xf32>
    %254 = arith.addf %243, %253 : vector<4x4x128xf32>
    %c4_i32_157 = arith.constant 4 : i32
    %255 = arith.addi %0, %c4_i32_157 : i32
    %c0_158 = arith.constant 0 : index
    %c0_159 = arith.constant 0 : index
    %256 = arith.index_cast %255 : i32 to index
    %c3_160 = arith.constant 3 : index
    %c0_161 = arith.constant 0 : index
    %257 = vector.load %arg2[%c0_158, %c0_159, %256, %c3_160, %c0_161] : memref<1x1x8x8x128xbf16, #tpu.memory_space<vmem>>, vector<1x1x4x4x128xbf16>
    %258 = vector.shape_cast %257 : vector<1x1x4x4x128xbf16> to vector<4x4x128xbf16>
    %259 = arith.extf %258 : vector<4x4x128xbf16> to vector<4x4x128xf32>
    %c23 = arith.constant 23 : index
    %c0_162 = arith.constant 0 : index
    %c0_163 = arith.constant 0 : index
    %260 = vector.load %arg3[%c23, %c0_162, %c0_163] : memref<25x1x128xf32, #tpu.memory_space<vmem>>, vector<1x1x128xf32>
    %261 = vector.shape_cast %260 : vector<1x1x128xf32> to vector<1x128xf32>
    %262 = vector.shape_cast %261 : vector<1x128xf32> to vector<1x1x128xf32>
    %263 = vector.broadcast %262 : vector<1x1x128xf32> to vector<4x4x128xf32>
    %264 = arith.mulf %259, %263 : vector<4x4x128xf32>
    %265 = arith.addf %254, %264 : vector<4x4x128xf32>
    %c4_i32_164 = arith.constant 4 : i32
    %266 = arith.addi %0, %c4_i32_164 : i32
    %c0_165 = arith.constant 0 : index
    %c0_166 = arith.constant 0 : index
    %267 = arith.index_cast %266 : i32 to index
    %c4_167 = arith.constant 4 : index
    %c0_168 = arith.constant 0 : index
    %268 = vector.load %arg2[%c0_165, %c0_166, %267, %c4_167, %c0_168] : memref<1x1x8x8x128xbf16, #tpu.memory_space<vmem>>, vector<1x1x4x4x128xbf16>
    %269 = vector.shape_cast %268 : vector<1x1x4x4x128xbf16> to vector<4x4x128xbf16>
    %270 = arith.extf %269 : vector<4x4x128xbf16> to vector<4x4x128xf32>
    %c24 = arith.constant 24 : index
    %c0_169 = arith.constant 0 : index
    %c0_170 = arith.constant 0 : index
    %271 = vector.load %arg3[%c24, %c0_169, %c0_170] : memref<25x1x128xf32, #tpu.memory_space<vmem>>, vector<1x1x128xf32>
    %272 = vector.shape_cast %271 : vector<1x1x128xf32> to vector<1x128xf32>
    %273 = vector.shape_cast %272 : vector<1x128xf32> to vector<1x1x128xf32>
    %274 = vector.broadcast %273 : vector<1x1x128xf32> to vector<4x4x128xf32>
    %275 = arith.mulf %270, %274 : vector<4x4x128xf32>
    %276 = arith.addf %265, %275 : vector<4x4x128xf32>
    %c0_171 = arith.constant 0 : index
    %c0_172 = arith.constant 0 : index
    %277 = vector.load %arg4[%c0_171, %c0_172] : memref<1x128xf32, #tpu.memory_space<vmem>>, vector<1x128xf32>
    %278 = vector.shape_cast %277 : vector<1x128xf32> to vector<1x1x128xf32>
    %279 = vector.broadcast %278 : vector<1x1x128xf32> to vector<4x4x128xf32>
    %280 = arith.addf %276, %279 : vector<4x4x128xf32>
    %cst_173 = arith.constant 3.000000e+00 : f32
    %281 = vector.broadcast %cst_173 : f32 to vector<4x4x128xf32>
    %282 = arith.addf %280, %281 : vector<4x4x128xf32>
    %cst_174 = arith.constant 0.000000e+00 : f32
    %cst_175 = arith.constant 6.000000e+00 : f32
    %283 = vector.broadcast %cst_174 : f32 to vector<4x4x128xf32>
    %284 = arith.maximumf %283, %282 : vector<4x4x128xf32>
    %285 = vector.broadcast %cst_175 : f32 to vector<4x4x128xf32>
    %286 = arith.minimumf %285, %284 : vector<4x4x128xf32>
    %287 = arith.mulf %280, %286 : vector<4x4x128xf32>
    %cst_176 = arith.constant 0.166666672 : f32
    %288 = vector.broadcast %cst_176 : f32 to vector<4x4x128xf32>
    %289 = arith.mulf %287, %288 : vector<4x4x128xf32>
    %290 = arith.truncf %289 : vector<4x4x128xf32> to vector<4x4x128xbf16>
    %c0_177 = arith.constant 0 : index
    %c0_178 = arith.constant 0 : index
    %c0_179 = arith.constant 0 : index
    %c0_180 = arith.constant 0 : index
    %291 = vector.load %arg5[%c0_177, %c0_178, %c0_179, %c0_180] : memref<1x4x4x128xbf16, #tpu.memory_space<vmem>>, vector<1x4x4x128xbf16>
    %292 = vector.shape_cast %291 : vector<1x4x4x128xbf16> to vector<4x4x128xbf16>
    %293 = vector.shape_cast %290 : vector<4x4x128xbf16> to vector<1x4x4x128xbf16>
    tpu.vector_store %arg5[%c0_177, %c0_178, %c0_179, %c0_180], %293 {strides = array<i32>} : memref<1x4x4x128xbf16, #tpu.memory_space<vmem>>, vector<1x4x4x128xbf16>,
    %294 = tpu.iota {dimensions = array<i32: 0>} : vector<4x4x128xi32>
    %c4_i32_181 = arith.constant 4 : i32
    %295 = arith.subi %c4_i32_181, %0 : i32
    %296 = vector.broadcast %295 : i32 to vector<4x4x128xi32>
    %297 = arith.cmpi slt, %294, %296 : vector<4x4x128xi32>
    %cst_182 = arith.constant 0.000000e+00 : f32
    %298 = vector.broadcast %cst_182 : f32 to vector<4x4x128xf32>
    %299 = arith.select %297, %289, %298 : vector<4x4x128xi1>, vector<4x4x128xf32>
    %cst_183 = arith.constant dense<0.000000e+00> : vector<128xf32>
    %300 = vector.multi_reduction <add>, %299, %cst_183 [0, 1] : vector<4x4x128xf32> to vector<128xf32>
    %301 = vector.shape_cast %300 : vector<128xf32> to vector<1x1x128xf32>
    %c0_184 = arith.constant 0 : index
    %c0_185 = arith.constant 0 : index
    %c0_186 = arith.constant 0 : index
    %c0_187 = arith.constant 0 : index
    %302 = vector.load %arg6[%c0_184, %c0_185, %c0_186, %c0_187] : memref<1x1x1x128xf32, #tpu.memory_space<vmem>>, vector<1x1x1x128xf32>
    %303 = vector.shape_cast %302 : vector<1x1x1x128xf32> to vector<1x1x128xf32>
    %304 = vector.shape_cast %301 : vector<1x1x128xf32> to vector<1x1x1x128xf32>
    tpu.vector_store %arg6[%c0_184, %c0_185, %c0_186, %c0_187], %304 {strides = array<i32>} : memref<1x1x1x128xf32, #tpu.memory_space<vmem>>, vector<1x1x1x128xf32>,
    return
  }
  func.func @transform_0(%arg0: i32, %arg1: i32) -> (i32, i32, i32, i32, i32) {
    %c0_i32 = arith.constant 0 : i32
    %c0_i32_0 = arith.constant 0 : i32
    %c0_i32_1 = arith.constant 0 : i32
    %c0_i32_2 = arith.constant 0 : i32
    %c0_i32_3 = arith.constant 0 : i32
    return %arg0, %c0_i32, %c0_i32_0, %c0_i32_1, %c0_i32_2 : i32, i32, i32, i32, i32
  }
  func.func @transform_1(%arg0: i32, %arg1: i32) -> (i32, i32, i32) {
    %c0_i32 = arith.constant 0 : i32
    %c0_i32_0 = arith.constant 0 : i32
    %c0_i32_1 = arith.constant 0 : i32
    %c0_i32_2 = arith.constant 0 : i32
    return %c0_i32, %c0_i32_0, %c0_i32_1 : i32, i32, i32
  }
  func.func @transform_2(%arg0: i32, %arg1: i32) -> (i32, i32) {
    %c0_i32 = arith.constant 0 : i32
    %c0_i32_0 = arith.constant 0 : i32
    %c0_i32_1 = arith.constant 0 : i32
    return %c0_i32, %c0_i32_0 : i32, i32
  }
  func.func @transform_3(%arg0: i32, %arg1: i32) -> (i32, i32, i32, i32) {
    %c0_i32 = arith.constant 0 : i32
    %c0_i32_0 = arith.constant 0 : i32
    %c0_i32_1 = arith.constant 0 : i32
    return %arg0, %arg1, %c0_i32, %c0_i32_0 : i32, i32, i32, i32
  }
  func.func @transform_4(%arg0: i32, %arg1: i32) -> (i32, i32, i32, i32) {
    %c0_i32 = arith.constant 0 : i32
    %c0_i32_0 = arith.constant 0 : i32
    %c0_i32_1 = arith.constant 0 : i32
    return %arg0, %arg1, %c0_i32, %c0_i32_0 : i32, i32, i32, i32
  }
}

module attributes {stable_mosaic.version = 11 : i64} {
  func.func @_se_kernel(%arg0: i32, %arg1: memref<1x1x1x128xf32, #tpu.memory_space<vmem>>, %arg2: memref<128x24xbf16, #tpu.memory_space<vmem>>, %arg3: memref<1x24xf32, #tpu.memory_space<vmem>>, %arg4: memref<24x128xbf16, #tpu.memory_space<vmem>>, %arg5: memref<1x128xf32, #tpu.memory_space<vmem>>, %arg6: memref<1x1x128xf32, #tpu.memory_space<vmem>>) attributes {dimension_semantics = [#tpu.dimension_semantics<parallel>], iteration_bounds = array<i64: 2>, scalar_prefetch = 0 : i64, scratch_operands = 0 : i64, tpu.core_type = #tpu.core_type<tc>, window_params = [{transform_indices = @transform_0, window_bounds = array<i64: 1, 1, 1, 128>}, {pipeline_mode = #tpu.pipeline_mode<synchronous>, transform_indices = @transform_1, window_bounds = array<i64: 128, 24>}, {pipeline_mode = #tpu.pipeline_mode<synchronous>, transform_indices = @transform_2, window_bounds = array<i64: 1, 24>}, {pipeline_mode = #tpu.pipeline_mode<synchronous>, transform_indices = @transform_3, window_bounds = array<i64: 24, 128>}, {pipeline_mode = #tpu.pipeline_mode<synchronous>, transform_indices = @transform_4, window_bounds = array<i64: 1, 128>}, {transform_indices = @transform_5, window_bounds = array<i64: 1, 1, 128>}]} {
    %c0 = arith.constant 0 : index
    %c0_0 = arith.constant 0 : index
    %c0_1 = arith.constant 0 : index
    %c0_2 = arith.constant 0 : index
    %0 = vector.load %arg1[%c0, %c0_0, %c0_1, %c0_2] : memref<1x1x1x128xf32, #tpu.memory_space<vmem>>, vector<1x1x1x128xf32>
    %1 = vector.shape_cast %0 : vector<1x1x1x128xf32> to vector<1x128xf32>
    %cst = arith.constant dense<0.000000e+00> : vector<128xf32>
    %2 = vector.multi_reduction <add>, %1, %cst [0] : vector<1x128xf32> to vector<128xf32>
    %3 = vector.shape_cast %2 : vector<128xf32> to vector<1x128xf32>
    %cst_3 = arith.constant 6.250000e-02 : f32
    %4 = vector.broadcast %cst_3 : f32 to vector<1x128xf32>
    %5 = arith.mulf %3, %4 : vector<1x128xf32>
    %6 = arith.truncf %5 : vector<1x128xf32> to vector<1x128xbf16>
    %c0_4 = arith.constant 0 : index
    %c0_5 = arith.constant 0 : index
    %7 = vector.load %arg2[%c0_4, %c0_5] : memref<128x24xbf16, #tpu.memory_space<vmem>>, vector<128x24xbf16>
    %cst_6 = arith.constant dense<0.000000e+00> : vector<1x24xf32>
    %8 = tpu.matmul %6, %7, %cst_6 {dimension_numbers = #tpu.dot_dimension_numbers<[1], [0], [0], [1], [0, 0, 1, 1], [], []>} : vector<1x128xbf16>, vector<128x24xbf16>, vector<1x24xf32> -> vector<1x24xf32>
    %c0_7 = arith.constant 0 : index
    %c0_8 = arith.constant 0 : index
    %9 = vector.load %arg3[%c0_7, %c0_8] : memref<1x24xf32, #tpu.memory_space<vmem>>, vector<1x24xf32>
    %10 = arith.addf %8, %9 : vector<1x24xf32>
    %cst_9 = arith.constant 0.000000e+00 : f32
    %11 = vector.broadcast %cst_9 : f32 to vector<1x24xf32>
    %12 = arith.maximumf %10, %11 : vector<1x24xf32>
    %13 = arith.truncf %12 : vector<1x24xf32> to vector<1x24xbf16>
    %c0_10 = arith.constant 0 : index
    %c0_11 = arith.constant 0 : index
    %14 = vector.load %arg4[%c0_10, %c0_11] : memref<24x128xbf16, #tpu.memory_space<vmem>>, vector<24x128xbf16>
    %cst_12 = arith.constant dense<0.000000e+00> : vector<1x128xf32>
    %15 = tpu.matmul %13, %14, %cst_12 {dimension_numbers = #tpu.dot_dimension_numbers<[1], [0], [0], [1], [0, 0, 1, 1], [], []>} : vector<1x24xbf16>, vector<24x128xbf16>, vector<1x128xf32> -> vector<1x128xf32>
    %c0_13 = arith.constant 0 : index
    %c0_14 = arith.constant 0 : index
    %16 = vector.load %arg5[%c0_13, %c0_14] : memref<1x128xf32, #tpu.memory_space<vmem>>, vector<1x128xf32>
    %17 = arith.addf %15, %16 : vector<1x128xf32>
    %cst_15 = arith.constant 3.000000e+00 : f32
    %18 = vector.broadcast %cst_15 : f32 to vector<1x128xf32>
    %19 = arith.addf %17, %18 : vector<1x128xf32>
    %cst_16 = arith.constant 0.000000e+00 : f32
    %cst_17 = arith.constant 6.000000e+00 : f32
    %20 = vector.broadcast %cst_16 : f32 to vector<1x128xf32>
    %21 = arith.maximumf %20, %19 : vector<1x128xf32>
    %22 = vector.broadcast %cst_17 : f32 to vector<1x128xf32>
    %23 = arith.minimumf %22, %21 : vector<1x128xf32>
    %cst_18 = arith.constant 0.166666672 : f32
    %24 = vector.broadcast %cst_18 : f32 to vector<1x128xf32>
    %25 = arith.mulf %23, %24 : vector<1x128xf32>
    %c0_19 = arith.constant 0 : index
    %c0_20 = arith.constant 0 : index
    %c0_21 = arith.constant 0 : index
    %26 = vector.load %arg6[%c0_19, %c0_20, %c0_21] : memref<1x1x128xf32, #tpu.memory_space<vmem>>, vector<1x1x128xf32>
    %27 = vector.shape_cast %26 : vector<1x1x128xf32> to vector<1x128xf32>
    %28 = vector.shape_cast %25 : vector<1x128xf32> to vector<1x1x128xf32>
    tpu.vector_store %arg6[%c0_19, %c0_20, %c0_21], %28 {strides = array<i32>} : memref<1x1x128xf32, #tpu.memory_space<vmem>>, vector<1x1x128xf32>,
    return
  }
  func.func @transform_0(%arg0: i32) -> (i32, i32, i32, i32) {
    %c0_i32 = arith.constant 0 : i32
    %c0_i32_0 = arith.constant 0 : i32
    %c0_i32_1 = arith.constant 0 : i32
    %c0_i32_2 = arith.constant 0 : i32
    return %arg0, %c0_i32, %c0_i32_0, %c0_i32_1 : i32, i32, i32, i32
  }
  func.func @transform_1(%arg0: i32) -> (i32, i32) {
    %c0_i32 = arith.constant 0 : i32
    %c0_i32_0 = arith.constant 0 : i32
    %c0_i32_1 = arith.constant 0 : i32
    return %c0_i32, %c0_i32_0 : i32, i32
  }
  func.func @transform_2(%arg0: i32) -> (i32, i32) {
    %c0_i32 = arith.constant 0 : i32
    %c0_i32_0 = arith.constant 0 : i32
    %c0_i32_1 = arith.constant 0 : i32
    return %c0_i32, %c0_i32_0 : i32, i32
  }
  func.func @transform_3(%arg0: i32) -> (i32, i32) {
    %c0_i32 = arith.constant 0 : i32
    %c0_i32_0 = arith.constant 0 : i32
    %c0_i32_1 = arith.constant 0 : i32
    return %c0_i32, %c0_i32_0 : i32, i32
  }
  func.func @transform_4(%arg0: i32) -> (i32, i32) {
    %c0_i32 = arith.constant 0 : i32
    %c0_i32_0 = arith.constant 0 : i32
    %c0_i32_1 = arith.constant 0 : i32
    return %c0_i32, %c0_i32_0 : i32, i32
  }
  func.func @transform_5(%arg0: i32) -> (i32, i32, i32) {
    %c0_i32 = arith.constant 0 : i32
    %c0_i32_0 = arith.constant 0 : i32
    %c0_i32_1 = arith.constant 0 : i32
    return %arg0, %c0_i32, %c0_i32_0 : i32, i32, i32
  }
}

module attributes {stable_mosaic.version = 11 : i64} {
  func.func @_pw_se_kernel(%arg0: i32, %arg1: i32, %arg2: memref<1x16x128xbf16, #tpu.memory_space<vmem>>, %arg3: memref<128x24xbf16, #tpu.memory_space<vmem>>, %arg4: memref<1x24xf32, #tpu.memory_space<vmem>>, %arg5: memref<1x1x128xf32, #tpu.memory_space<vmem>>, %arg6: memref<1x16x24xbf16, #tpu.memory_space<vmem>>, %arg7: memref<1x16x24xbf16, #tpu.memory_space<vmem>>) attributes {dimension_semantics = [#tpu.dimension_semantics<parallel>, #tpu.dimension_semantics<parallel>], iteration_bounds = array<i64: 2, 1>, scalar_prefetch = 0 : i64, scratch_operands = 0 : i64, tpu.core_type = #tpu.core_type<tc>, window_params = [{transform_indices = @transform_0, window_bounds = array<i64: 1, 16, 128>}, {pipeline_mode = #tpu.pipeline_mode<synchronous>, transform_indices = @transform_1, window_bounds = array<i64: 128, 24>}, {pipeline_mode = #tpu.pipeline_mode<synchronous>, transform_indices = @transform_2, window_bounds = array<i64: 1, 24>}, {transform_indices = @transform_3, window_bounds = array<i64: 1, 1, 128>}, {transform_indices = @transform_4, window_bounds = array<i64: 1, 16, 24>}, {transform_indices = @transform_5, window_bounds = array<i64: 1, 16, 24>}]} {
    %c0 = arith.constant 0 : index
    %c0_0 = arith.constant 0 : index
    %c0_1 = arith.constant 0 : index
    %0 = vector.load %arg2[%c0, %c0_0, %c0_1] : memref<1x16x128xbf16, #tpu.memory_space<vmem>>, vector<1x16x128xbf16>
    %1 = vector.shape_cast %0 : vector<1x16x128xbf16> to vector<16x128xbf16>
    %2 = arith.extf %1 : vector<16x128xbf16> to vector<16x128xf32>
    %c0_2 = arith.constant 0 : index
    %c0_3 = arith.constant 0 : index
    %c0_4 = arith.constant 0 : index
    %3 = vector.load %arg5[%c0_2, %c0_3, %c0_4] : memref<1x1x128xf32, #tpu.memory_space<vmem>>, vector<1x1x128xf32>
    %4 = vector.shape_cast %3 : vector<1x1x128xf32> to vector<1x128xf32>
    %5 = vector.broadcast %4 : vector<1x128xf32> to vector<16x128xf32>
    %6 = arith.mulf %2, %5 : vector<16x128xf32>
    %7 = arith.truncf %6 : vector<16x128xf32> to vector<16x128xbf16>
    %c0_5 = arith.constant 0 : index
    %c0_6 = arith.constant 0 : index
    %8 = vector.load %arg3[%c0_5, %c0_6] : memref<128x24xbf16, #tpu.memory_space<vmem>>, vector<128x24xbf16>
    %cst = arith.constant dense<0.000000e+00> : vector<16x24xf32>
    %9 = tpu.matmul %7, %8, %cst {dimension_numbers = #tpu.dot_dimension_numbers<[1], [0], [0], [1], [0, 0, 1, 1], [], []>} : vector<16x128xbf16>, vector<128x24xbf16>, vector<16x24xf32> -> vector<16x24xf32>
    %c0_7 = arith.constant 0 : index
    %c0_8 = arith.constant 0 : index
    %10 = vector.load %arg4[%c0_7, %c0_8] : memref<1x24xf32, #tpu.memory_space<vmem>>, vector<1x24xf32>
    %11 = vector.broadcast %10 : vector<1x24xf32> to vector<16x24xf32>
    %12 = arith.addf %9, %11 : vector<16x24xf32>
    %c0_9 = arith.constant 0 : index
    %c0_10 = arith.constant 0 : index
    %c0_11 = arith.constant 0 : index
    %13 = vector.load %arg6[%c0_9, %c0_10, %c0_11] : memref<1x16x24xbf16, #tpu.memory_space<vmem>>, vector<1x16x24xbf16>
    %14 = vector.shape_cast %13 : vector<1x16x24xbf16> to vector<16x24xbf16>
    %15 = arith.extf %14 : vector<16x24xbf16> to vector<16x24xf32>
    %16 = arith.addf %12, %15 : vector<16x24xf32>
    %17 = arith.truncf %16 : vector<16x24xf32> to vector<16x24xbf16>
    %c0_12 = arith.constant 0 : index
    %c0_13 = arith.constant 0 : index
    %c0_14 = arith.constant 0 : index
    %18 = vector.load %arg7[%c0_12, %c0_13, %c0_14] : memref<1x16x24xbf16, #tpu.memory_space<vmem>>, vector<1x16x24xbf16>
    %19 = vector.shape_cast %18 : vector<1x16x24xbf16> to vector<16x24xbf16>
    %20 = vector.shape_cast %17 : vector<16x24xbf16> to vector<1x16x24xbf16>
    tpu.vector_store %arg7[%c0_12, %c0_13, %c0_14], %20 {strides = array<i32>} : memref<1x16x24xbf16, #tpu.memory_space<vmem>>, vector<1x16x24xbf16>,
    return
  }
  func.func @transform_0(%arg0: i32, %arg1: i32) -> (i32, i32, i32) {
    %c0_i32 = arith.constant 0 : i32
    %c0_i32_0 = arith.constant 0 : i32
    return %arg0, %arg1, %c0_i32 : i32, i32, i32
  }
  func.func @transform_1(%arg0: i32, %arg1: i32) -> (i32, i32) {
    %c0_i32 = arith.constant 0 : i32
    %c0_i32_0 = arith.constant 0 : i32
    %c0_i32_1 = arith.constant 0 : i32
    return %c0_i32, %c0_i32_0 : i32, i32
  }
  func.func @transform_2(%arg0: i32, %arg1: i32) -> (i32, i32) {
    %c0_i32 = arith.constant 0 : i32
    %c0_i32_0 = arith.constant 0 : i32
    %c0_i32_1 = arith.constant 0 : i32
    return %c0_i32, %c0_i32_0 : i32, i32
  }
  func.func @transform_3(%arg0: i32, %arg1: i32) -> (i32, i32, i32) {
    %c0_i32 = arith.constant 0 : i32
    %c0_i32_0 = arith.constant 0 : i32
    %c0_i32_1 = arith.constant 0 : i32
    return %arg0, %c0_i32, %c0_i32_0 : i32, i32, i32
  }
  func.func @transform_4(%arg0: i32, %arg1: i32) -> (i32, i32, i32) {
    %c0_i32 = arith.constant 0 : i32
    %c0_i32_0 = arith.constant 0 : i32
    return %arg0, %arg1, %c0_i32 : i32, i32, i32
  }
  func.func @transform_5(%arg0: i32, %arg1: i32) -> (i32, i32, i32) {
    %c0_i32 = arith.constant 0 : i32
    %c0_i32_0 = arith.constant 0 : i32
    return %arg0, %arg1, %c0_i32 : i32, i32, i32
  }
}

module attributes {stable_mosaic.version = 11 : i64} {
  func.func @_pw_flat_kernel(%arg0: i32, %arg1: memref<32x24xbf16, #tpu.memory_space<vmem>>, %arg2: memref<24x256xbf16, #tpu.memory_space<vmem>>, %arg3: memref<1x256xf32, #tpu.memory_space<vmem>>, %arg4: memref<32x256xbf16, #tpu.memory_space<vmem>>) attributes {dimension_semantics = [#tpu.dimension_semantics<parallel>], iteration_bounds = array<i64: 1>, scalar_prefetch = 0 : i64, scratch_operands = 0 : i64, tpu.core_type = #tpu.core_type<tc>, window_params = [{transform_indices = @transform_0, window_bounds = array<i64: 32, 24>}, {pipeline_mode = #tpu.pipeline_mode<synchronous>, transform_indices = @transform_1, window_bounds = array<i64: 24, 256>}, {pipeline_mode = #tpu.pipeline_mode<synchronous>, transform_indices = @transform_2, window_bounds = array<i64: 1, 256>}, {transform_indices = @transform_3, window_bounds = array<i64: 32, 256>}]} {
    %c0 = arith.constant 0 : index
    %c0_0 = arith.constant 0 : index
    %0 = vector.load %arg1[%c0, %c0_0] : memref<32x24xbf16, #tpu.memory_space<vmem>>, vector<32x24xbf16>
    %c0_1 = arith.constant 0 : index
    %c0_2 = arith.constant 0 : index
    %1 = vector.load %arg2[%c0_1, %c0_2] : memref<24x256xbf16, #tpu.memory_space<vmem>>, vector<24x256xbf16>
    %cst = arith.constant dense<0.000000e+00> : vector<32x256xf32>
    %2 = tpu.matmul %0, %1, %cst {dimension_numbers = #tpu.dot_dimension_numbers<[1], [0], [0], [1], [0, 0, 1, 1], [], []>} : vector<32x24xbf16>, vector<24x256xbf16>, vector<32x256xf32> -> vector<32x256xf32>
    %c0_3 = arith.constant 0 : index
    %c0_4 = arith.constant 0 : index
    %3 = vector.load %arg3[%c0_3, %c0_4] : memref<1x256xf32, #tpu.memory_space<vmem>>, vector<1x256xf32>
    %4 = vector.broadcast %3 : vector<1x256xf32> to vector<32x256xf32>
    %5 = arith.addf %2, %4 : vector<32x256xf32>
    %cst_5 = arith.constant 3.000000e+00 : f32
    %6 = vector.broadcast %cst_5 : f32 to vector<32x256xf32>
    %7 = arith.addf %5, %6 : vector<32x256xf32>
    %cst_6 = arith.constant 0.000000e+00 : f32
    %cst_7 = arith.constant 6.000000e+00 : f32
    %8 = vector.broadcast %cst_6 : f32 to vector<32x256xf32>
    %9 = arith.maximumf %8, %7 : vector<32x256xf32>
    %10 = vector.broadcast %cst_7 : f32 to vector<32x256xf32>
    %11 = arith.minimumf %10, %9 : vector<32x256xf32>
    %12 = arith.mulf %5, %11 : vector<32x256xf32>
    %cst_8 = arith.constant 0.166666672 : f32
    %13 = vector.broadcast %cst_8 : f32 to vector<32x256xf32>
    %14 = arith.mulf %12, %13 : vector<32x256xf32>
    %15 = arith.truncf %14 : vector<32x256xf32> to vector<32x256xbf16>
    %c0_9 = arith.constant 0 : index
    %c0_10 = arith.constant 0 : index
    %16 = vector.load %arg4[%c0_9, %c0_10] : memref<32x256xbf16, #tpu.memory_space<vmem>>, vector<32x256xbf16>
    tpu.vector_store %arg4[%c0_9, %c0_10], %15 {strides = array<i32>} : memref<32x256xbf16, #tpu.memory_space<vmem>>, vector<32x256xbf16>,
    return
  }
  func.func @transform_0(%arg0: i32) -> (i32, i32) {
    %c0_i32 = arith.constant 0 : i32
    %c0_i32_0 = arith.constant 0 : i32
    return %arg0, %c0_i32 : i32, i32
  }
  func.func @transform_1(%arg0: i32) -> (i32, i32) {
    %c0_i32 = arith.constant 0 : i32
    %c0_i32_0 = arith.constant 0 : i32
    %c0_i32_1 = arith.constant 0 : i32
    return %c0_i32, %c0_i32_0 : i32, i32
  }
  func.func @transform_2(%arg0: i32) -> (i32, i32) {
    %c0_i32 = arith.constant 0 : i32
    %c0_i32_0 = arith.constant 0 : i32
    %c0_i32_1 = arith.constant 0 : i32
    return %c0_i32, %c0_i32_0 : i32, i32
  }
  func.func @transform_3(%arg0: i32) -> (i32, i32) {
    %c0_i32 = arith.constant 0 : i32
    %c0_i32_0 = arith.constant 0 : i32
    return %arg0, %c0_i32 : i32, i32
  }
}

module attributes {stable_mosaic.version = 11 : i64} {
  func.func @_head_kernel(%arg0: memref<2x16x256xbf16, #tpu.memory_space<vmem>>, %arg1: memref<256x128xbf16, #tpu.memory_space<vmem>>, %arg2: memref<1x128xf32, #tpu.memory_space<vmem>>, %arg3: memref<128x10xbf16, #tpu.memory_space<vmem>>, %arg4: memref<1x10xf32, #tpu.memory_space<vmem>>, %arg5: memref<2x10xf32, #tpu.memory_space<vmem>>) attributes {dimension_semantics = [], scalar_prefetch = 0 : i64, scratch_operands = 0 : i64, tpu.core_type = #tpu.core_type<tc>} {
    %c0 = arith.constant 0 : index
    %c0_0 = arith.constant 0 : index
    %c0_1 = arith.constant 0 : index
    %0 = vector.load %arg0[%c0, %c0_0, %c0_1] : memref<2x16x256xbf16, #tpu.memory_space<vmem>>, vector<2x16x256xbf16>
    %1 = arith.extf %0 : vector<2x16x256xbf16> to vector<2x16x256xf32>
    %cst = arith.constant dense<0.000000e+00> : vector<2x256xf32>
    %2 = vector.multi_reduction <add>, %1, %cst [1] : vector<2x16x256xf32> to vector<2x256xf32>
    %cst_2 = arith.constant 6.250000e-02 : f32
    %3 = vector.broadcast %cst_2 : f32 to vector<2x256xf32>
    %4 = arith.mulf %2, %3 : vector<2x256xf32>
    %5 = arith.truncf %4 : vector<2x256xf32> to vector<2x256xbf16>
    %c0_3 = arith.constant 0 : index
    %c0_4 = arith.constant 0 : index
    %6 = vector.load %arg1[%c0_3, %c0_4] : memref<256x128xbf16, #tpu.memory_space<vmem>>, vector<256x128xbf16>
    %cst_5 = arith.constant dense<0.000000e+00> : vector<2x128xf32>
    %7 = tpu.matmul %5, %6, %cst_5 {dimension_numbers = #tpu.dot_dimension_numbers<[1], [0], [0], [1], [0, 0, 1, 1], [], []>} : vector<2x256xbf16>, vector<256x128xbf16>, vector<2x128xf32> -> vector<2x128xf32>
    %c0_6 = arith.constant 0 : index
    %c0_7 = arith.constant 0 : index
    %8 = vector.load %arg2[%c0_6, %c0_7] : memref<1x128xf32, #tpu.memory_space<vmem>>, vector<1x128xf32>
    %9 = vector.broadcast %8 : vector<1x128xf32> to vector<2x128xf32>
    %10 = arith.addf %7, %9 : vector<2x128xf32>
    %cst_8 = arith.constant 3.000000e+00 : f32
    %11 = vector.broadcast %cst_8 : f32 to vector<2x128xf32>
    %12 = arith.addf %10, %11 : vector<2x128xf32>
    %cst_9 = arith.constant 0.000000e+00 : f32
    %cst_10 = arith.constant 6.000000e+00 : f32
    %13 = vector.broadcast %cst_9 : f32 to vector<2x128xf32>
    %14 = arith.maximumf %13, %12 : vector<2x128xf32>
    %15 = vector.broadcast %cst_10 : f32 to vector<2x128xf32>
    %16 = arith.minimumf %15, %14 : vector<2x128xf32>
    %17 = arith.mulf %10, %16 : vector<2x128xf32>
    %cst_11 = arith.constant 0.166666672 : f32
    %18 = vector.broadcast %cst_11 : f32 to vector<2x128xf32>
    %19 = arith.mulf %17, %18 : vector<2x128xf32>
    %20 = arith.truncf %19 : vector<2x128xf32> to vector<2x128xbf16>
    %c0_12 = arith.constant 0 : index
    %c0_13 = arith.constant 0 : index
    %21 = vector.load %arg3[%c0_12, %c0_13] : memref<128x10xbf16, #tpu.memory_space<vmem>>, vector<128x10xbf16>
    %cst_14 = arith.constant dense<0.000000e+00> : vector<2x10xf32>
    %22 = tpu.matmul %20, %21, %cst_14 {dimension_numbers = #tpu.dot_dimension_numbers<[1], [0], [0], [1], [0, 0, 1, 1], [], []>} : vector<2x128xbf16>, vector<128x10xbf16>, vector<2x10xf32> -> vector<2x10xf32>
    %c0_15 = arith.constant 0 : index
    %c0_16 = arith.constant 0 : index
    %23 = vector.load %arg4[%c0_15, %c0_16] : memref<1x10xf32, #tpu.memory_space<vmem>>, vector<1x10xf32>
    %24 = vector.broadcast %23 : vector<1x10xf32> to vector<2x10xf32>
    %25 = arith.addf %22, %24 : vector<2x10xf32>
    %c0_17 = arith.constant 0 : index
    %c0_18 = arith.constant 0 : index
    %26 = vector.load %arg5[%c0_17, %c0_18] : memref<2x10xf32, #tpu.memory_space<vmem>>, vector<2x10xf32>
    tpu.vector_store %arg5[%c0_17, %c0_18], %25 {strides = array<i32>} : memref<2x10xf32, #tpu.memory_space<vmem>>, vector<2x10xf32>,
    return
  }
}

</mosaic_0001>

<bundles_post_ra>
// kernel: mobilenet_v3_forward.14
= control target key start
LH: loop header
LB: loop body
LE: loop exit
PB: predicated region body
PF: predicated region fallthrough
CT: control target
= control target key end

     0   :  { %vm89_vm0 = vcmask 130048   ;;  %vm323_vm1 = vcmask 125952   ;;  %s656_s1 = inlined_call_operand.vmem [shape: bf16[16,16], index: 1, kind: input, shape index: {}]   ;;  %s657_s0 = inlined_call_operand.vmem [shape: bf16[128,16], index: 0, kind: input, shape index: {}]   ;;  %s658_s3 = inlined_call_operand.vmem [shape: bf16[128,16], index: 3, kind: input, shape index: {}]   ;;  %s659_s2 = inlined_call_operand.vmem [shape: f32[1,16], index: 2, kind: input, shape index: {}]   ;;  %s660_s4 = inlined_call_operand.vmem [shape: bf16[128,16], index: 4, kind: output, shape index: {}]  }
   0x1   :  { %v462_v0 = vld [vmem:[%s656_s1] sm:$0xff]   ;;  %v465_v3 = vld [vmem:[%s657_s0 + $0x8] sm:$0xff]   ;;  %v467_v5 = vld [vmem:[%s657_s0 + $0x10] sm:$0xff]  }
   0x2   :  { %v463_v1 = vld [vmem:[%s657_s0] sm:$0xff]   ;;  %442 = vmatprep.subr.bf16.mxu0 %v462_v0  ;;  %460 = vmatprep.subr.bf16.mxu1 %v462_v0  ;;  %v466_v4 = vld [vmem:[%s657_s0 + $0x28] sm:$0xff]   ;;  %v468_v6 = vld [vmem:[%s657_s0 + $0x30] sm:$0xff]  }
   0x3   :  { %v464_v2 = vld [vmem:[%s657_s0 + $0x20] sm:$0xff]   ;;  %443 = vmatpush3.bf16.msra.mxu0 %v462_v0  ;;  %461 = vmatpush3.bf16.msra.mxu1 %v462_v0  ;;  %v469_v7 = vld [vmem:[%s657_s0 + $0x18] sm:$0xff]   ;;  %v426_v9 = vld [vmem:[%s658_s3 + $0x8] sm:$0xff]  }
   0x4   :  { %444 = vmatprep.mubr.msk.bf16.mxu0 %vm89_vm0, %v463_v1  ;;  %452 = vmatprep.mubr.msk.bf16.mxu1 %vm89_vm0, %v464_v2  ;;  %v470_v8 = vld [vmem:[%s657_s0 + $0x38] sm:$0xff]   ;;  %v430_v10 = vld [vmem:[%s658_s3 + $0x28] sm:$0xff]   ;;  %v540_v11 = vld [vmem:[%s659_s2] ss:$0 sm:$0xff]  ;;  %v400_v14 = vunpack.c.l.bf16 %v426_v9  ;;  %v401_v31 = vunpack.c.h.bf16 %v426_v9 }
   0x5   :  { %v395_v12 = vld [vmem:[%s658_s3] sm:$0xff]   ;;  %v416_v15 = vunpack.c.l.bf16 %v430_v10  ;;  %v555_v28 = vld [vmem:[%s658_s3 + $0x18] sm:$0xff]   ;;  %v417_v33 = vunpack.c.h.bf16 %v430_v10  ;;  %v565_v40 = vld [vmem:[%s658_s3 + $0x10] sm:$0xff]  }
   0x6   :  { %445 = vmatmul.mubr.msk.bf16.vlgmr.msra.gmra.mxu0 %vm89_vm0, %v465_v3  ;;  %453 = vmatmul.mubr.msk.bf16.vlgmr.msra.gmra.mxu1 %vm89_vm0, %v466_v4  ;;  %v429_v13 = vld [vmem:[%s658_s3 + $0x20] sm:$0xff]   ;;  %v396_v20 = vunpack.c.l.bf16 %v395_v12  ;;  %v560_v29 = vld [vmem:[%s658_s3 + $0x38] sm:$0xff]   ;;  %v397_v34 = vunpack.c.h.bf16 %v395_v12  ;;  %v570_v41 = vld [vmem:[%s658_s3 + $0x30] sm:$0xff]   ;;  %v408_v46 = vunpack.c.l.bf16 %v555_v28  ;;  %v404_v56 = vunpack.c.l.bf16 %v565_v40 }
   0x7   :  { %448 = vmatprep.mubr.msk.bf16.mxu0 %vm89_vm0, %v467_v5  ;;  %456 = vmatprep.mubr.msk.bf16.mxu1 %vm89_vm0, %v468_v6  ;;  %v412_v21 = vunpack.c.l.bf16 %v429_v13  ;;  %v413_v35 = vunpack.c.h.bf16 %v429_v13  ;;  %v424_v47 = vunpack.c.l.bf16 %v560_v29  ;;  %v420_v57 = vunpack.c.l.bf16 %v570_v41 }
   0x8   :  { %v409_v2 = vunpack.c.h.bf16 %v555_v28  ;;  %v425_v3 = vunpack.c.h.bf16 %v560_v29  ;;  %v405_v13 = vunpack.c.h.bf16 %v565_v40 }
   0xe   :  { %449 = vmatmul.mubr.msk.bf16.gmra.mxu0 %vm89_vm0, %v469_v7  ;;  %457 = vmatmul.mubr.msk.bf16.gmra.mxu1 %vm89_vm0, %v470_v8 }
  0xc6   :  { %v446_v16 = vpop.f32.mrf.mxu0  ;;  %v454_v17 = vpop.f32.mrf.mxu1 }
  0xc7   :  { %v157_v18 = vadd.f32 %v446_v16, %v540_v11  ;;  %v189_v19 = vadd.f32 %v454_v17, %v540_v11 }
  0xc8   :  { %v148_v22 = vpop.f32.mrf.mxu0  ;;  %v180_v23 = vpop.f32.mrf.mxu1 }
  0xc9   :  { %v245_v24 = vadd.f32 %v400_v14, %v157_v18  ;;  %v253_v25 = vadd.f32 %v416_v15, %v189_v19  ;;  %v149_v26 = vadd.f32 %v540_v11, %v148_v22  ;;  %v181_v27 = vadd.f32 %v540_v11, %v180_v23 }
  0xca   :  { %v447_v30 = vpop.f32.mrf.mxu0  ;;  %v455_v32 = vpop.f32.mrf.mxu1  ;;  %v421_v14 = vunpack.c.h.bf16 %v570_v41 }
  0xcb   :  { %v380_v36 = vpack.c.bf16 %v245_v24, %v245_v24  ;;  %v388_v37 = vpack.c.bf16 %v253_v25, %v253_v25  ;;  %v243_v38 = vadd.f32 %v396_v20, %v149_v26  ;;  %v251_v39 = vadd.f32 %v412_v21, %v181_v27 }
  0xcc   :  { %v160_v42 = vadd.f32 %v447_v30, %v540_v11  ;;  %v192_v43 = vadd.f32 %v455_v32, %v540_v11  ;;  %v151_v44 = vpop.f32.mrf.mxu0  ;;  %v183_v45 = vpop.f32.mrf.mxu1 }
  0xcd   :  { %326 = vst.msk [vmem:[%s660_s4 + $0x8] sm:$0xf] %vm323_vm1, %v380_v36  ;;  %334 = vst.msk [vmem:[%s660_s4 + $0x28] sm:$0xf] %vm323_vm1, %v388_v37  ;;  %v378_v48 = vpack.c.bf16 %v243_v38, %v243_v38  ;;  %v386_v49 = vpack.c.bf16 %v251_v39, %v251_v39  ;;  %v152_v50 = vadd.f32 %v540_v11, %v151_v44 }
  0xce   :  { %v184_v51 = vadd.f32 %v540_v11, %v183_v45  ;;  %v246_v52 = vadd.f32 %v401_v31, %v160_v42  ;;  %v254_v53 = vadd.f32 %v417_v33, %v192_v43  ;;  %v450_v54 = vpop.f32.mrf.mxu0  ;;  %v458_v55 = vpop.f32.mrf.mxu1 }
  0xcf   :  { %324 = vst.msk [vmem:[%s660_s4] sm:$0xf] %vm323_vm1, %v378_v48  ;;  %332 = vst.msk [vmem:[%s660_s4 + $0x20] sm:$0xf] %vm323_vm1, %v386_v49  ;;  %v244_v58 = vadd.f32 %v397_v34, %v152_v50  ;;  %v173_v60 = vadd.f32 %v450_v54, %v540_v11  ;;  %v205_v61 = vadd.f32 %v458_v55, %v540_v11 }
  0xd0   :  { %v252_v59 = vadd.f32 %v413_v35, %v184_v51  ;;  %v381_v62 = vpack.c.bf16 %v246_v52, %v246_v52  ;;  %v389_v63 = vpack.c.bf16 %v254_v53, %v254_v53  ;;  %v164_v0 = vpop.f32.mrf.mxu0  ;;  %v196_v1 = vpop.f32.mrf.mxu1 }
  0xd1   :  { %v379_v4 = vpack.c.bf16 %v244_v58, %v244_v58  ;;  %v249_v6 = vadd.f32 %v408_v46, %v173_v60  ;;  %v257_v7 = vadd.f32 %v424_v47, %v205_v61  ;;  %v165_v8 = vadd.f32 %v540_v11, %v164_v0 }
  0xd2   :  { %v387_v5 = vpack.c.bf16 %v252_v59, %v252_v59  ;;  %327 = vst.msk [vmem:[%s660_s4 + $0xc] sm:$0xf] %vm323_vm1, %v381_v62  ;;  %335 = vst.msk [vmem:[%s660_s4 + $0x2c] sm:$0xf] %vm323_vm1, %v389_v63  ;;  %v197_v9 = vadd.f32 %v540_v11, %v196_v1  ;;  %v451_v10 = vpop.f32.mrf.mxu0  ;;  %v459_v12 = vpop.f32.mrf.mxu1 }
  0xd3   :  { %325 = vst.msk [vmem:[%s660_s4 + $0x4] sm:$0xf] %vm323_vm1, %v379_v4  ;;  %v384_v15 = vpack.c.bf16 %v249_v6, %v249_v6  ;;  %v392_v16 = vpack.c.bf16 %v257_v7, %v257_v7  ;;  %v176_v17 = vadd.f32 %v451_v10, %v540_v11  ;;  %v208_v18 = vadd.f32 %v459_v12, %v540_v11 }
  0xd4   :  { %333 = vst.msk [vmem:[%s660_s4 + $0x24] sm:$0xf] %vm323_vm1, %v387_v5  ;;  %v247_v19 = vadd.f32 %v404_v56, %v165_v8  ;;  %v255_v20 = vadd.f32 %v420_v57, %v197_v9  ;;  %v167_v21 = vpop.f32.mrf.mxu0  ;;  %v199_v22 = vpop.f32.mrf.mxu1 }
  0xd5   :  { %330 = vst.msk [vmem:[%s660_s4 + $0x18] sm:$0xf] %vm323_vm1, %v384_v15  ;;  %338 = vst.msk [vmem:[%s660_s4 + $0x38] sm:$0xf] %vm323_vm1, %v392_v16  ;;  %v250_v23 = vadd.f32 %v409_v2, %v176_v17  ;;  %v258_v24 = vadd.f32 %v425_v3, %v208_v18  ;;  %v168_v25 = vadd.f32 %v540_v11, %v167_v21 }
  0xd6   :  { %v200_v26 = vadd.f32 %v540_v11, %v199_v22  ;;  %v382_v27 = vpack.c.bf16 %v247_v19, %v247_v19  ;;  %v390_v28 = vpack.c.bf16 %v255_v20, %v255_v20 }
  0xd7   :  { %v385_v29 = vpack.c.bf16 %v250_v23, %v250_v23  ;;  %v393_v30 = vpack.c.bf16 %v258_v24, %v258_v24  ;;  %v248_v31 = vadd.f32 %v405_v13, %v168_v25 }
  0xd8   :  { %v256_v32 = vadd.f32 %v421_v14, %v200_v26  ;;  %328 = vst.msk [vmem:[%s660_s4 + $0x10] sm:$0xf] %vm323_vm1, %v382_v27  ;;  %336 = vst.msk [vmem:[%s660_s4 + $0x30] sm:$0xf] %vm323_vm1, %v390_v28 }
  0xd9   :  { %331 = vst.msk [vmem:[%s660_s4 + $0x1c] sm:$0xf] %vm323_vm1, %v385_v29  ;;  %339 = vst.msk [vmem:[%s660_s4 + $0x3c] sm:$0xf] %vm323_vm1, %v393_v30  ;;  %v383_v11 = vpack.c.bf16 %v248_v31, %v248_v31 }
  0xda   :  { %v391_v33 = vpack.c.bf16 %v256_v32, %v256_v32 }
  0xdb   :  { %329 = vst.msk [vmem:[%s660_s4 + $0x14] sm:$0xf] %vm323_vm1, %v383_v11 }
  0xdc   :  { %337 = vst.msk [vmem:[%s660_s4 + $0x34] sm:$0xf] %vm323_vm1, %v391_v33 }

// kernel: mobilenet_v3_forward.12
= control target key start
LH: loop header
LB: loop body
LE: loop exit
PB: predicated region body
PF: predicated region fallthrough
CT: control target
= control target key end

     0   :  { %vm94_vm0 = vcmask 261120   ;;  %vm360_vm1 = vcmask 125952   ;;  %s619_s1 = inlined_call_operand.vmem [shape: bf16[32,16], index: 1, kind: input, shape index: {}]   ;;  %s620_s0 = inlined_call_operand.vmem [shape: bf16[128,32], index: 0, kind: input, shape index: {}]   ;;  %s621_s2 = inlined_call_operand.vmem [shape: f32[1,16], index: 2, kind: input, shape index: {}]   ;;  %s622_s3 = inlined_call_operand.vmem [shape: bf16[128,16], index: 3, kind: output, shape index: {}]  }
   0x1   :  { %v466_v0 = vld [vmem:[%s619_s1 + $0x8] sm:$0xff]   ;;  %v467_v1 = vld [vmem:[%s619_s1] sm:$0xff]   ;;  %v472_v6 = vld [vmem:[%s620_s0 + $0x10] sm:$0xff]  }
   0x2   :  { %442 = vmatprep.subr.bf16.mxu0 %v466_v0  ;;  %462 = vmatprep.subr.bf16.mxu1 %v466_v0  ;;  %v468_v2 = vld [vmem:[%s620_s0] sm:$0xff]   ;;  %v470_v4 = vld [vmem:[%s620_s0 + $0x8] sm:$0xff]   ;;  %v473_v7 = vld [vmem:[%s620_s0 + $0x30] sm:$0xff]  }
   0x3   :  { %443 = vmatpush3.bf16.msra.mxu0 %v466_v0  ;;  %464 = vmatpush3.bf16.msra.mxu1 %v466_v0  ;;  %v469_v3 = vld [vmem:[%s620_s0 + $0x20] sm:$0xff]   ;;  %v471_v5 = vld [vmem:[%s620_s0 + $0x28] sm:$0xff]   ;;  %v474_v8 = vld [vmem:[%s620_s0 + $0x18] sm:$0xff]  }
   0x4   :  { %444 = vmatprep.subr.bf16.mxu0 %v467_v1  ;;  %463 = vmatprep.subr.bf16.mxu1 %v467_v1  ;;  %v475_v9 = vld [vmem:[%s620_s0 + $0x38] sm:$0xff]   ;;  %v537_v10 = vld [vmem:[%s621_s2] ss:$0 sm:$0xff] }
   0x5   :  { %446 = vmatprep.mubr.msk.bf16.mxu0 %vm94_vm0, %v468_v2  ;;  %454 = vmatprep.mubr.msk.bf16.mxu1 %vm94_vm0, %v469_v3 }
   0x7   :  { %445 = vmatpush3.bf16.msra.mxu0 %v467_v1  ;;  %465 = vmatpush3.bf16.msra.mxu1 %v467_v1 }
   0xa   :  { %447 = vmatmul.mubr.msk.bf16.vlgmr.msra.gmra.mxu0 %vm94_vm0, %v470_v4  ;;  %455 = vmatmul.mubr.msk.bf16.vlgmr.msra.gmra.mxu1 %vm94_vm0, %v471_v5 }
   0xb   :  { %450 = vmatprep.mubr.msk.bf16.mxu0 %vm94_vm0, %v472_v6  ;;  %458 = vmatprep.mubr.msk.bf16.mxu1 %vm94_vm0, %v473_v7 }
  0x12   :  { %451 = vmatmul.mubr.msk.bf16.gmra.mxu0 %vm94_vm0, %v474_v8  ;;  %459 = vmatmul.mubr.msk.bf16.gmra.mxu1 %vm94_vm0, %v475_v9 }
  0xca   :  { %v448_v11 = vpop.f32.mrf.mxu0  ;;  %v456_v12 = vpop.f32.mrf.mxu1 }
  0xcb   :  { %v162_v13 = vadd.f32 %v448_v11, %v537_v10  ;;  %v194_v14 = vadd.f32 %v456_v12, %v537_v10 }
  0xcc   :  { %v153_v15 = vpop.f32.mrf.mxu0  ;;  %v185_v16 = vpop.f32.mrf.mxu1 }
  0xcd   :  { %v218_v17 = vadd.f32 3.0, %v162_v13  ;;  %v226_v18 = vadd.f32 3.0, %v194_v14  ;;  %v154_v19 = vadd.f32 %v537_v10, %v153_v15  ;;  %v186_v20 = vadd.f32 %v537_v10, %v185_v16 }
  0xce   :  { %v449_v21 = vpop.f32.mrf.mxu0  ;;  %v457_v22 = vpop.f32.mrf.mxu1 }
  0xcf   :  { %v234_v23 = vmax.f32 %v218_v17, 0.0  ;;  %v242_v24 = vmax.f32 %v226_v18, 0.0  ;;  %v216_v25 = vadd.f32 3.0, %v154_v19  ;;  %v224_v26 = vadd.f32 3.0, %v186_v20 }
  0xd0   :  { %v165_v27 = vadd.f32 %v449_v21, %v537_v10  ;;  %v197_v28 = vadd.f32 %v457_v22, %v537_v10  ;;  %v156_v29 = vpop.f32.mrf.mxu0  ;;  %v188_v30 = vpop.f32.mrf.mxu1 }
  0xd1   :  { %v250_v31 = vmin.f32 %v234_v23, 6.0  ;;  %v258_v32 = vmin.f32 %v242_v24, 6.0  ;;  %v232_v33 = vmax.f32 %v216_v25, 0.0  ;;  %v240_v34 = vmax.f32 %v224_v26, 0.0 }
  0xd2   :  { %v219_v35 = vadd.f32 3.0, %v165_v27  ;;  %v227_v36 = vadd.f32 3.0, %v197_v28  ;;  %v157_v37 = vadd.f32 %v537_v10, %v156_v29  ;;  %v189_v38 = vadd.f32 %v537_v10, %v188_v30  ;;  %v452_v39 = vpop.f32.mrf.mxu0  ;;  %v460_v40 = vpop.f32.mrf.mxu1 }
  0xd3   :  { %v266_v41 = vmul.f32 %v250_v31, %v162_v13  ;;  %v274_v42 = vmul.f32 %v258_v32, %v194_v14  ;;  %v248_v43 = vmin.f32 %v232_v33, 6.0  ;;  %v256_v44 = vmin.f32 %v240_v34, 6.0 }
  0xd4   :  { %v235_v45 = vmax.f32 %v219_v35, 0.0  ;;  %v243_v46 = vmax.f32 %v227_v36, 0.0  ;;  %v217_v47 = vadd.f32 3.0, %v157_v37  ;;  %v225_v48 = vadd.f32 3.0, %v189_v38  ;;  %v169_v53 = vpop.f32.mrf.mxu0  ;;  %v201_v54 = vpop.f32.mrf.mxu1 }
  0xd5   :  { %v282_v49 = vmul.f32 0.16666667, %v266_v41  ;;  %v290_v50 = vmul.f32 0.16666667, %v274_v42  ;;  %v264_v51 = vmul.f32 %v248_v43, %v154_v19  ;;  %v272_v52 = vmul.f32 %v256_v44, %v186_v20 }
  0xd6   :  { %v251_v55 = vmin.f32 %v235_v45, 6.0  ;;  %v259_v56 = vmin.f32 %v243_v46, 6.0  ;;  %v233_v57 = vmax.f32 %v217_v47, 0.0  ;;  %v241_v58 = vmax.f32 %v225_v48, 0.0  ;;  %v453_v7 = vpop.f32.mrf.mxu0  ;;  %v461_v8 = vpop.f32.mrf.mxu1 }
  0xd7   :  { %v418_v59 = vpack.c.bf16 %v282_v49, %v282_v49  ;;  %v426_v60 = vpack.c.bf16 %v290_v50, %v290_v50  ;;  %v280_v61 = vmul.f32 0.16666667, %v264_v51  ;;  %v288_v62 = vmul.f32 0.16666667, %v272_v52 }
  0xd8   :  { %v267_v63 = vmul.f32 %v251_v55, %v165_v27  ;;  %v275_v0 = vmul.f32 %v259_v56, %v197_v28  ;;  %v249_v1 = vmin.f32 %v233_v57, 6.0  ;;  %v257_v2 = vmin.f32 %v241_v58, 6.0  ;;  %v172_v26 = vpop.f32.mrf.mxu0  ;;  %v204_v27 = vpop.f32.mrf.mxu1 }
  0xd9   :  { %363 = vst.msk [vmem:[%s622_s3 + $0x8] sm:$0xf] %vm360_vm1, %v418_v59  ;;  %371 = vst.msk [vmem:[%s622_s3 + $0x28] sm:$0xf] %vm360_vm1, %v426_v60  ;;  %v416_v3 = vpack.c.bf16 %v280_v61, %v280_v61  ;;  %v424_v4 = vpack.c.bf16 %v288_v62, %v288_v62  ;;  %v178_v5 = vadd.f32 %v452_v39, %v537_v10 }
  0xda   :  { %v210_v6 = vadd.f32 %v460_v40, %v537_v10  ;;  %v283_v9 = vmul.f32 0.16666667, %v267_v63  ;;  %v291_v11 = vmul.f32 0.16666667, %v275_v0  ;;  %v265_v12 = vmul.f32 %v249_v1, %v157_v37 }
  0xdb   :  { %v273_v13 = vmul.f32 %v257_v2, %v189_v38  ;;  %361 = vst.msk [vmem:[%s622_s3] sm:$0xf] %vm360_vm1, %v416_v3  ;;  %369 = vst.msk [vmem:[%s622_s3 + $0x20] sm:$0xf] %vm360_vm1, %v424_v4  ;;  %v222_v14 = vadd.f32 3.0, %v178_v5  ;;  %v170_v16 = vadd.f32 %v537_v10, %v169_v53  ;;  %v202_v17 = vadd.f32 %v537_v10, %v201_v54 }
  0xdc   :  { %v230_v15 = vadd.f32 3.0, %v210_v6  ;;  %v419_v18 = vpack.c.bf16 %v283_v9, %v283_v9  ;;  %v427_v19 = vpack.c.bf16 %v291_v11, %v291_v11  ;;  %v281_v20 = vmul.f32 0.16666667, %v265_v12 }
  0xdd   :  { %v289_v21 = vmul.f32 0.16666667, %v273_v13  ;;  %v238_v22 = vmax.f32 %v222_v14, 0.0  ;;  %v220_v24 = vadd.f32 3.0, %v170_v16  ;;  %v228_v25 = vadd.f32 3.0, %v202_v17 }
  0xde   :  { %v246_v23 = vmax.f32 %v230_v15, 0.0  ;;  %364 = vst.msk [vmem:[%s622_s3 + $0xc] sm:$0xf] %vm360_vm1, %v419_v18  ;;  %372 = vst.msk [vmem:[%s622_s3 + $0x2c] sm:$0xf] %vm360_vm1, %v427_v19  ;;  %v417_v28 = vpack.c.bf16 %v281_v20, %v281_v20  ;;  %v181_v30 = vadd.f32 %v453_v7, %v537_v10  ;;  %v213_v31 = vadd.f32 %v461_v8, %v537_v10 }
  0xdf   :  { %v425_v29 = vpack.c.bf16 %v289_v21, %v289_v21  ;;  %v254_v32 = vmin.f32 %v238_v22, 6.0  ;;  %v236_v34 = vmax.f32 %v220_v24, 0.0  ;;  %v244_v35 = vmax.f32 %v228_v25, 0.0 }
  0xe0   :  { %v262_v33 = vmin.f32 %v246_v23, 6.0  ;;  %362 = vst.msk [vmem:[%s622_s3 + $0x4] sm:$0xf] %vm360_vm1, %v417_v28  ;;  %v223_v36 = vadd.f32 3.0, %v181_v30  ;;  %v231_v37 = vadd.f32 3.0, %v213_v31  ;;  %v173_v38 = vadd.f32 %v537_v10, %v172_v26 }
  0xe1   :  { %370 = vst.msk [vmem:[%s622_s3 + $0x24] sm:$0xf] %vm360_vm1, %v425_v29  ;;  %v205_v39 = vadd.f32 %v537_v10, %v204_v27  ;;  %v270_v40 = vmul.f32 %v254_v32, %v178_v5  ;;  %v252_v42 = vmin.f32 %v236_v34, 6.0  ;;  %v260_v43 = vmin.f32 %v244_v35, 6.0 }
  0xe2   :  { %v278_v41 = vmul.f32 %v262_v33, %v210_v6  ;;  %v239_v44 = vmax.f32 %v223_v36, 0.0  ;;  %v247_v45 = vmax.f32 %v231_v37, 0.0  ;;  %v221_v46 = vadd.f32 3.0, %v173_v38 }
  0xe3   :  { %v229_v47 = vadd.f32 3.0, %v205_v39  ;;  %v286_v48 = vmul.f32 0.16666667, %v270_v40  ;;  %v268_v50 = vmul.f32 %v252_v42, %v170_v16  ;;  %v276_v51 = vmul.f32 %v260_v43, %v202_v17 }
  0xe4   :  { %v294_v49 = vmul.f32 0.16666667, %v278_v41  ;;  %v255_v52 = vmin.f32 %v239_v44, 6.0  ;;  %v263_v53 = vmin.f32 %v247_v45, 6.0  ;;  %v237_v54 = vmax.f32 %v221_v46, 0.0 }
  0xe5   :  { %v245_v55 = vmax.f32 %v229_v47, 0.0  ;;  %v422_v56 = vpack.c.bf16 %v286_v48, %v286_v48  ;;  %v284_v58 = vmul.f32 0.16666667, %v268_v50  ;;  %v292_v10 = vmul.f32 0.16666667, %v276_v51 }
  0xe6   :  { %v430_v57 = vpack.c.bf16 %v294_v49, %v294_v49  ;;  %v271_v59 = vmul.f32 %v255_v52, %v181_v30  ;;  %v279_v60 = vmul.f32 %v263_v53, %v213_v31  ;;  %v253_v61 = vmin.f32 %v237_v54, 6.0 }
  0xe7   :  { %v261_v62 = vmin.f32 %v245_v55, 6.0  ;;  %367 = vst.msk [vmem:[%s622_s3 + $0x18] sm:$0xf] %vm360_vm1, %v422_v56  ;;  %v420_v63 = vpack.c.bf16 %v284_v58, %v284_v58  ;;  %v428_v0 = vpack.c.bf16 %v292_v10, %v292_v10 }
  0xe8   :  { %375 = vst.msk [vmem:[%s622_s3 + $0x38] sm:$0xf] %vm360_vm1, %v430_v57  ;;  %v287_v1 = vmul.f32 0.16666667, %v271_v59  ;;  %v295_v2 = vmul.f32 0.16666667, %v279_v60  ;;  %v269_v3 = vmul.f32 %v253_v61, %v173_v38 }
  0xe9   :  { %v277_v4 = vmul.f32 %v261_v62, %v205_v39  ;;  %365 = vst.msk [vmem:[%s622_s3 + $0x10] sm:$0xf] %vm360_vm1, %v420_v63  ;;  %373 = vst.msk [vmem:[%s622_s3 + $0x30] sm:$0xf] %vm360_vm1, %v428_v0 }
  0xea   :  { %v423_v5 = vpack.c.bf16 %v287_v1, %v287_v1  ;;  %v431_v6 = vpack.c.bf16 %v295_v2, %v295_v2  ;;  %v285_v7 = vmul.f32 0.16666667, %v269_v3 }
  0xeb   :  { %v293_v8 = vmul.f32 0.16666667, %v277_v4 }
  0xec   :  { %368 = vst.msk [vmem:[%s622_s3 + $0x1c] sm:$0xf] %vm360_vm1, %v423_v5  ;;  %376 = vst.msk [vmem:[%s622_s3 + $0x3c] sm:$0xf] %vm360_vm1, %v431_v6  ;;  %v421_v9 = vpack.c.bf16 %v285_v7, %v285_v7 }
  0xed   :  { %v429_v11 = vpack.c.bf16 %v293_v8, %v293_v8 }
  0xee   :  { %366 = vst.msk [vmem:[%s622_s3 + $0x14] sm:$0xf] %vm360_vm1, %v421_v9 }
  0xef   :  { %374 = vst.msk [vmem:[%s622_s3 + $0x34] sm:$0xf] %vm360_vm1, %v429_v11 }

// kernel: mobilenet_v3_forward.13
= control target key start
LH: loop header
LB: loop body
LE: loop exit
PB: predicated region body
PF: predicated region fallthrough
CT: control target
= control target key end

     0   :  { %s1180_s12 = smov 0   ;;  %s1182_s13 = smov 0   ;;  %s1605_s0 = inlined_call_operand.vmem [shape: bf16[2,1,10,10,16], index: 0, kind: input, shape index: {}]   ;;  %s1606_s1 = inlined_call_operand.vmem [shape: f32[9,1,16], index: 1, kind: input, shape index: {}]   ;;  %s1607_s2 = inlined_call_operand.vmem [shape: f32[1,16], index: 2, kind: input, shape index: {}]   ;;  %s1608_s3 = inlined_call_operand.vmem [shape: bf16[2,8,8,16], index: 3, kind: output, shape index: {}]  }
   0x1   :  { %s1184_s14 = smov 0  }
   0x2 LB: > { %s25_s15 = sadd.s32 1, %s1154_s13  ;;  %p1038_p0 = scmp.ge.s32.totalorder %s1158_s14, 1  ;;  %s1158_s14 = sphi %s1184_s14, %s13_s14   ;;  %s1154_s13 = sphi %s1182_s13, %s1610_s13   ;;  %s1150_s12 = sphi %s1180_s12, %s1609_s12  }
   0x3   : > { %p27_p1 = scmp.ge.s32.totalorder %s25_s15, 2  ;;  %p151_p2 = scmp.lt.s32.totalorder %s1158_s14, 3 }
   0x5   : > { %s1612_s15 = smov (%p27_p1, %s25_s15), 0  ;;  %p152_p3 = pnand %p1038_p0, %p151_p2 }
   0x6   : > { %p179_p4 = scmp.lt.s32.totalorder (!%p152_p3), %s1150_s12, 1 }
   0x7   : > { %155 = sbr.rel (%p152_p3) target bundleno = 127 (0x7f), region = 32 }
   0xc   : > { %s1614_s12 = smov (!%p179_p4, %s1150_s12), 1  ;;  %v1042_v0 = vld [vmem:[%s1606_s1] ss:$0 sm:$0xff]  ;;  %vm293_vm0 = vcmask 1046528   ;;  %v1044_v29 = vld [vmem:[%s1606_s1 + $0x1] ss:$0 sm:$0xff] }
   0xd   : > { %s1111_s16 = smul.u32 80, %s1614_s12  ;;  %vm390_vm1 = vcmask 1045504   ;;  %vm934_vm2 = vcmask 125952   ;;  %s1110_s17 = sshll.u32 %s1614_s12, 5 }
   0xe   : > { %s192_s20 = scalar_lea.vmem %s1608_s3, %s1110_s17 }
   0xf   : > { %s1204_s19 = scalar_lea.vmem %s1605_s0, %s1111_s16 }
  0x10   : > { %v198_v1 = vld [vmem:[%s1204_s19] ss:$8 sps:$4 sm:$0xff]   ;;  %v200_v2 = vld [vmem:[%s1204_s19 + $0x10] ss:$8 sps:$4 sm:$0xff]   ;;  %v1214_v9 = vld [vmem:[%s1204_s19 + $0x4] sm:$0x1] }
  0x11   : > { %v202_v3 = vld [vmem:[%s1204_s19 + $0x20] ss:$8 sps:$4 sm:$0xff]   ;;  %v204_v4 = vld [vmem:[%s1204_s19 + $0x30] ss:$8 sps:$4 sm:$0xff]   ;;  %v206_v5 = vunpack.c.l.bf16 %v198_v1  ;;  %v207_v6 = vunpack.c.h.bf16 %v198_v1  ;;  %v208_v7 = vunpack.c.l.bf16 %v200_v2  ;;  %v209_v8 = vunpack.c.h.bf16 %v200_v2  ;;  %v1217_v10 = vld [vmem:[%s1204_s19 + $0xc] sm:$0x1] }
  0x12   : > { %v210_v11 = vunpack.c.l.bf16 %v202_v3  ;;  %v211_v12 = vunpack.c.h.bf16 %v202_v3  ;;  %v212_v13 = vunpack.c.l.bf16 %v204_v4  ;;  %v213_v14 = vunpack.c.h.bf16 %v204_v4  ;;  %v1220_v15 = vld [vmem:[%s1204_s19 + $0x14] sm:$0x1]  ;;  %v1223_v16 = vld [vmem:[%s1204_s19 + $0x1c] sm:$0x1]  ;;  %v1226_v17 = vld [vmem:[%s1204_s19 + $0x24] sm:$0x1] }
  0x13   : > { %v221_v18 = vmul.f32 %v1042_v0, %v206_v5  ;;  %v222_v19 = vmul.f32 %v1042_v0, %v207_v6  ;;  %v1228_v20 = vmul.f32 %v1042_v0, %v208_v7  ;;  %v1230_v21 = vmul.f32 %v1042_v0, %v209_v8  ;;  %v1233_v22 = vld [vmem:[%s1204_s19 + $0x2c] sm:$0x1]  ;;  %v1236_v23 = vld [vmem:[%s1204_s19 + $0x34] sm:$0x1]  ;;  %v1239_v24 = vld [vmem:[%s1204_s19 + $0x3c] sm:$0x1] }
  0x14   : > { %v225_v25 = vmul.f32 %v1042_v0, %v210_v11  ;;  %v1241_v26 = vmul.f32 %v1042_v0, %v211_v12  ;;  %v1243_v27 = vmul.f32 %v1042_v0, %v212_v13  ;;  %v1245_v28 = vmul.f32 %v1042_v0, %v213_v14 }
  0x15   : > { %v245_v30 = vunpack.c.l.bf16 %v1214_v9  ;;  %v246_v31 = vunpack.c.l.bf16 %v1217_v10  ;;  %v247_v32 = vunpack.c.l.bf16 %v1220_v15  ;;  %v248_v33 = vunpack.c.l.bf16 %v1223_v16 }
  0x16   : > { %v249_v34 = vunpack.c.l.bf16 %v1226_v17  ;;  %v250_v35 = vunpack.c.l.bf16 %v1233_v22  ;;  %v251_v36 = vunpack.c.l.bf16 %v1236_v23  ;;  %v252_v37 = vunpack.c.l.bf16 %v1239_v24 }
  0x17   : > { %v261_v38 = vmul.f32 %v1044_v29, %v206_v5  ;;  %v262_v39 = vmul.f32 %v1044_v29, %v245_v30  ;;  %v263_v40 = vmul.f32 %v1044_v29, %v207_v6  ;;  %v264_v41 = vmul.f32 %v1044_v29, %v246_v31  ;;  %v334_v6 = vld [vmem:[%s1204_s19] sm:$0xe] }
  0x18   : > { %v265_v42 = vmul.f32 %v1044_v29, %v208_v7  ;;  %v266_v43 = vmul.f32 %v1044_v29, %v247_v32  ;;  %v267_v44 = vmul.f32 %v1044_v29, %v209_v8  ;;  %v268_v45 = vmul.f32 %v1044_v29, %v248_v33  ;;  %v335_v7 = vld [vmem:[%s1204_s19 + $0x8] sm:$0xe] }
  0x19   : > { %v269_v46 = vmul.f32 %v1044_v29, %v210_v11  ;;  %v270_v47 = vmul.f32 %v1044_v29, %v249_v34  ;;  %v271_v48 = vmul.f32 %v1044_v29, %v211_v12  ;;  %v272_v49 = vmul.f32 %v1044_v29, %v250_v35 }
  0x1a   : > { %v273_v50 = vmul.f32 %v1044_v29, %v212_v13  ;;  %v274_v51 = vmul.f32 %v1044_v29, %v251_v36  ;;  %v275_v52 = vmul.f32 %v1044_v29, %v213_v14  ;;  %v276_v53 = vmul.f32 %v1044_v29, %v252_v37  ;;  %v336_v14 = vld [vmem:[%s1204_s19 + $0x10] sm:$0xe] }
  0x1b   : > { %v294_v54 = vrot.slane %v261_v38, 1  ;;  %v295_v55 = vrot.slane %v262_v39, 1  ;;  %v297_v56 = vrot.slane %v263_v40, 1  ;;  %v298_v57 = vrot.slane %v264_v41, 1  ;;  %v337_v41 = vld [vmem:[%s1204_s19 + $0x18] sm:$0xe] }
  0x1c   : > { %v300_v58 = vrot.slane %v265_v42, 1  ;;  %v301_v59 = vrot.slane %v266_v43, 1  ;;  %v303_v60 = vrot.slane %v267_v44, 1  ;;  %v304_v61 = vrot.slane %v268_v45, 1  ;;  %v338_v42 = vld [vmem:[%s1204_s19 + $0x20] sm:$0xe] }
  0x1d   : > { %v296_v62 = vsel %vm293_vm0, %v294_v54, %v295_v55  ;;  %v299_v63 = vsel %vm293_vm0, %v297_v56, %v298_v57  ;;  %v306_v0 = vrot.slane %v269_v46, 1  ;;  %v307_v1 = vrot.slane %v270_v47, 1  ;;  %v339_v47 = vld [vmem:[%s1204_s19 + $0x28] sm:$0xe] }
  0x1e   : > { %v302_v2 = vsel %vm293_vm0, %v300_v58, %v301_v59  ;;  %v305_v3 = vsel %vm293_vm0, %v303_v60, %v304_v61  ;;  %v309_v4 = vrot.slane %v271_v48, 1  ;;  %v310_v5 = vrot.slane %v272_v49, 1  ;;  %v340_v48 = vld [vmem:[%s1204_s19 + $0x30] sm:$0xe]  ;;  %v341_v49 = vld [vmem:[%s1204_s19 + $0x38] sm:$0xe] }
  0x1f   : > { %v308_v8 = vsel %vm293_vm0, %v306_v0, %v307_v1  ;;  %v312_v11 = vrot.slane %v273_v50, 1  ;;  %v313_v12 = vrot.slane %v274_v51, 1  ;;  %v315_v13 = vrot.slane %v275_v52, 1  ;;  %v1046_v52 = vld [vmem:[%s1606_s1 + $0x2] ss:$0 sm:$0xff] }
  0x20   : > { %v311_v29 = vsel %vm293_vm0, %v309_v4, %v310_v5  ;;  %v316_v38 = vrot.slane %v276_v53, 1  ;;  %v1283_v39 = vadd.f32 %v296_v62, %v221_v18  ;;  %v1285_v40 = vadd.f32 %v299_v63, %v222_v19 }
  0x21   : > { %v314_v43 = vsel %vm293_vm0, %v312_v11, %v313_v12  ;;  %v1291_v44 = vadd.f32 %v302_v2, %v1228_v20  ;;  %v329_v45 = vadd.f32 %v305_v3, %v1230_v21  ;;  %v330_v46 = vadd.f32 %v308_v8, %v225_v25 }
  0x22   : > { %v317_v50 = vsel %vm293_vm0, %v315_v13, %v316_v38  ;;  %v331_v18 = vadd.f32 %v311_v29, %v1241_v26  ;;  %v332_v19 = vadd.f32 %v314_v43, %v1243_v27  ;;  %v342_v51 = vunpack.c.l.bf16 %v334_v6  ;;  %v1047_v13 = vld [vmem:[%s1204_s19 + $0x8] ss:$8 sps:$4 sm:$0xff]  }
  0x23   : > { %v333_v20 = vadd.f32 %v317_v50, %v1245_v28  ;;  %v343_v53 = vunpack.c.l.bf16 %v335_v7  ;;  %v344_v54 = vunpack.c.l.bf16 %v336_v14  ;;  %v345_v21 = vunpack.c.l.bf16 %v337_v41  ;;  %v1051_v50 = vld [vmem:[%s1204_s19 + $0x28] ss:$8 sps:$4 sm:$0xff]  }
  0x24   : > { %v346_v25 = vunpack.c.l.bf16 %v338_v42  ;;  %v347_v55 = vunpack.c.l.bf16 %v339_v47  ;;  %v348_v56 = vunpack.c.l.bf16 %v340_v48  ;;  %v349_v57 = vunpack.c.l.bf16 %v341_v49  ;;  %v1049_v42 = vld [vmem:[%s1204_s19 + $0x18] ss:$8 sps:$4 sm:$0xff]  }
  0x25   : > { %v358_v58 = vmul.f32 %v1046_v52, %v342_v51  ;;  %v359_v26 = vmul.f32 %v1046_v52, %v245_v30  ;;  %v360_v59 = vmul.f32 %v1046_v52, %v343_v53  ;;  %v361_v27 = vmul.f32 %v1046_v52, %v246_v31  ;;  %v1053_v51 = vld [vmem:[%s1204_s19 + $0x38] ss:$8 sps:$4 sm:$0xff]  }
  0x26   : > { %v362_v60 = vmul.f32 %v1046_v52, %v344_v54  ;;  %v363_v61 = vmul.f32 %v1046_v52, %v247_v32  ;;  %v364_v28 = vmul.f32 %v1046_v52, %v345_v21  ;;  %v365_v62 = vmul.f32 %v1046_v52, %v248_v33 }
  0x27   : > { %v366_v63 = vmul.f32 %v1046_v52, %v346_v25  ;;  %v367_v0 = vmul.f32 %v1046_v52, %v249_v34  ;;  %v368_v1 = vmul.f32 %v1046_v52, %v347_v55  ;;  %v369_v9 = vmul.f32 %v1046_v52, %v250_v35 }
  0x28   : > { %v370_v30 = vmul.f32 %v1046_v52, %v348_v56  ;;  %v371_v10 = vmul.f32 %v1046_v52, %v251_v36  ;;  %v372_v31 = vmul.f32 %v1046_v52, %v349_v57  ;;  %v373_v15 = vmul.f32 %v1046_v52, %v252_v37 }
  0x29   : > { %v391_v32 = vrot.slane %v358_v58, 2  ;;  %v392_v2 = vrot.slane %v359_v26, 2  ;;  %v394_v16 = vrot.slane %v360_v59, 2  ;;  %v395_v33 = vrot.slane %v361_v27, 2  ;;  %v1339_v59 = vld [vmem:[%s1204_s19 + $0xc] sm:$0x1] }
  0x2a   : > { %v397_v3 = vrot.slane %v362_v60, 2  ;;  %v398_v17 = vrot.slane %v363_v61, 2  ;;  %v400_v34 = vrot.slane %v364_v28, 2  ;;  %v401_v4 = vrot.slane %v365_v62, 2  ;;  %v1345_v62 = vld [vmem:[%s1204_s19 + $0x1c] sm:$0x1] }
  0x2b   : > { %v393_v22 = vsel %vm390_vm1, %v391_v32, %v392_v2  ;;  %v396_v35 = vsel %vm390_vm1, %v394_v16, %v395_v33  ;;  %v403_v23 = vrot.slane %v366_v63, 2  ;;  %v404_v36 = vrot.slane %v367_v0, 2  ;;  %v1348_v63 = vld [vmem:[%s1204_s19 + $0x24] sm:$0x1]  ;;  %v1351_v0 = vld [vmem:[%s1204_s19 + $0x2c] sm:$0x1] }
  0x2c   : > { %v399_v5 = vsel %vm390_vm1, %v397_v3, %v398_v17  ;;  %v402_v24 = vsel %vm390_vm1, %v400_v34, %v401_v4  ;;  %v406_v37 = vrot.slane %v368_v1, 2  ;;  %v407_v6 = vrot.slane %v369_v9, 2  ;;  %v1364_v32 = vld [vmem:[%s1204_s19 + $0x44] sm:$0x1] }
  0x2d   : > { %v405_v7 = vsel %vm390_vm1, %v403_v23, %v404_v36  ;;  %v409_v8 = vrot.slane %v370_v30, 2  ;;  %v410_v11 = vrot.slane %v371_v10, 2  ;;  %v412_v12 = vrot.slane %v372_v31, 2  ;;  %v1358_v31 = vld [vmem:[%s1204_s19 + $0x34] sm:$0x1] }
  0x2e   : > { %v408_v14 = vsel %vm390_vm1, %v406_v37, %v407_v6  ;;  %v413_v29 = vrot.slane %v373_v15, 2  ;;  %v423_v38 = vadd.f32 %v393_v22, %v1283_v39  ;;  %v424_v41 = vadd.f32 %v396_v35, %v1285_v40  ;;  %v1056_v39 = vld [vmem:[%s1606_s1 + $0x3] ss:$0 sm:$0xff]  ;;  %v1361_v15 = vld [vmem:[%s1204_s19 + $0x3c] sm:$0x1] }
  0x2f   : > { %v411_v43 = vsel %vm390_vm1, %v409_v8, %v410_v11  ;;  %v425_v47 = vadd.f32 %v399_v5, %v1291_v44  ;;  %v426_v48 = vadd.f32 %v402_v24, %v329_v45  ;;  %v427_v49 = vadd.f32 %v405_v7, %v330_v46  ;;  %v1066_v17 = vld [vmem:[%s1606_s1 + $0x4] ss:$0 sm:$0xff] }
  0x30   : > { %v414_v52 = vsel %vm390_vm1, %v412_v12, %v413_v29  ;;  %v428_v53 = vadd.f32 %v408_v14, %v331_v18  ;;  %v429_v54 = vadd.f32 %v411_v43, %v332_v19  ;;  %v443_v21 = vunpack.c.l.bf16 %v1047_v13 }
  0x31   : > { %v430_v40 = vadd.f32 %v414_v52, %v333_v20  ;;  %v444_v25 = vunpack.c.h.bf16 %v1047_v13  ;;  %v445_v55 = vunpack.c.l.bf16 %v1049_v42  ;;  %v446_v44 = vunpack.c.h.bf16 %v1049_v42  ;;  %v1342_v20 = vld [vmem:[%s1204_s19 + $0x14] sm:$0x1] }
  0x32   : > { %v447_v45 = vunpack.c.l.bf16 %v1051_v50  ;;  %v448_v46 = vunpack.c.h.bf16 %v1051_v50  ;;  %v449_v56 = vunpack.c.l.bf16 %v1053_v51  ;;  %v450_v57 = vunpack.c.h.bf16 %v1053_v51 }
  0x33   : > { %v459_v18 = vmul.f32 %v1056_v39, %v443_v21  ;;  %v460_v58 = vmul.f32 %v1056_v39, %v444_v25  ;;  %v461_v19 = vmul.f32 %v1056_v39, %v445_v55  ;;  %v462_v26 = vmul.f32 %v1056_v39, %v446_v44 }
  0x34   : > { %v463_v27 = vmul.f32 %v1056_v39, %v447_v45  ;;  %v464_v60 = vmul.f32 %v1056_v39, %v448_v46  ;;  %v465_v61 = vmul.f32 %v1056_v39, %v449_v56  ;;  %v466_v28 = vmul.f32 %v1056_v39, %v450_v57 }
  0x35   : > { %v467_v1 = vadd.f32 %v459_v18, %v423_v38  ;;  %v468_v9 = vadd.f32 %v460_v58, %v424_v41  ;;  %v1353_v30 = vadd.f32 %v461_v19, %v425_v47  ;;  %v1355_v10 = vadd.f32 %v462_v26, %v426_v48  ;;  %v1067_v58 = vld [vmem:[%s1204_s19 + $0x8] sm:$0xe]  ;;  %v1068_v19 = vld [vmem:[%s1204_s19 + $0x10] sm:$0xe] }
  0x36   : > { %v471_v2 = vadd.f32 %v463_v27, %v427_v49  ;;  %v1366_v16 = vadd.f32 %v464_v60, %v428_v53  ;;  %v1368_v33 = vadd.f32 %v465_v61, %v429_v54  ;;  %v1370_v3 = vadd.f32 %v466_v28, %v430_v40  ;;  %v1069_v28 = vld [vmem:[%s1204_s19 + $0x18] sm:$0xe] }
  0x37   : > { %v483_v34 = vunpack.c.l.bf16 %v1339_v59  ;;  %v484_v4 = vunpack.c.l.bf16 %v1342_v20  ;;  %v485_v22 = vunpack.c.l.bf16 %v1345_v62  ;;  %v486_v35 = vunpack.c.l.bf16 %v1348_v63 }
  0x38   : > { %v487_v23 = vunpack.c.l.bf16 %v1351_v0  ;;  %v488_v36 = vunpack.c.l.bf16 %v1358_v31  ;;  %v489_v5 = vunpack.c.l.bf16 %v1361_v15  ;;  %v490_v24 = vunpack.c.l.bf16 %v1364_v32 }
  0x39   : > { %v499_v37 = vmul.f32 %v1066_v17, %v443_v21  ;;  %v500_v6 = vmul.f32 %v1066_v17, %v483_v34  ;;  %v501_v7 = vmul.f32 %v1066_v17, %v444_v25  ;;  %v502_v8 = vmul.f32 %v1066_v17, %v484_v4 }
  0x3a   : > { %v503_v11 = vmul.f32 %v1066_v17, %v445_v55  ;;  %v504_v12 = vmul.f32 %v1066_v17, %v485_v22  ;;  %v505_v13 = vmul.f32 %v1066_v17, %v446_v44  ;;  %v506_v14 = vmul.f32 %v1066_v17, %v486_v35 }
  0x3b   : > { %v507_v29 = vmul.f32 %v1066_v17, %v447_v45  ;;  %v508_v38 = vmul.f32 %v1066_v17, %v487_v23  ;;  %v509_v41 = vmul.f32 %v1066_v17, %v448_v46  ;;  %v510_v42 = vmul.f32 %v1066_v17, %v488_v36 }
  0x3c   : > { %v511_v43 = vmul.f32 %v1066_v17, %v449_v56  ;;  %v512_v47 = vmul.f32 %v1066_v17, %v489_v5  ;;  %v513_v48 = vmul.f32 %v1066_v17, %v450_v57  ;;  %v514_v49 = vmul.f32 %v1066_v17, %v490_v24 }
  0x3d   : > { %v531_v50 = vrot.slane %v499_v37, 1  ;;  %v532_v51 = vrot.slane %v500_v6, 1  ;;  %v534_v52 = vrot.slane %v501_v7, 1  ;;  %v535_v53 = vrot.slane %v502_v8, 1  ;;  %v1070_v8 = vld [vmem:[%s1204_s19 + $0x20] sm:$0xe] }
  0x3e   : > { %v537_v54 = vrot.slane %v503_v11, 1  ;;  %v538_v21 = vrot.slane %v504_v12, 1  ;;  %v540_v39 = vrot.slane %v505_v13, 1  ;;  %v541_v40 = vrot.slane %v506_v14, 1  ;;  %v1071_v11 = vld [vmem:[%s1204_s19 + $0x28] sm:$0xe] }
  0x3f   : > { %v533_v25 = vsel %vm293_vm0, %v531_v50, %v532_v51  ;;  %v536_v55 = vsel %vm293_vm0, %v534_v52, %v535_v53  ;;  %v543_v44 = vrot.slane %v507_v29, 1  ;;  %v544_v45 = vrot.slane %v508_v38, 1  ;;  %v1072_v38 = vld [vmem:[%s1204_s19 + $0x30] sm:$0xe] }
  0x40   : > { %v539_v46 = vsel %vm293_vm0, %v537_v54, %v538_v21  ;;  %v542_v56 = vsel %vm293_vm0, %v540_v39, %v541_v40  ;;  %v546_v57 = vrot.slane %v509_v41, 1  ;;  %v547_v18 = vrot.slane %v510_v42, 1  ;;  %v1073_v41 = vld [vmem:[%s1204_s19 + $0x38] sm:$0xe]  ;;  %v1074_v42 = vld [vmem:[%s1204_s19 + $0x40] sm:$0xe] }
  0x41   : > { %v545_v26 = vsel %vm293_vm0, %v543_v44, %v544_v45  ;;  %v549_v27 = vrot.slane %v511_v43, 1  ;;  %v550_v60 = vrot.slane %v512_v47, 1  ;;  %v552_v61 = vrot.slane %v513_v48, 1  ;;  %v1076_v48 = vld [vmem:[%s1606_s1 + $0x5] ss:$0 sm:$0xff] }
  0x42   : > { %v548_v17 = vsel %vm293_vm0, %v546_v57, %v547_v18  ;;  %v553_v37 = vrot.slane %v514_v49, 1  ;;  %v1408_v6 = vadd.f32 %v533_v25, %v467_v1  ;;  %v1410_v7 = vadd.f32 %v536_v55, %v468_v9 }
  0x43   : > { %v551_v12 = vsel %vm293_vm0, %v549_v27, %v550_v60  ;;  %v1416_v13 = vadd.f32 %v539_v46, %v1353_v30  ;;  %v566_v14 = vadd.f32 %v542_v56, %v1355_v10  ;;  %v567_v29 = vadd.f32 %v545_v26, %v471_v2 }
  0x44   : > { %v554_v43 = vsel %vm293_vm0, %v552_v61, %v553_v37  ;;  %v568_v1 = vadd.f32 %v548_v17, %v1366_v16  ;;  %v569_v9 = vadd.f32 %v551_v12, %v1368_v33  ;;  %v579_v47 = vunpack.c.l.bf16 %v1067_v58  ;;  %v1077_v61 = vld [vmem:[%s1204_s19 + $0x10] ss:$8 sps:$4 sm:$0xff]  }
  0x45   : > { %v570_v30 = vadd.f32 %v554_v43, %v1370_v3  ;;  %v580_v49 = vunpack.c.l.bf16 %v1068_v19  ;;  %v581_v50 = vunpack.c.l.bf16 %v1069_v28  ;;  %v582_v10 = vunpack.c.l.bf16 %v1070_v8  ;;  %v1081_v43 = vld [vmem:[%s1204_s19 + $0x30] ss:$8 sps:$4 sm:$0xff]  }
  0x46   : > { %v583_v2 = vunpack.c.l.bf16 %v1071_v11  ;;  %v584_v51 = vunpack.c.l.bf16 %v1072_v38  ;;  %v585_v52 = vunpack.c.l.bf16 %v1073_v41  ;;  %v586_v53 = vunpack.c.l.bf16 %v1074_v42  ;;  %v1079_v11 = vld [vmem:[%s1204_s19 + $0x20] ss:$8 sps:$4 sm:$0xff]  }
  0x47   : > { %v595_v54 = vmul.f32 %v1076_v48, %v579_v47  ;;  %v596_v16 = vmul.f32 %v1076_v48, %v483_v34  ;;  %v597_v21 = vmul.f32 %v1076_v48, %v580_v49  ;;  %v598_v33 = vmul.f32 %v1076_v48, %v484_v4  ;;  %v1083_v47 = vld [vmem:[%s1204_s19 + $0x40] ss:$8 sps:$4 sm:$0xff]  }
  0x48   : > { %v599_v39 = vmul.f32 %v1076_v48, %v581_v50  ;;  %v600_v40 = vmul.f32 %v1076_v48, %v485_v22  ;;  %v601_v3 = vmul.f32 %v1076_v48, %v582_v10  ;;  %v602_v25 = vmul.f32 %v1076_v48, %v486_v35 }
  0x49   : > { %v603_v55 = vmul.f32 %v1076_v48, %v583_v2  ;;  %v604_v44 = vmul.f32 %v1076_v48, %v487_v23  ;;  %v605_v45 = vmul.f32 %v1076_v48, %v584_v51  ;;  %v606_v59 = vmul.f32 %v1076_v48, %v488_v36 }
  0x4a   : > { %v607_v34 = vmul.f32 %v1076_v48, %v585_v52  ;;  %v608_v20 = vmul.f32 %v1076_v48, %v489_v5  ;;  %v609_v4 = vmul.f32 %v1076_v48, %v586_v53  ;;  %v610_v62 = vmul.f32 %v1076_v48, %v490_v24 }
  0x4b   : > { %v627_v22 = vrot.slane %v595_v54, 2  ;;  %v628_v46 = vrot.slane %v596_v16, 2  ;;  %v630_v63 = vrot.slane %v597_v21, 2  ;;  %v631_v35 = vrot.slane %v598_v33, 2  ;;  %v1464_v21 = vld [vmem:[%s1204_s19 + $0x14] sm:$0x1] }
  0x4c   : > { %v633_v56 = vrot.slane %v599_v39, 2  ;;  %v634_v0 = vrot.slane %v600_v40, 2  ;;  %v636_v23 = vrot.slane %v601_v3, 2  ;;  %v637_v57 = vrot.slane %v602_v25, 2  ;;  %v1470_v25 = vld [vmem:[%s1204_s19 + $0x24] sm:$0x1] }
  0x4d   : > { %v629_v31 = vsel %vm390_vm1, %v627_v22, %v628_v46  ;;  %v632_v36 = vsel %vm390_vm1, %v630_v63, %v631_v35  ;;  %v639_v15 = vrot.slane %v603_v55, 2  ;;  %v640_v5 = vrot.slane %v604_v44, 2  ;;  %v1473_v55 = vld [vmem:[%s1204_s19 + $0x2c] sm:$0x1]  ;;  %v1476_v44 = vld [vmem:[%s1204_s19 + $0x34] sm:$0x1] }
  0x4e   : > { %v635_v18 = vsel %vm390_vm1, %v633_v56, %v634_v0  ;;  %v638_v32 = vsel %vm390_vm1, %v636_v23, %v637_v57  ;;  %v642_v24 = vrot.slane %v605_v45, 2  ;;  %v643_v58 = vrot.slane %v606_v59, 2  ;;  %v1489_v22 = vld [vmem:[%s1204_s19 + $0x4c] sm:$0x1]  ;;  %v1096_v0 = vld [vmem:[%s1606_s1 + $0x7] ss:$0 sm:$0xff] }
  0x4f   : > { %v641_v19 = vsel %vm390_vm1, %v639_v15, %v640_v5  ;;  %v645_v26 = vrot.slane %v607_v34, 2  ;;  %v646_v27 = vrot.slane %v608_v20, 2  ;;  %v648_v60 = vrot.slane %v609_v4, 2  ;;  %v1483_v4 = vld [vmem:[%s1204_s19 + $0x3c] sm:$0x1] }
  0x50   : > { %v644_v28 = vsel %vm390_vm1, %v642_v24, %v643_v58  ;;  %v649_v17 = vrot.slane %v610_v62, 2  ;;  %v659_v37 = vadd.f32 %v629_v31, %v1408_v6  ;;  %v660_v8 = vadd.f32 %v632_v36, %v1410_v7  ;;  %v1086_v6 = vld [vmem:[%s1606_s1 + $0x6] ss:$0 sm:$0xff]  ;;  %v1486_v62 = vld [vmem:[%s1204_s19 + $0x44] sm:$0x1] }
  0x51   : > { %v647_v12 = vsel %vm390_vm1, %v645_v26, %v646_v27  ;;  %v661_v38 = vadd.f32 %v635_v18, %v1416_v13  ;;  %v662_v41 = vadd.f32 %v638_v32, %v566_v14  ;;  %v663_v42 = vadd.f32 %v641_v19, %v567_v29 }
  0x52   : > { %v650_v48 = vsel %vm390_vm1, %v648_v60, %v649_v17  ;;  %v664_v49 = vadd.f32 %v644_v28, %v568_v1  ;;  %v665_v50 = vadd.f32 %v647_v12, %v569_v9  ;;  %v679_v10 = vunpack.c.l.bf16 %v1077_v61 }
  0x53   : > { %v666_v7 = vadd.f32 %v650_v48, %v570_v30  ;;  %v680_v2 = vunpack.c.h.bf16 %v1077_v61  ;;  %v681_v51 = vunpack.c.l.bf16 %v1079_v11  ;;  %v682_v13 = vunpack.c.h.bf16 %v1079_v11  ;;  %v1467_v30 = vld [vmem:[%s1204_s19 + $0x1c] sm:$0x1] }
  0x54   : > { %v683_v14 = vunpack.c.l.bf16 %v1081_v43  ;;  %v684_v29 = vunpack.c.h.bf16 %v1081_v43  ;;  %v685_v52 = vunpack.c.l.bf16 %v1083_v47  ;;  %v686_v53 = vunpack.c.h.bf16 %v1083_v47 }
  0x55   : > { %v695_v1 = vmul.f32 %v1086_v6, %v679_v10  ;;  %v696_v54 = vmul.f32 %v1086_v6, %v680_v2  ;;  %v697_v9 = vmul.f32 %v1086_v6, %v681_v51  ;;  %v698_v16 = vmul.f32 %v1086_v6, %v682_v13 }
  0x56   : > { %v699_v33 = vmul.f32 %v1086_v6, %v683_v14  ;;  %v700_v39 = vmul.f32 %v1086_v6, %v684_v29  ;;  %v701_v40 = vmul.f32 %v1086_v6, %v685_v52  ;;  %v702_v3 = vmul.f32 %v1086_v6, %v686_v53 }
  0x57   : > { %v703_v45 = vadd.f32 %v695_v1, %v659_v37  ;;  %v704_v59 = vadd.f32 %v696_v54, %v660_v8  ;;  %v1478_v34 = vadd.f32 %v697_v9, %v661_v38  ;;  %v1480_v20 = vadd.f32 %v698_v16, %v662_v41  ;;  %v1097_v54 = vld [vmem:[%s1204_s19 + $0x10] sm:$0xe]  ;;  %v1098_v9 = vld [vmem:[%s1204_s19 + $0x18] sm:$0xe] }
  0x58   : > { %v707_v46 = vadd.f32 %v699_v33, %v663_v42  ;;  %v1491_v63 = vadd.f32 %v700_v39, %v664_v49  ;;  %v1493_v35 = vadd.f32 %v701_v40, %v665_v50  ;;  %v1495_v56 = vadd.f32 %v702_v3, %v666_v7  ;;  %v1099_v3 = vld [vmem:[%s1204_s19 + $0x20] sm:$0xe] }
  0x59   : > { %v719_v23 = vunpack.c.l.bf16 %v1464_v21  ;;  %v720_v57 = vunpack.c.l.bf16 %v1467_v30  ;;  %v721_v31 = vunpack.c.l.bf16 %v1470_v25  ;;  %v722_v36 = vunpack.c.l.bf16 %v1473_v55 }
  0x5a   : > { %v723_v15 = vunpack.c.l.bf16 %v1476_v44  ;;  %v724_v5 = vunpack.c.l.bf16 %v1483_v4  ;;  %v725_v18 = vunpack.c.l.bf16 %v1486_v62  ;;  %v726_v32 = vunpack.c.l.bf16 %v1489_v22 }
  0x5b   : > { %v735_v24 = vmul.f32 %v1096_v0, %v679_v10  ;;  %v736_v58 = vmul.f32 %v1096_v0, %v719_v23  ;;  %v737_v19 = vmul.f32 %v1096_v0, %v680_v2  ;;  %v738_v26 = vmul.f32 %v1096_v0, %v720_v57 }
  0x5c   : > { %v739_v27 = vmul.f32 %v1096_v0, %v681_v51  ;;  %v740_v60 = vmul.f32 %v1096_v0, %v721_v31  ;;  %v741_v61 = vmul.f32 %v1096_v0, %v682_v13  ;;  %v742_v28 = vmul.f32 %v1096_v0, %v722_v36 }
  0x5d   : > { %v743_v17 = vmul.f32 %v1096_v0, %v683_v14  ;;  %v744_v37 = vmul.f32 %v1096_v0, %v723_v15  ;;  %v745_v8 = vmul.f32 %v1096_v0, %v684_v29  ;;  %v746_v11 = vmul.f32 %v1096_v0, %v724_v5 }
  0x5e   : > { %v747_v12 = vmul.f32 %v1096_v0, %v685_v52  ;;  %v748_v38 = vmul.f32 %v1096_v0, %v725_v18  ;;  %v749_v41 = vmul.f32 %v1096_v0, %v686_v53  ;;  %v750_v42 = vmul.f32 %v1096_v0, %v726_v32 }
  0x5f   : > { %v767_v43 = vrot.slane %v735_v24, 1  ;;  %v768_v47 = vrot.slane %v736_v58, 1  ;;  %v770_v48 = vrot.slane %v737_v19, 1  ;;  %v771_v49 = vrot.slane %v738_v26, 1  ;;  %v1100_v26 = vld [vmem:[%s1204_s19 + $0x28] sm:$0xe] }
  0x60   : > { %v773_v50 = vrot.slane %v739_v27, 1  ;;  %v774_v10 = vrot.slane %v740_v60, 1  ;;  %v776_v6 = vrot.slane %v741_v61, 1  ;;  %v777_v7 = vrot.slane %v742_v28, 1  ;;  %v1101_v27 = vld [vmem:[%s1204_s19 + $0x30] sm:$0xe] }
  0x61   : > { %v769_v2 = vsel %vm293_vm0, %v767_v43, %v768_v47  ;;  %v772_v51 = vsel %vm293_vm0, %v770_v48, %v771_v49  ;;  %v779_v13 = vrot.slane %v743_v17, 1  ;;  %v780_v14 = vrot.slane %v744_v37, 1  ;;  %v1102_v37 = vld [vmem:[%s1204_s19 + $0x38] sm:$0xe] }
  0x62   : > { %v775_v29 = vsel %vm293_vm0, %v773_v50, %v774_v10  ;;  %v778_v52 = vsel %vm293_vm0, %v776_v6, %v777_v7  ;;  %v782_v53 = vrot.slane %v745_v8, 1  ;;  %v783_v1 = vrot.slane %v746_v11, 1  ;;  %v1103_v8 = vld [vmem:[%s1204_s19 + $0x40] sm:$0xe]  ;;  %v1104_v11 = vld [vmem:[%s1204_s19 + $0x48] sm:$0xe] }
  0x63   : > { %v781_v16 = vsel %vm293_vm0, %v779_v13, %v780_v14  ;;  %v785_v33 = vrot.slane %v747_v12, 1  ;;  %v786_v39 = vrot.slane %v748_v38, 1  ;;  %v788_v40 = vrot.slane %v749_v41, 1  ;;  %v1106_v41 = vld [vmem:[%s1606_s1 + $0x8] ss:$0 sm:$0xff] }
  0x64   : > { %v784_v0 = vsel %vm293_vm0, %v782_v53, %v783_v1  ;;  %v789_v24 = vrot.slane %v750_v42, 1  ;;  %v1533_v58 = vadd.f32 %v769_v2, %v703_v45  ;;  %v1535_v19 = vadd.f32 %v772_v51, %v704_v59 }
  0x65   : > { %v787_v60 = vsel %vm293_vm0, %v785_v33, %v786_v39  ;;  %v1541_v61 = vadd.f32 %v775_v29, %v1478_v34  ;;  %v802_v28 = vadd.f32 %v778_v52, %v1480_v20  ;;  %v803_v17 = vadd.f32 %v781_v16, %v707_v46 }
  0x66   : > { %v790_v12 = vsel %vm293_vm0, %v788_v40, %v789_v24  ;;  %v804_v45 = vadd.f32 %v784_v0, %v1491_v63  ;;  %v805_v59 = vadd.f32 %v787_v60, %v1493_v35  ;;  %v815_v38 = vunpack.c.l.bf16 %v1097_v54  ;;  %v1107_v40 = vld [vmem:[%s1607_s2] ss:$0 sm:$0xff] }
  0x67   : > { %v806_v34 = vadd.f32 %v790_v12, %v1495_v56  ;;  %v816_v42 = vunpack.c.l.bf16 %v1098_v9  ;;  %v817_v43 = vunpack.c.l.bf16 %v1099_v3  ;;  %v818_v20 = vunpack.c.l.bf16 %v1100_v26 }
  0x68   : > { %v819_v46 = vunpack.c.l.bf16 %v1101_v27  ;;  %v820_v47 = vunpack.c.l.bf16 %v1102_v37  ;;  %v821_v48 = vunpack.c.l.bf16 %v1103_v8  ;;  %v822_v49 = vunpack.c.l.bf16 %v1104_v11 }
  0x69   : > { %v831_v50 = vmul.f32 %v1106_v41, %v815_v38  ;;  %v832_v63 = vmul.f32 %v1106_v41, %v719_v23  ;;  %v833_v10 = vmul.f32 %v1106_v41, %v816_v42  ;;  %v834_v35 = vmul.f32 %v1106_v41, %v720_v57 }
  0x6a   : > { %v835_v6 = vmul.f32 %v1106_v41, %v817_v43  ;;  %v836_v7 = vmul.f32 %v1106_v41, %v721_v31  ;;  %v837_v56 = vmul.f32 %v1106_v41, %v818_v20  ;;  %v838_v2 = vmul.f32 %v1106_v41, %v722_v36 }
  0x6b   : > { %v839_v51 = vmul.f32 %v1106_v41, %v819_v46  ;;  %v840_v13 = vmul.f32 %v1106_v41, %v723_v15  ;;  %v841_v14 = vmul.f32 %v1106_v41, %v820_v47  ;;  %v842_v21 = vmul.f32 %v1106_v41, %v724_v5 }
  0x6c   : > { %v843_v23 = vmul.f32 %v1106_v41, %v821_v48  ;;  %v844_v30 = vmul.f32 %v1106_v41, %v725_v18  ;;  %v845_v57 = vmul.f32 %v1106_v41, %v822_v49  ;;  %v846_v25 = vmul.f32 %v1106_v41, %v726_v32 }
  0x6d   : > { %v863_v31 = vrot.slane %v831_v50, 2  ;;  %v864_v29 = vrot.slane %v832_v63, 2  ;;  %v866_v55 = vrot.slane %v833_v10, 2  ;;  %v867_v36 = vrot.slane %v834_v35, 2 }
  0x6e   : > { %v869_v52 = vrot.slane %v835_v6, 2  ;;  %v870_v53 = vrot.slane %v836_v7, 2  ;;  %v872_v44 = vrot.slane %v837_v56, 2  ;;  %v873_v15 = vrot.slane %v838_v2, 2 }
  0x6f   : > { %v865_v1 = vsel %vm390_vm1, %v863_v31, %v864_v29  ;;  %v868_v4 = vsel %vm390_vm1, %v866_v55, %v867_v36  ;;  %v875_v5 = vrot.slane %v839_v51, 2  ;;  %v876_v54 = vrot.slane %v840_v13, 2 }
  0x70   : > { %v871_v62 = vsel %vm390_vm1, %v869_v52, %v870_v53  ;;  %v874_v22 = vsel %vm390_vm1, %v872_v44, %v873_v15  ;;  %v878_v18 = vrot.slane %v841_v14, 2  ;;  %v879_v32 = vrot.slane %v842_v21, 2 }
  0x71   : > { %v877_v9 = vsel %vm390_vm1, %v875_v5, %v876_v54  ;;  %v881_v16 = vrot.slane %v843_v23, 2  ;;  %v882_v33 = vrot.slane %v844_v30, 2  ;;  %v884_v39 = vrot.slane %v845_v57, 2 }
  0x72   : > { %v880_v3 = vsel %vm390_vm1, %v878_v18, %v879_v32  ;;  %v885_v0 = vrot.slane %v846_v25, 2  ;;  %v895_v24 = vadd.f32 %v865_v1, %v1533_v58  ;;  %v896_v26 = vadd.f32 %v868_v4, %v1535_v19 }
  0x73   : > { %v883_v27 = vsel %vm390_vm1, %v881_v16, %v882_v33  ;;  %v897_v60 = vadd.f32 %v871_v62, %v1541_v61  ;;  %v898_v37 = vadd.f32 %v874_v22, %v802_v28  ;;  %v899_v8 = vadd.f32 %v877_v9, %v803_v17 }
  0x74   : > { %v886_v11 = vsel %vm390_vm1, %v884_v39, %v885_v0  ;;  %v900_v12 = vadd.f32 %v880_v3, %v804_v45  ;;  %v901_v38 = vadd.f32 %v883_v27, %v805_v59  ;;  %v910_v41 = vadd.f32 %v1107_v40, %v895_v24 }
  0x75   : > { %v902_v42 = vadd.f32 %v886_v11, %v806_v34  ;;  %v911_v43 = vadd.f32 %v1107_v40, %v896_v26  ;;  %v912_v20 = vadd.f32 %v1107_v40, %v897_v60  ;;  %v913_v46 = vadd.f32 %v1107_v40, %v898_v37 }
  0x76   : > { %v914_v47 = vadd.f32 %v1107_v40, %v899_v8  ;;  %v915_v58 = vadd.f32 %v1107_v40, %v900_v12  ;;  %v916_v48 = vadd.f32 %v1107_v40, %v901_v38  ;;  %v918_v19 = vmax.f32 %v910_v41, 0.0 }
  0x77   : > { %v917_v61 = vadd.f32 %v1107_v40, %v902_v42  ;;  %v919_v28 = vmax.f32 %v911_v43, 0.0  ;;  %v920_v17 = vmax.f32 %v912_v20, 0.0  ;;  %v921_v49 = vmax.f32 %v913_v46, 0.0 }
  0x78   : > { %v922_v50 = vmax.f32 %v914_v47, 0.0  ;;  %v923_v45 = vmax.f32 %v915_v58, 0.0  ;;  %v924_v59 = vmax.f32 %v916_v48, 0.0  ;;  %v926_v63 = vpack.c.bf16 %v918_v19, %v918_v19 }
  0x79   : > { %v925_v34 = vmax.f32 %v917_v61, 0.0  ;;  %v927_v10 = vpack.c.bf16 %v919_v28, %v919_v28  ;;  %v928_v35 = vpack.c.bf16 %v920_v17, %v920_v17  ;;  %v929_v6 = vpack.c.bf16 %v921_v49, %v921_v49 }
  0x7a   : > { %v930_v7 = vpack.c.bf16 %v922_v50, %v922_v50  ;;  %v931_v56 = vpack.c.bf16 %v923_v45, %v923_v45  ;;  %v932_v2 = vpack.c.bf16 %v924_v59, %v924_v59  ;;  %935 = vst.msk [vmem:[%s192_s20] sm:$0xf] %vm934_vm2, %v926_v63 }
  0x7b   : > { %v933_v51 = vpack.c.bf16 %v925_v34, %v925_v34  ;;  %936 = vst.msk [vmem:[%s192_s20 + $0x4] sm:$0xf] %vm934_vm2, %v927_v10  ;;  %937 = vst.msk [vmem:[%s192_s20 + $0x8] sm:$0xf] %vm934_vm2, %v928_v35 }
  0x7c   : > { %938 = vst.msk [vmem:[%s192_s20 + $0xc] sm:$0xf] %vm934_vm2, %v929_v6  ;;  %939 = vst.msk [vmem:[%s192_s20 + $0x10] sm:$0xf] %vm934_vm2, %v930_v7 }
  0x7d   : > { %940 = vst.msk [vmem:[%s192_s20 + $0x14] sm:$0xf] %vm934_vm2, %v931_v56  ;;  %941 = vst.msk [vmem:[%s192_s20 + $0x18] sm:$0xf] %vm934_vm2, %v932_v2 }
  0x7e   : > { %942 = vst.msk [vmem:[%s192_s20 + $0x1c] sm:$0xf] %vm934_vm2, %v933_v51 }
  0x7f PF: > { %s13_s14 = sadd.s32 1, %s1158_s14   ;;  %s1609_s12 = smov %s1154_s13 }
  0x80   : > { %p10_p5 = scmp.ge.s32.totalorder %s13_s14, 4   ;;  %s1610_s13 = smov %s1612_s15 }
  0x82   :  { %12 = sbr.rel (!%p10_p5) target bundleno = 2 (0x2), region = 73 }

// kernel: mobilenet_v3_forward.15
= control target key start
LH: loop header
LB: loop body
LE: loop exit
PB: predicated region body
PF: predicated region fallthrough
CT: control target
= control target key end

     0   :  { %vm86_vm0 = vcmask 130048   ;;  %s525_s1 = inlined_call_operand.vmem [shape: bf16[16,128], index: 1, kind: input, shape index: {}]   ;;  %s526_s0 = inlined_call_operand.vmem [shape: bf16[128,16], index: 0, kind: input, shape index: {}]   ;;  %s527_s2 = inlined_call_operand.vmem [shape: f32[1,128], index: 2, kind: input, shape index: {}]   ;;  %s528_s3 = inlined_call_operand.vmem [shape: bf16[128,128], index: 3, kind: output, shape index: {}]  }
   0x1   :  { %v434_v0 = vld [vmem:[%s525_s1] sm:$0xff]   ;;  %v437_v3 = vld [vmem:[%s526_s0 + $0x8] sm:$0xff]   ;;  %v439_v5 = vld [vmem:[%s526_s0 + $0x10] sm:$0xff]  }
   0x2   :  { %v435_v1 = vld [vmem:[%s526_s0] sm:$0xff]   ;;  %414 = vmatprep.subr.bf16.mxu0 %v434_v0  ;;  %432 = vmatprep.subr.bf16.mxu1 %v434_v0  ;;  %v438_v4 = vld [vmem:[%s526_s0 + $0x28] sm:$0xff]   ;;  %v440_v6 = vld [vmem:[%s526_s0 + $0x30] sm:$0xff]  }
   0x3   :  { %v436_v2 = vld [vmem:[%s526_s0 + $0x20] sm:$0xff]   ;;  %415 = vmatpush3.bf16.msra.mxu0 %v434_v0  ;;  %433 = vmatpush3.bf16.msra.mxu1 %v434_v0  ;;  %v441_v7 = vld [vmem:[%s526_s0 + $0x18] sm:$0xff]  }
   0x4   :  { %416 = vmatprep.mubr.msk.bf16.mxu0 %vm86_vm0, %v435_v1  ;;  %424 = vmatprep.mubr.msk.bf16.mxu1 %vm86_vm0, %v436_v2  ;;  %v442_v8 = vld [vmem:[%s526_s0 + $0x38] sm:$0xff]   ;;  %v308_v9 = vld [vmem:[%s527_s2] ss:$0 sm:$0xff] }
   0x6   :  { %417 = vmatmul.mubr.msk.bf16.vlgmr.msra.gmra.mxu0 %vm86_vm0, %v437_v3  ;;  %425 = vmatmul.mubr.msk.bf16.vlgmr.msra.gmra.mxu1 %vm86_vm0, %v438_v4 }
   0x7   :  { %420 = vmatprep.mubr.msk.bf16.mxu0 %vm86_vm0, %v439_v5  ;;  %428 = vmatprep.mubr.msk.bf16.mxu1 %vm86_vm0, %v440_v6 }
   0xe   :  { %421 = vmatmul.mubr.msk.bf16.gmra.mxu0 %vm86_vm0, %v441_v7  ;;  %429 = vmatmul.mubr.msk.bf16.gmra.mxu1 %vm86_vm0, %v442_v8 }
  0xc6   :  { %v418_v10 = vpop.f32.mrf.mxu0  ;;  %v426_v11 = vpop.f32.mrf.mxu1 }
  0xc7   :  { %v154_v12 = vadd.f32 %v418_v10, %v308_v9  ;;  %v186_v13 = vadd.f32 %v426_v11, %v308_v9 }
  0xc8   :  { %v145_v14 = vpop.f32.mrf.mxu0  ;;  %v177_v15 = vpop.f32.mrf.mxu1 }
  0xc9   :  { %v146_v16 = vadd.f32 %v308_v9, %v145_v14  ;;  %v178_v17 = vadd.f32 %v308_v9, %v177_v15  ;;  %v210_v22 = vmax.f32 %v154_v12, 0.0  ;;  %v218_v23 = vmax.f32 %v186_v13, 0.0 }
  0xca   :  { %v419_v18 = vpop.f32.mrf.mxu0  ;;  %v427_v19 = vpop.f32.mrf.mxu1 }
  0xcb   :  { %v157_v20 = vadd.f32 %v419_v18, %v308_v9  ;;  %v189_v21 = vadd.f32 %v427_v19, %v308_v9  ;;  %v208_v30 = vmax.f32 %v146_v16, 0.0  ;;  %v216_v31 = vmax.f32 %v178_v17, 0.0 }
  0xcc   :  { %v148_v24 = vpop.f32.mrf.mxu0  ;;  %v180_v25 = vpop.f32.mrf.mxu1 }
  0xcd   :  { %v211_v26 = vmax.f32 %v157_v20, 0.0  ;;  %v219_v27 = vmax.f32 %v189_v21, 0.0  ;;  %v149_v28 = vadd.f32 %v308_v9, %v148_v24  ;;  %v181_v29 = vadd.f32 %v308_v9, %v180_v25 }
  0xce   :  { %v422_v32 = vpop.f32.mrf.mxu0  ;;  %v430_v33 = vpop.f32.mrf.mxu1 }
  0xcf   :  { %v366_v34 = vpack.c.bf16 %v211_v26, %v210_v22  ;;  %v386_v35 = vpack.c.bf16 %v219_v27, %v218_v23  ;;  %v209_v36 = vmax.f32 %v149_v28, 0.0  ;;  %v217_v37 = vmax.f32 %v181_v29, 0.0 }
  0xd0   :  { %v170_v38 = vadd.f32 %v422_v32, %v308_v9  ;;  %v202_v39 = vadd.f32 %v430_v33, %v308_v9  ;;  %v161_v40 = vpop.f32.mrf.mxu0  ;;  %v193_v41 = vpop.f32.mrf.mxu1 }
  0xd1   :  { %398 = vst [vmem:[%s528_s3 + $0x8] sm:$0xff] %v366_v34   ;;  %402 = vst [vmem:[%s528_s3 + $0x28] sm:$0xff] %v386_v35   ;;  %v361_v42 = vpack.c.bf16 %v209_v36, %v208_v30  ;;  %v381_v43 = vpack.c.bf16 %v217_v37, %v216_v31  ;;  %v162_v44 = vadd.f32 %v308_v9, %v161_v40 }
  0xd2   :  { %v194_v45 = vadd.f32 %v308_v9, %v193_v41  ;;  %v423_v46 = vpop.f32.mrf.mxu0  ;;  %v431_v47 = vpop.f32.mrf.mxu1  ;;  %v214_v50 = vmax.f32 %v170_v38, 0.0  ;;  %v222_v51 = vmax.f32 %v202_v39, 0.0 }
  0xd3   :  { %362 = vst [vmem:[%s528_s3] sm:$0xff] %v361_v42   ;;  %401 = vst [vmem:[%s528_s3 + $0x20] sm:$0xff] %v381_v43   ;;  %v173_v48 = vadd.f32 %v423_v46, %v308_v9  ;;  %v205_v49 = vadd.f32 %v431_v47, %v308_v9  ;;  %v212_v58 = vmax.f32 %v162_v44, 0.0 }
  0xd4   :  { %v164_v52 = vpop.f32.mrf.mxu0  ;;  %v196_v53 = vpop.f32.mrf.mxu1  ;;  %v220_v59 = vmax.f32 %v194_v45, 0.0 }
  0xd5   :  { %v215_v54 = vmax.f32 %v173_v48, 0.0  ;;  %v223_v55 = vmax.f32 %v205_v49, 0.0  ;;  %v165_v56 = vadd.f32 %v308_v9, %v164_v52  ;;  %v197_v57 = vadd.f32 %v308_v9, %v196_v53 }
  0xd7   :  { %v376_v60 = vpack.c.bf16 %v215_v54, %v214_v50  ;;  %v396_v61 = vpack.c.bf16 %v223_v55, %v222_v51  ;;  %v213_v62 = vmax.f32 %v165_v56, 0.0  ;;  %v221_v63 = vmax.f32 %v197_v57, 0.0 }
  0xd9   :  { %400 = vst [vmem:[%s528_s3 + $0x18] sm:$0xff] %v376_v60   ;;  %404 = vst [vmem:[%s528_s3 + $0x38] sm:$0xff] %v396_v61   ;;  %v371_v0 = vpack.c.bf16 %v213_v62, %v212_v58  ;;  %v391_v1 = vpack.c.bf16 %v221_v63, %v220_v59 }
  0xdb   :  { %399 = vst [vmem:[%s528_s3 + $0x10] sm:$0xff] %v371_v0   ;;  %403 = vst [vmem:[%s528_s3 + $0x30] sm:$0xff] %v391_v1  }

// kernel: mobilenet_v3_forward.17
= control target key start
LH: loop header
LB: loop body
LE: loop exit
PB: predicated region body
PF: predicated region fallthrough
CT: control target
= control target key end

     0   :  { %vm167_vm0 = vcmask 191488   ;;  %s300_s1 = inlined_call_operand.vmem [shape: bf16[128,24], index: 1, kind: input, shape index: {}]   ;;  %s301_s0 = inlined_call_operand.vmem [shape: bf16[32,128], index: 0, kind: input, shape index: {}]   ;;  %s302_s2 = inlined_call_operand.vmem [shape: f32[1,24], index: 2, kind: input, shape index: {}]   ;;  %s303_s3 = inlined_call_operand.vmem [shape: bf16[32,24], index: 3, kind: output, shape index: {}]  }
   0x1   :  { %v225_v0 = vld [vmem:[%s300_s1 + $0x38] sm:$0xff]   ;;  %v226_v1 = vld [vmem:[%s300_s1 + $0x30] sm:$0xff]   ;;  %v227_v2 = vld [vmem:[%s300_s1 + $0x28] sm:$0xff]  }
   0x2   :  { %205 = vmatprep.subr.bf16.mxu0 %v225_v0  ;;  %v228_v3 = vld [vmem:[%s300_s1 + $0x20] sm:$0xff]   ;;  %v229_v5 = vld [vmem:[%s300_s1 + $0x18] sm:$0xff]   ;;  %v230_v6 = vld [vmem:[%s300_s1 + $0x10] sm:$0xff]  }
   0x3   :  { %206 = vmatpush3.bf16.msra.mxu0 %v225_v0  ;;  %v233_v4 = vld [vmem:[%s301_s0] sm:$0xff]   ;;  %v231_v7 = vld [vmem:[%s300_s1 + $0x8] sm:$0xff]  }
   0x4   :  { %207 = vmatprep.subr.bf16.mxu0 %v226_v1  ;;  %221 = vmatprep.mubr.bf16.mxu0 %v233_v4  ;;  %v232_v8 = vld [vmem:[%s300_s1] sm:$0xff]   ;;  %v234_v9 = vld [vmem:[%s301_s0 + $0x8] sm:$0xff]  }
   0x5   :  { %v176_v10 = vld [vmem:[%s302_s2] ss:$0 sm:$0xff] }
   0x7   :  { %208 = vmatpush3.bf16.msra.mxu0 %v226_v1 }
   0x8   :  { %209 = vmatprep.subr.bf16.mxu0 %v227_v2 }
   0xb   :  { %210 = vmatpush3.bf16.msra.mxu0 %v227_v2 }
   0xc   :  { %211 = vmatprep.subr.bf16.mxu0 %v228_v3 }
   0xf   :  { %212 = vmatpush3.bf16.msra.mxu0 %v228_v3 }
  0x10   :  { %213 = vmatprep.subr.bf16.mxu0 %v229_v5 }
  0x13   :  { %214 = vmatpush3.bf16.msra.mxu0 %v229_v5 }
  0x14   :  { %215 = vmatprep.subr.bf16.mxu0 %v230_v6 }
  0x17   :  { %216 = vmatpush3.bf16.msra.mxu0 %v230_v6 }
  0x18   :  { %217 = vmatprep.subr.bf16.mxu0 %v231_v7 }
  0x1b   :  { %218 = vmatpush3.bf16.msra.mxu0 %v231_v7 }
  0x1c   :  { %219 = vmatprep.subr.bf16.mxu0 %v232_v8 }
  0x1f   :  { %220 = vmatpush3.bf16.msra.mxu0 %v232_v8 }
  0x22   :  { %222 = vmatmul.mubr.bf16.vlgmr.msra.gmra.mxu0 %v234_v9 }
  0xe2   :  { %v223_v11 = vpop.f32.mrf.mxu0 }
  0xe3   :  { %v145_v12 = vadd.f32 %v223_v11, %v176_v10 }
  0xe4   :  { %v136_v13 = vpop.f32.mrf.mxu0 }
  0xe5   :  { %v193_v14 = vpack.c.bf16 %v145_v12, %v145_v12  ;;  %v137_v15 = vadd.f32 %v176_v10, %v136_v13 }
  0xe6   :  { %v224_v16 = vpop.f32.mrf.mxu0 }
  0xe7   :  { %170 = vst.msk [vmem:[%s303_s3 + $0x8] sm:$0xf] %vm167_vm0, %v193_v14  ;;  %v191_v17 = vpack.c.bf16 %v137_v15, %v137_v15  ;;  %v148_v18 = vadd.f32 %v224_v16, %v176_v10 }
  0xe8   :  { %v139_v19 = vpop.f32.mrf.mxu0 }
  0xe9   :  { %168 = vst.msk [vmem:[%s303_s3] sm:$0xf] %vm167_vm0, %v191_v17  ;;  %v194_v20 = vpack.c.bf16 %v148_v18, %v148_v18  ;;  %v140_v21 = vadd.f32 %v176_v10, %v139_v19 }
  0xeb   :  { %171 = vst.msk [vmem:[%s303_s3 + $0xc] sm:$0xf] %vm167_vm0, %v194_v20  ;;  %v192_v22 = vpack.c.bf16 %v140_v21, %v140_v21 }
  0xed   :  { %169 = vst.msk [vmem:[%s303_s3 + $0x4] sm:$0xf] %vm167_vm0, %v192_v22 }

// kernel: mobilenet_v3_forward.18
= control target key start
LH: loop header
LB: loop body
LE: loop exit
PB: predicated region body
PF: predicated region fallthrough
CT: control target
= control target key end

     0   :  { %vm55_vm0 = vcmask 1043456   ;;  %vm48_vm1 = vcmask 195584   ;;  %s236_s1 = inlined_call_operand.vmem [shape: bf16[24,128], index: 1, kind: input, shape index: {}]   ;;  %s237_s0 = inlined_call_operand.vmem [shape: bf16[32,24], index: 0, kind: input, shape index: {}]   ;;  %s238_s2 = inlined_call_operand.vmem [shape: f32[1,128], index: 2, kind: input, shape index: {}]   ;;  %s239_s3 = inlined_call_operand.vmem [shape: bf16[32,128], index: 3, kind: output, shape index: {}]  }
   0x1   :  { %v191_v0 = vld [vmem:[%s236_s1 + $0x8] ss:$0 sps:$4 sm:$0xff]   ;;  %v192_v1 = vld [vmem:[%s236_s1] sm:$0xff]  }
   0x2   :  { %190 = vmatprep.subr.msk.bf16.mxu0 %vm55_vm0, %v191_v0  ;;  %v57_v2 = vsel %vm55_vm0, %v191_v0, 0  ;;  %v193_v3 = vld [vmem:[%s237_s0] sm:$0xff]   ;;  %v194_v4 = vld [vmem:[%s237_s0 + $0x8] sm:$0xff]  }
   0x3   :  { %183 = vmatpush3.bf16.msra.mxu0 %v57_v2  ;;  %186 = vmatprep.mubr.msk.bf16.mxu0 %vm48_vm1, %v193_v3  ;;  %v152_v5 = vld [vmem:[%s238_s2] ss:$0 sm:$0xff] }
   0x4   :  { %184 = vmatprep.subr.bf16.mxu0 %v192_v1 }
   0x7   :  { %185 = vmatpush3.bf16.msra.mxu0 %v192_v1 }
   0xa   :  { %187 = vmatmul.mubr.msk.bf16.vlgmr.msra.gmra.mxu0 %vm48_vm1, %v194_v4 }
  0xca   :  { %v188_v6 = vpop.f32.mrf.mxu0 }
  0xcb   :  { %v102_v7 = vadd.f32 %v188_v6, %v152_v5 }
  0xcc   :  { %v93_v8 = vpop.f32.mrf.mxu0 }
  0xcd   :  { %v110_v9 = vadd.f32 3.0, %v102_v7  ;;  %v94_v10 = vadd.f32 %v152_v5, %v93_v8 }
  0xce   :  { %v189_v11 = vpop.f32.mrf.mxu0 }
  0xcf   :  { %v114_v12 = vmax.f32 %v110_v9, 0.0  ;;  %v108_v13 = vadd.f32 3.0, %v94_v10  ;;  %v105_v14 = vadd.f32 %v189_v11, %v152_v5 }
  0xd0   :  { %v96_v15 = vpop.f32.mrf.mxu0 }
  0xd1   :  { %v118_v16 = vmin.f32 %v114_v12, 6.0  ;;  %v112_v17 = vmax.f32 %v108_v13, 0.0  ;;  %v111_v18 = vadd.f32 3.0, %v105_v14  ;;  %v97_v19 = vadd.f32 %v152_v5, %v96_v15 }
  0xd3   :  { %v116_v20 = vmin.f32 %v112_v17, 6.0  ;;  %v115_v21 = vmax.f32 %v111_v18, 0.0  ;;  %v109_v22 = vadd.f32 3.0, %v97_v19  ;;  %v122_v23 = vmul.f32 %v118_v16, %v102_v7 }
  0xd5   :  { %v119_v24 = vmin.f32 %v115_v21, 6.0  ;;  %v113_v25 = vmax.f32 %v109_v22, 0.0  ;;  %v120_v26 = vmul.f32 %v116_v20, %v94_v10  ;;  %v126_v29 = vmul.f32 0.16666667, %v122_v23 }
  0xd7   :  { %v123_v27 = vmul.f32 %v119_v24, %v105_v14  ;;  %v117_v28 = vmin.f32 %v113_v25, 6.0  ;;  %v124_v32 = vmul.f32 0.16666667, %v120_v26 }
  0xd9   :  { %v127_v30 = vmul.f32 0.16666667, %v123_v27  ;;  %v121_v31 = vmul.f32 %v117_v28, %v97_v19 }
  0xdb   :  { %v175_v33 = vpack.c.bf16 %v127_v30, %v126_v29  ;;  %v125_v34 = vmul.f32 0.16666667, %v121_v31 }
  0xdd   :  { %177 = vst [vmem:[%s239_s3 + $0x8] sm:$0xff] %v175_v33   ;;  %v170_v35 = vpack.c.bf16 %v125_v34, %v124_v32 }
  0xdf   :  { %171 = vst [vmem:[%s239_s3] sm:$0xff] %v170_v35  }

// kernel: mobilenet_v3_forward.16
= control target key start
LH: loop header
LB: loop body
LE: loop exit
PB: predicated region body
PF: predicated region fallthrough
CT: control target
= control target key end

     0   :  { %s715_s12 = smov 0   ;;  %s717_s13 = smov 0   ;;  %s889_s0 = inlined_call_operand.vmem [shape: bf16[2,4,5,5,128], index: 0, kind: input, shape index: {}]   ;;  %s890_s1 = inlined_call_operand.vmem [shape: f32[9,1,128], index: 1, kind: input, shape index: {}]   ;;  %s891_s2 = inlined_call_operand.vmem [shape: f32[1,128], index: 2, kind: input, shape index: {}]   ;;  %s892_s3 = inlined_call_operand.vmem [shape: bf16[2,4,4,128], index: 3, kind: output, shape index: {}]  }
   0x1   :  { %s719_s14 = smov 0  }
   0x2 LB: > { %s25_s15 = sadd.s32 1, %s689_s13  ;;  %p593_p0 = scmp.ge.s32.totalorder %s693_s14, 1  ;;  %s693_s14 = sphi %s719_s14, %s13_s14   ;;  %s689_s13 = sphi %s717_s13, %s894_s13   ;;  %s685_s12 = sphi %s715_s12, %s893_s12  }
   0x3   : > { %p27_p1 = scmp.ge.s32.totalorder %s25_s15, 2  ;;  %p151_p2 = scmp.lt.s32.totalorder %s693_s14, 3 }
   0x5   : > { %s896_s15 = smov (%p27_p1, %s25_s15), 0  ;;  %p152_p3 = pnand %p593_p0, %p151_p2 }
   0x6   : > { %p179_p4 = scmp.lt.s32.totalorder (!%p152_p3), %s685_s12, 1 }
   0x7   : > { %155 = sbr.rel (%p152_p3) target bundleno = 64 (0x40), region = 32 }
   0xc   : > { %s898_s12 = smov (!%p179_p4, %s685_s12), 1  ;;  %v739_v0 = vld [vmem:[%s890_s1] ss:$0 sm:$0xff]  ;;  %v749_v1 = vld [vmem:[%s890_s1 + $0x1] ss:$0 sm:$0xff] }
   0xd   : > { %s646_s16 = smul.u32 80, %s898_s12  ;;  %v754_v2 = vld [vmem:[%s890_s1 + $0x2] ss:$0 sm:$0xff]  ;;  %v759_v3 = vld [vmem:[%s890_s1 + $0x3] ss:$0 sm:$0xff]  ;;  %s645_s17 = sshll.u32 %s898_s12, 3 }
   0xe   : > { %v769_v12 = vld [vmem:[%s890_s1 + $0x4] ss:$0 sm:$0xff]  ;;  %v775_v17 = vld [vmem:[%s890_s1 + $0x5] ss:$0 sm:$0xff]  ;;  %v789_v28 = vld [vmem:[%s890_s1 + $0x8] ss:$0 sm:$0xff]  ;;  %s859_s19 = scalar_lea.vmem %s892_s3, %s645_s17 }
   0xf   : > { %s744_s21 = scalar_lea.vmem %s889_s0, %s646_s16  ;;  %v800_v38 = vld [vmem:[%s890_s1 + $0x6] ss:$0 sm:$0xff]  ;;  %v805_v43 = vld [vmem:[%s890_s1 + $0x7] ss:$0 sm:$0xff] }
  0x10   : > { %v197_v4 = vld [vmem:[%s744_s21] sm:$0x3]  ;;  %v598_v5 = vld [vmem:[%s744_s21 + $0x14] sm:$0x3]  ;;  %v606_v10 = vld [vmem:[%s744_s21 + $0x28] sm:$0x3] }
  0x11   : > { %v247_v6 = vld [vmem:[%s744_s21] sm:$0x7]  ;;  %v201_v7 = vunpack.c.l.bf16 %v197_v4  ;;  %v227_v8 = vunpack.c.l.bf16 %v598_v5  ;;  %v612_v11 = vld [vmem:[%s744_s21 + $0x3c] sm:$0x3]  ;;  %v618_v13 = vld [vmem:[%s744_s21 + $0x28] sm:$0x7]  ;;  %v290_v14 = vunpack.c.l.bf16 %v606_v10 }
  0x12   : > { %v251_v9 = vunpack.c.l.bf16 %v247_v6  ;;  %v317_v15 = vunpack.c.l.bf16 %v612_v11  ;;  %v341_v16 = vunpack.c.l.bf16 %v618_v13  ;;  %v624_v18 = vld [vmem:[%s744_s21 + $0x4] sm:$0x3]  ;;  %v630_v23 = vld [vmem:[%s744_s21 + $0x18] sm:$0x3]  ;;  %v607_v30 = vld [vmem:[%s744_s21 + $0x2c] sm:$0x3] }
  0x13   : > { %v636_v19 = vld [vmem:[%s744_s21 + $0x4] sm:$0x7]  ;;  %v212_v20 = vmul.f32 %v739_v0, %v201_v7  ;;  %v239_v21 = vmul.f32 %v749_v1, %v227_v8  ;;  %v599_v25 = vld [vmem:[%s744_s21 + $0x18] sm:$0x3]  ;;  %v302_v26 = vmul.f32 %v759_v3, %v290_v14  ;;  %v380_v27 = vunpack.c.l.bf16 %v624_v18  ;;  %v613_v35 = vld [vmem:[%s744_s21 + $0x40] sm:$0x3] }
  0x14   : > { %v263_v22 = vmul.f32 %v754_v2, %v251_v9  ;;  %v198_v24 = vld [vmem:[%s744_s21 + $0x4] sm:$0x3]  ;;  %v353_v33 = vmul.f32 %v775_v17, %v341_v16  ;;  %v431_v34 = vunpack.c.l.bf16 %v636_v19  ;;  %v619_v36 = vld [vmem:[%s744_s21 + $0x2c] sm:$0x7]  ;;  %v329_v37 = vmul.f32 %v769_v12, %v317_v15  ;;  %v625_v51 = vld [vmem:[%s744_s21 + $0x8] sm:$0x3] }
  0x15   : > { %v248_v29 = vld [vmem:[%s744_s21 + $0x4] sm:$0x7]  ;;  %v243_v31 = vadd.f32 %v239_v21, %v212_v20  ;;  %v407_v39 = vunpack.c.l.bf16 %v630_v23  ;;  %v202_v40 = vunpack.c.l.bf16 %v198_v24  ;;  %v228_v41 = vunpack.c.l.bf16 %v599_v25  ;;  %v637_v52 = vld [vmem:[%s744_s21 + $0x8] sm:$0x7]  ;;  %v600_v58 = vld [vmem:[%s744_s21 + $0x1c] sm:$0x3] }
  0x16   : > { %v271_v32 = vrot.slane %v263_v22, 1  ;;  %v808_v44 = vmul.f32 %v789_v28, %v431_v34  ;;  %v252_v45 = vunpack.c.l.bf16 %v248_v29  ;;  %v291_v46 = vunpack.c.l.bf16 %v607_v30  ;;  %v199_v57 = vld [vmem:[%s744_s21 + $0x8] sm:$0x3]  ;;  %v631_v63 = vld [vmem:[%s744_s21 + $0x1c] sm:$0x3] }
  0x17   : > { %v213_v47 = vmul.f32 %v739_v0, %v202_v40  ;;  %v240_v48 = vmul.f32 %v749_v1, %v228_v41  ;;  %v318_v49 = vunpack.c.l.bf16 %v613_v35  ;;  %v342_v50 = vunpack.c.l.bf16 %v619_v36  ;;  %v249_v8 = vld [vmem:[%s744_s21 + $0x8] sm:$0x7]  ;;  %v608_v9 = vld [vmem:[%s744_s21 + $0x30] sm:$0x3]  ;;  %v614_v15 = vld [vmem:[%s744_s21 + $0x44] sm:$0x3] }
  0x18   : > { %v279_v42 = vadd.f32 %v271_v32, %v243_v31  ;;  %v361_v54 = vrot.slane %v353_v33, 1  ;;  %v392_v55 = vmul.f32 %v800_v38, %v380_v27  ;;  %v264_v56 = vmul.f32 %v754_v2, %v252_v45  ;;  %v620_v21 = vld [vmem:[%s744_s21 + $0x30] sm:$0x7]  ;;  %v638_v31 = vld [vmem:[%s744_s21 + $0xc] sm:$0x7] }
  0x19   : > { %v419_v59 = vmul.f32 %v805_v43, %v407_v39  ;;  %v451_v60 = vrot.slane %v808_v44, 1  ;;  %v244_v61 = vadd.f32 %v240_v48, %v213_v47  ;;  %v303_v62 = vmul.f32 %v759_v3, %v291_v46  ;;  %v200_v36 = vld [vmem:[%s744_s21 + $0xc] sm:$0x3]  ;;  %v632_v44 = vld [vmem:[%s744_s21 + $0x20] sm:$0x3] }
  0x1a   : > { %v306_v53 = vadd.f32 %v302_v26, %v279_v42  ;;  %v272_v5 = vrot.slane %v264_v56, 1  ;;  %v354_v6 = vmul.f32 %v775_v17, %v342_v50  ;;  %v432_v7 = vunpack.c.l.bf16 %v637_v52  ;;  %v626_v42 = vld [vmem:[%s744_s21 + $0xc] sm:$0x3]  ;;  %v841_v45 = vld [vmem:[%s891_s2] ss:$0 sm:$0xff] }
  0x1b   : > { %v330_v10 = vmul.f32 %v769_v12, %v318_v49  ;;  %v381_v11 = vunpack.c.l.bf16 %v625_v51  ;;  %v203_v13 = vunpack.c.l.bf16 %v199_v57  ;;  %v229_v14 = vunpack.c.l.bf16 %v600_v58  ;;  %v601_v50 = vld [vmem:[%s744_s21 + $0x20] sm:$0x3]  ;;  %v609_v56 = vld [vmem:[%s744_s21 + $0x34] sm:$0x3] }
  0x1c   : > { %v333_v4 = vadd.f32 %v329_v37, %v306_v53  ;;  %v280_v18 = vadd.f32 %v272_v5, %v244_v61  ;;  %v408_v19 = vunpack.c.l.bf16 %v631_v63  ;;  %v444_v20 = vmul.f32 %v789_v28, %v432_v7 }
  0x1d   : > { %v214_v22 = vmul.f32 %v739_v0, %v203_v13  ;;  %v241_v23 = vmul.f32 %v749_v1, %v229_v14  ;;  %v253_v24 = vunpack.c.l.bf16 %v249_v8  ;;  %v292_v25 = vunpack.c.l.bf16 %v608_v9 }
  0x1e   : > { %v369_v16 = vadd.f32 %v361_v54, %v333_v4  ;;  %v307_v27 = vadd.f32 %v303_v62, %v280_v18  ;;  %v362_v29 = vrot.slane %v354_v6, 1  ;;  %v319_v30 = vunpack.c.l.bf16 %v614_v15  ;;  %v615_v62 = vld [vmem:[%s744_s21 + $0x48] sm:$0x3] }
  0x1f   : > { %v393_v32 = vmul.f32 %v800_v38, %v381_v11  ;;  %v245_v33 = vadd.f32 %v241_v23, %v214_v22  ;;  %v265_v34 = vmul.f32 %v754_v2, %v253_v24  ;;  %v343_v35 = vunpack.c.l.bf16 %v620_v21  ;;  %v639_v24 = vld [vmem:[%s744_s21 + $0x10] sm:$0x7] }
  0x20   : > { %v396_v26 = vadd.f32 %v392_v55, %v369_v16  ;;  %v334_v39 = vadd.f32 %v330_v10, %v307_v27  ;;  %v420_v40 = vmul.f32 %v805_v43, %v408_v19  ;;  %v452_v41 = vrot.slane %v444_v20, 1  ;;  %v250_v55 = vld [vmem:[%s744_s21 + $0xc] sm:$0x7] }
  0x21   : > { %v273_v46 = vrot.slane %v265_v34, 1  ;;  %v304_v47 = vmul.f32 %v759_v3, %v292_v25  ;;  %v355_v48 = vmul.f32 %v775_v17, %v343_v35  ;;  %v433_v49 = vunpack.c.l.bf16 %v638_v31 }
  0x22   : > { %v423_v37 = vadd.f32 %v419_v59, %v396_v26  ;;  %v370_v52 = vadd.f32 %v362_v29, %v334_v39  ;;  %v331_v53 = vmul.f32 %v769_v12, %v319_v30  ;;  %v204_v54 = vunpack.c.l.bf16 %v200_v36 }
  0x23   : > { %v281_v57 = vadd.f32 %v273_v46, %v245_v33  ;;  %v363_v58 = vrot.slane %v355_v48, 1  ;;  %v382_v59 = vunpack.c.l.bf16 %v626_v42  ;;  %v409_v61 = vunpack.c.l.bf16 %v632_v44 }
  0x24   : > { %v459_v51 = vadd.f32 %v451_v60, %v423_v37  ;;  %v397_v4 = vadd.f32 %v393_v32, %v370_v52  ;;  %v215_v5 = vmul.f32 %v739_v0, %v204_v54  ;;  %v230_v6 = vunpack.c.l.bf16 %v601_v50  ;;  %v621_v60 = vld [vmem:[%s744_s21 + $0x34] sm:$0x7]  ;;  %v633_v32 = vld [vmem:[%s744_s21 + $0x24] sm:$0x3] }
  0x25   : > { %v308_v7 = vadd.f32 %v304_v47, %v281_v57  ;;  %v445_v8 = vmul.f32 %v789_v28, %v433_v49  ;;  %v254_v9 = vunpack.c.l.bf16 %v250_v55  ;;  %v293_v10 = vunpack.c.l.bf16 %v609_v56 }
  0x26   : > { %v470_v63 = vadd.f32 %v841_v45, %v459_v51  ;;  %v424_v13 = vadd.f32 %v420_v40, %v397_v4  ;;  %v242_v14 = vmul.f32 %v749_v1, %v230_v6  ;;  %v320_v15 = vunpack.c.l.bf16 %v615_v62  ;;  %v627_v1 = vld [vmem:[%s744_s21 + $0x10] sm:$0x3] }
  0x27   : > { %v335_v0 = vadd.f32 %v331_v53, %v308_v7  ;;  %v394_v16 = vmul.f32 %v800_v38, %v382_v59  ;;  %v266_v18 = vmul.f32 %v754_v2, %v254_v9  ;;  %v344_v19 = vunpack.c.l.bf16 %v621_v60 }
  0x28   : > { %v474_v11 = vmax.f32 %v470_v63, 0.0  ;;  %v460_v21 = vadd.f32 %v452_v41, %v424_v13  ;;  %v421_v22 = vmul.f32 %v805_v43, %v409_v61  ;;  %v246_v23 = vadd.f32 %v242_v14, %v215_v5 }
  0x29   : > { %v371_v25 = vadd.f32 %v363_v58, %v335_v0  ;;  %v274_v26 = vrot.slane %v266_v18, 1  ;;  %v305_v27 = vmul.f32 %v759_v3, %v293_v10  ;;  %v356_v29 = vmul.f32 %v775_v17, %v344_v19 }
  0x2a   : > { %v478_v20 = vpack.c.bf16 %v474_v11, %v474_v11  ;;  %v471_v30 = vadd.f32 %v841_v45, %v460_v21  ;;  %v453_v31 = vrot.slane %v445_v8, 1  ;;  %v332_v2 = vmul.f32 %v769_v12, %v320_v15 }
  0x2b   : > { %v398_v33 = vadd.f32 %v394_v16, %v371_v25  ;;  %v282_v34 = vadd.f32 %v274_v26, %v246_v23  ;;  %v383_v35 = vunpack.c.l.bf16 %v627_v1  ;;  %v434_v36 = vunpack.c.l.bf16 %v639_v24 }
  0x2c   : > { %482 = vst [vmem:[%s859_s19] sm:$0x3] %v478_v20  ;;  %v475_v37 = vmax.f32 %v471_v30, 0.0  ;;  %v364_v41 = vrot.slane %v356_v29, 1  ;;  %v410_v3 = vunpack.c.l.bf16 %v633_v32 }
  0x2d   : > { %v425_v39 = vadd.f32 %v421_v22, %v398_v33  ;;  %v309_v40 = vadd.f32 %v305_v27, %v282_v34  ;;  %v395_v46 = vmul.f32 %v800_v38, %v383_v35  ;;  %v446_v12 = vmul.f32 %v789_v28, %v434_v36 }
  0x2e   : > { %v479_v42 = vpack.c.bf16 %v475_v37, %v475_v37  ;;  %v422_v49 = vmul.f32 %v805_v43, %v410_v3 }
  0x2f   : > { %v461_v17 = vadd.f32 %v453_v31, %v425_v39  ;;  %v336_v44 = vadd.f32 %v332_v2, %v309_v40  ;;  %v454_v52 = vrot.slane %v446_v12, 1 }
  0x30   : > { %483 = vst [vmem:[%s859_s19 + $0x2] sm:$0x3] %v479_v42 }
  0x31   : > { %v472_v47 = vadd.f32 %v841_v45, %v461_v17  ;;  %v372_v48 = vadd.f32 %v364_v41, %v336_v44 }
  0x33   : > { %v476_v50 = vmax.f32 %v472_v47, 0.0  ;;  %v399_v51 = vadd.f32 %v395_v46, %v372_v48 }
  0x35   : > { %v480_v53 = vpack.c.bf16 %v476_v50, %v476_v50  ;;  %v426_v54 = vadd.f32 %v422_v49, %v399_v51 }
  0x37   : > { %484 = vst [vmem:[%s859_s19 + $0x4] sm:$0x3] %v480_v53  ;;  %v462_v55 = vadd.f32 %v454_v52, %v426_v54 }
  0x39   : > { %v473_v56 = vadd.f32 %v841_v45, %v462_v55 }
  0x3b   : > { %v477_v57 = vmax.f32 %v473_v56, 0.0 }
  0x3d   : > { %v481_v38 = vpack.c.bf16 %v477_v57, %v477_v57 }
  0x3f   : > { %485 = vst [vmem:[%s859_s19 + $0x6] sm:$0x3] %v481_v38 }
  0x40 PF: > { %s13_s14 = sadd.s32 1, %s693_s14   ;;  %s893_s12 = smov %s689_s13 }
  0x41   : > { %p10_p5 = scmp.ge.s32.totalorder %s13_s14, 4   ;;  %s894_s13 = smov %s896_s15 }
  0x43   :  { %12 = sbr.rel (!%p10_p5) target bundleno = 2 (0x2), region = 76 }

// kernel: mobilenet_v3_forward.20
= control target key start
LH: loop header
LB: loop body
LE: loop exit
PB: predicated region body
PF: predicated region fallthrough
CT: control target
= control target key end

     0   :  { %s555_s18 = smov 0   ;;  %s612_s0 = inlined_call_operand.vmem [shape: f32[2,1,1,128], index: 0, kind: input, shape index: {}]   ;;  %s613_s1 = inlined_call_operand.vmem [shape: bf16[128,24], index: 1, kind: input, shape index: {}]   ;;  %s614_s2 = inlined_call_operand.vmem [shape: f32[1,24], index: 2, kind: input, shape index: {}]   ;;  %s615_s3 = inlined_call_operand.vmem [shape: bf16[24,128], index: 3, kind: input, shape index: {}]   ;;  %s616_s4 = inlined_call_operand.vmem [shape: f32[1,128], index: 4, kind: input, shape index: {}]   ;;  %s617_s5 = inlined_call_operand.vmem [shape: f32[2,1,128], index: 5, kind: output, shape index: {}]  }
   0x1 LB: > { %s437_s19 = sadd.s32 4294967295, %s521_s18   ;;  %p441_p0 = scmp.ge.s32.totalorder %s521_s18, 1  ;;  %s521_s18 = sphi %s555_s18, %s15_s18  }
   0x2   : > { %p185_p1 = scmp.lt.s32.totalorder %s521_s18, 3 }
   0x4   : > { %p186_p2 = pnand %p441_p0, %p185_p1 }
   0x5   : > { %p209_p3 = scmp.lt.s32.totalorder (!%p186_p2), %s437_s19, 1 }
   0x6   : > { %189 = sbr.rel (%p186_p2) target bundleno = 447 (0x1bf), region = 40 }
   0xb   : > { %v505_v0 = vld [vmem:[%s613_s1 + $0x38] sm:$0xff]   ;;  %v523_v1 = vmov 0.0   ;;  %v506_v2 = vld [vmem:[%s613_s1 + $0x30] sm:$0xff]   ;;  %vm524_vm0 = vmmov 0   ;;  %v507_v3 = vld [vmem:[%s613_s1 + $0x28] sm:$0xff]   ;;  %s619_s19 = smov (!%p209_p3, %s437_s19), 1 }
   0xc   : > { %467 = vmatprep.subr.bf16.mxu0 %v523_v1  ;;  %487 = vmatprep.subr.bf16.mxu1 %v523_v1  ;;  %v508_v4 = vld [vmem:[%s613_s1 + $0x20] sm:$0xff]   ;;  %v509_v5 = vld [vmem:[%s613_s1 + $0x18] sm:$0xff]   ;;  %v510_v6 = vld [vmem:[%s613_s1 + $0x10] sm:$0xff]   ;;  %s211_s9 = scalar_lea.vmem %s612_s0, %s619_s19  ;;  %vm344_vm1 = vcmask 1043456   ;;  %vm340_vm2 = vcmask 195584   ;;  %s214_s26 = scalar_lea.vmem %s617_s5, %s619_s19 }
   0xd   : > { %468 = vmatpush3.bf16.msra.mxu0 %v505_v0  ;;  %483 = vmatprep.mubr.msk.bf16.mxu0 %vm524_vm0, %v523_v1  ;;  %v511_v7 = vld [vmem:[%s613_s1 + $0x8] sm:$0xff]   ;;  %v216_v8 = vld [vmem:[%s211_s9] sm:$0x1] }
   0xe   : > { %469 = vmatprep.subr.bf16.mxu0 %v523_v1  ;;  %491 = vmatprep.mubr.msk.bf16.mxu1 %vm524_vm0, %v523_v1  ;;  %v218_v9 = vmul.f32 0.0625, %v216_v8  ;;  %v512_v10 = vld [vmem:[%s613_s1] sm:$0xff]   ;;  %v513_v12 = vld [vmem:[%s615_s3 + $0x8] ss:$0 sps:$4 sm:$0xff]  }
   0xf   : > { %v346_v13 = vsel %vm344_vm1, %v513_v12, 0  ;;  %v514_v14 = vld [vmem:[%s615_s3] sm:$0xff]  }
  0x10   : > { %v219_v11 = vpack.c.bf16 %v218_v9, %v218_v9  ;;  %488 = vmatpush3.bf16.msra.mxu1 %v346_v13  ;;  %v236_v15 = vld [vmem:[%s614_s2] sm:$0x1] }
  0x11   : > { %470 = vmatpush3.bf16.msra.mxu0 %v506_v2  ;;  %489 = vmatprep.subr.bf16.mxu1 %v523_v1  ;;  %v330_v23 = vld [vmem:[%s616_s4] sm:$0x1] }
  0x12   : > { %471 = vmatprep.subr.bf16.mxu0 %v523_v1 }
  0x14   : > { %490 = vmatpush3.bf16.msra.mxu1 %v514_v14 }
  0x15   : > { %472 = vmatpush3.bf16.msra.mxu0 %v507_v3 }
  0x16   : > { %473 = vmatprep.subr.bf16.mxu0 %v523_v1 }
  0x19   : > { %474 = vmatpush3.bf16.msra.mxu0 %v508_v4 }
  0x1a   : > { %475 = vmatprep.subr.bf16.mxu0 %v523_v1 }
  0x1d   : > { %476 = vmatpush3.bf16.msra.mxu0 %v509_v5 }
  0x1e   : > { %477 = vmatprep.subr.bf16.mxu0 %v523_v1 }
  0x21   : > { %478 = vmatpush3.bf16.msra.mxu0 %v510_v6 }
  0x22   : > { %479 = vmatprep.subr.bf16.mxu0 %v523_v1 }
  0x25   : > { %480 = vmatpush3.bf16.msra.mxu0 %v511_v7 }
  0x26   : > { %481 = vmatprep.subr.bf16.mxu0 %v523_v1 }
  0x29   : > { %482 = vmatpush3.bf16.msra.mxu0 %v512_v10 }
  0x2c   : > { %484 = vmatmul.mubr.bf16.vlgmr.msra.gmra.mxu0 %v219_v11 }
  0xec   : > { %v319_v16 = vpop.f32.mrf.mxu0 }
  0xed   : > { %v320_v17 = vadd.f32 %v319_v16, %v236_v15 }
  0xee   : > { %v485_v18 = vpop.f32.mrf.mxu0 }
  0xef   : > { %v325_v19 = vmax.f32 %v320_v17, 0.0 }
  0xf0   : > { %v322_v20 = vpop.f32.mrf.mxu0 }
  0xf1   : > { %v326_v21 = vpack.c.bf16 %v325_v19, %v325_v19 }
  0xf2   : > { %v486_v22 = vpop.f32.mrf.mxu0 }
  0xf3   : > { %492 = vmatmul.mubr.msk.bf16.vlgmr.msra.gmra.mxu1 %vm340_vm2, %v326_v21 }
 0x1b3   : > { %v382_v24 = vpop.f32.mrf.mxu1 }
 0x1b4   : > { %v383_v25 = vadd.f32 %v382_v24, %v330_v23 }
 0x1b5   : > { %v493_v26 = vpop.f32.mrf.mxu1 }
 0x1b6   : > { %v388_v27 = vadd.f32 3.0, %v383_v25 }
 0x1b7   : > { %v385_v28 = vpop.f32.mrf.mxu1 }
 0x1b8   : > { %v389_v29 = vmax.f32 %v388_v27, 0.0 }
 0x1b9   : > { %v494_v30 = vpop.f32.mrf.mxu1 }
 0x1ba   : > { %v390_v31 = vmin.f32 %v389_v29, 6.0 }
 0x1bc   : > { %v391_v32 = vmul.f32 0.16666667, %v390_v31 }
 0x1be   : > { %392 = vst [vmem:[%s214_s26] sm:$0x1] %v391_v32 }
 0x1bf PF: > { %s15_s18 = sadd.s32 1, %s521_s18  }
 0x1c0   : > { %p12_p4 = scmp.ge.s32.totalorder %s15_s18, 4  }
 0x1c2   :  { %14 = sbr.rel (!%p12_p4) target bundleno = 1 (0x1), region = 70 }

// kernel: mobilenet_v3_forward.21
= control target key start
LH: loop header
LB: loop body
LE: loop exit
PB: predicated region body
PF: predicated region fallthrough
CT: control target
= control target key end

     0   :  { %s729_s18 = smov 0   ;;  %s731_s19 = smov 0   ;;  %s800_s0 = inlined_call_operand.vmem [shape: bf16[2,16,128], index: 0, kind: input, shape index: {}]   ;;  %s801_s1 = inlined_call_operand.vmem [shape: bf16[128,24], index: 1, kind: input, shape index: {}]   ;;  %s802_s2 = inlined_call_operand.vmem [shape: f32[1,24], index: 2, kind: input, shape index: {}]   ;;  %s803_s3 = inlined_call_operand.vmem [shape: f32[2,1,128], index: 3, kind: input, shape index: {}]   ;;  %s804_s4 = inlined_call_operand.vmem [shape: bf16[2,16,24], index: 4, kind: input, shape index: {}]   ;;  %s805_s5 = inlined_call_operand.vmem [shape: bf16[2,16,24], index: 5, kind: output, shape index: {}]  }
   0x1   :  { %s733_s20 = smov 0  }
   0x2 LB: > { %s27_s21 = sadd.s32 1, %s691_s19  ;;  %p576_p0 = scmp.ge.s32.totalorder %s695_s20, 1  ;;  %s695_s20 = sphi %s733_s20, %s15_s20   ;;  %s691_s19 = sphi %s731_s19, %s807_s19   ;;  %s687_s18 = sphi %s729_s18, %s806_s18  }
   0x3   : > { %p29_p1 = scmp.ge.s32.totalorder %s27_s21, 2  ;;  %p233_p2 = scmp.lt.s32.totalorder %s695_s20, 3 }
   0x5   : > { %s809_s21 = smov (%p29_p1, %s27_s21), 0  ;;  %p234_p3 = pnand %p576_p0, %p233_p2 }
   0x6   : > { %p282_p4 = scmp.lt.s32.totalorder (!%p234_p3), %s687_s18, 1 }
   0x7   : > { %237 = sbr.rel (%p234_p3) target bundleno = 249 (0xf9), region = 40 }
   0xc   : > { %v665_v0 = vld [vmem:[%s801_s1 + $0x38] sm:$0xff]   ;;  %v697_v1 = vmov 0.0   ;;  %v666_v2 = vld [vmem:[%s801_s1 + $0x30] sm:$0xff]   ;;  %vm698_vm0 = vmmov 0   ;;  %v667_v3 = vld [vmem:[%s801_s1 + $0x28] sm:$0xff]   ;;  %s811_s18 = smov (!%p282_p4, %s687_s18), 1 }
   0xd   : > { %619 = vmatprep.subr.bf16.mxu0 %v697_v1  ;;  %635 = vmatprep.mubr.msk.bf16.mxu0 %vm698_vm0, %v697_v1  ;;  %v668_v4 = vld [vmem:[%s801_s1 + $0x20] sm:$0xff]   ;;  %s759_s30 = sshll.u32 %s811_s18, 3  ;;  %v669_v5 = vld [vmem:[%s801_s1 + $0x18] sm:$0xff]   ;;  %v670_v6 = vld [vmem:[%s801_s1 + $0x10] sm:$0xff]   ;;  %s293_s15 = scalar_lea.vmem %s803_s3, %s811_s18  ;;  %vm455_vm1 = vcmask 191488  }
   0xe   : > { %620 = vmatpush3.bf16.msra.mxu0 %v665_v0  ;;  %s289_s10 = scalar_lea.vmem %s800_s0, %s759_s30  ;;  %v671_v10 = vld [vmem:[%s801_s1 + $0x8] sm:$0xff]   ;;  %v583_v11 = vld [vmem:[%s293_s15] ss:$0 sm:$0xff]  ;;  %s302_s25 = scalar_lea.vmem %s804_s4, %s759_s30 }
   0xf   : > { %621 = vmatprep.subr.bf16.mxu0 %v697_v1  ;;  %v603_v7 = vld [vmem:[%s289_s10] sm:$0xff]   ;;  %s312_s6 = scalar_lea.vmem %s805_s5, %s759_s30 }
  0x10   : > { %v604_v8 = vunpack.c.l.bf16 %v603_v7  ;;  %v605_v9 = vunpack.c.h.bf16 %v603_v7  ;;  %v672_v14 = vld [vmem:[%s801_s1] sm:$0xff]  }
  0x11   : > { %v607_v16 = vld [vmem:[%s302_s25] sm:$0xff]  }
  0x12   : > { %622 = vmatpush3.bf16.msra.mxu0 %v666_v2  ;;  %v326_v12 = vmul.f32 %v604_v8, %v583_v11  ;;  %v327_v13 = vmul.f32 %v605_v9, %v583_v11  ;;  %v584_v17 = vld [vmem:[%s802_s2] ss:$0 sm:$0xff]  ;;  %v608_v18 = vunpack.c.l.bf16 %v607_v16  ;;  %v609_v23 = vunpack.c.h.bf16 %v607_v16 }
  0x13   : > { %623 = vmatprep.subr.bf16.mxu0 %v697_v1 }
  0x14   : > { %v328_v15 = vpack.c.bf16 %v327_v13, %v326_v12 }
  0x16   : > { %624 = vmatpush3.bf16.msra.mxu0 %v667_v3 }
  0x17   : > { %625 = vmatprep.subr.bf16.mxu0 %v697_v1 }
  0x1a   : > { %626 = vmatpush3.bf16.msra.mxu0 %v668_v4 }
  0x1b   : > { %627 = vmatprep.subr.bf16.mxu0 %v697_v1 }
  0x1e   : > { %628 = vmatpush3.bf16.msra.mxu0 %v669_v5 }
  0x1f   : > { %629 = vmatprep.subr.bf16.mxu0 %v697_v1 }
  0x22   : > { %630 = vmatpush3.bf16.msra.mxu0 %v670_v6 }
  0x23   : > { %631 = vmatprep.subr.bf16.mxu0 %v697_v1 }
  0x26   : > { %632 = vmatpush3.bf16.msra.mxu0 %v671_v10 }
  0x27   : > { %633 = vmatprep.subr.bf16.mxu0 %v697_v1 }
  0x2a   : > { %634 = vmatpush3.bf16.msra.mxu0 %v672_v14 }
  0x2d   : > { %636 = vmatmul.mubr.bf16.vlgmr.msra.gmra.mxu0 %v328_v15 }
  0xed   : > { %v434_v19 = vpop.f32.mrf.mxu0 }
  0xee   : > { %v435_v20 = vadd.f32 %v584_v17, %v434_v19 }
  0xef   : > { %v637_v21 = vpop.f32.mrf.mxu0 }
  0xf0   : > { %v445_v22 = vadd.f32 %v608_v18, %v435_v20 }
  0xf1   : > { %v437_v24 = vpop.f32.mrf.mxu0 }
  0xf2   : > { %v600_v25 = vpack.c.bf16 %v445_v22, %v445_v22  ;;  %v438_v26 = vadd.f32 %v584_v17, %v437_v24 }
  0xf3   : > { %v638_v27 = vpop.f32.mrf.mxu0 }
  0xf4   : > { %456 = vst.msk [vmem:[%s312_s6] sm:$0xf] %vm455_vm1, %v600_v25  ;;  %v446_v28 = vadd.f32 %v609_v23, %v438_v26 }
  0xf6   : > { %v601_v29 = vpack.c.bf16 %v446_v28, %v446_v28 }
  0xf8   : > { %457 = vst.msk [vmem:[%s312_s6 + $0x4] sm:$0xf] %vm455_vm1, %v601_v29 }
  0xf9 PF: > { %s15_s20 = sadd.s32 1, %s695_s20   ;;  %s806_s18 = smov %s691_s19 }
  0xfa   : > { %p12_p5 = scmp.ge.s32.totalorder %s15_s20, 4   ;;  %s807_s19 = smov %s809_s21 }
  0xfc   :  { %14 = sbr.rel (!%p12_p5) target bundleno = 2 (0x2), region = 76 }

// kernel: mobilenet_v3_forward.22
= control target key start
LH: loop header
LB: loop body
LE: loop exit
PB: predicated region body
PF: predicated region fallthrough
CT: control target
= control target key end

     0   :  { %vm66_vm0 = vcmask 1043456   ;;  %v227_v1 = vmov 0   ;;  %vm59_vm1 = vcmask 195584   ;;  %v24_v9 = vlaneseq  ;;  %s278_s1 = inlined_call_operand.vmem [shape: bf16[24,256], index: 1, kind: input, shape index: {}]   ;;  %s279_s0 = inlined_call_operand.vmem [shape: bf16[32,24], index: 0, kind: input, shape index: {}]   ;;  %s280_s2 = inlined_call_operand.vmem [shape: f32[1,256], index: 2, kind: input, shape index: {}]   ;;  %s281_s3 = inlined_call_operand.vmem [shape: bf16[32,256], index: 3, kind: output, shape index: {}]  }
   0x1   :  { %v21_v0 = vld [vmem:[%s278_s1 + $0x10] sm:$0xff]  ;;  %105 = vmatprep.mubr.bf16.mxu0 %v227_v1  ;;  %115 = vmatprep.mubr.bf16.mxu1 %v227_v1  ;;  %v222_v4 = vld [vmem:[%s278_s1 + $0x4] ss:$8 sps:$4 sm:$0xff]   ;;  %v224_v6 = vld [vmem:[%s278_s1] ss:$8 sps:$4 sm:$0xff]  }
   0x2   :  { %v203_v2 = vcombine.high %v21_v0, %v21_v0  ;;  %v202_v3 = vcombine.low %v21_v0, %v21_v0  ;;  %v225_v7 = vld [vmem:[%s279_s0] sm:$0xff]   ;;  %v226_v8 = vld [vmem:[%s279_s0 + $0x8] sm:$0xff]   ;;  %v25_v10 = vshrl.u32 %v24_v9, 7 }
   0x3   :  { %v22_v12 = vld [vmem:[%s280_s2] sm:$0x3] }
   0x4   :  { %204 = vmatprep.subr.msk.bf16.mxu0 %vm66_vm0, %v203_v2  ;;  %215 = vmatprep.subr.msk.bf16.mxu1 %vm66_vm0, %v203_v2  ;;  %v68_v5 = vsel %vm66_vm0, %v202_v3, 0  ;;  %v26_v11 = vsub.s32 0, %v25_v10  ;;  %v30_v13 = vsub.s32 1, %v25_v10 }
   0x5   :  { %86 = vmatpush1.bf16.msra.mxu0 %v68_v5  ;;  %217 = vmatpush1.bf16.msra.mxu1 %v68_v5 }
   0x6   :  { %87 = vmatprep.subr.bf16.mxu0 %v222_v4  ;;  %216 = vmatprep.subr.bf16.mxu1 %v222_v4  ;;  %v27_v14 = vrot.slane %v22_v12, %v26_v11  ;;  %v31_v15 = vrot.slane %v22_v12, %v30_v13 }
   0x9   :  { %88 = vmatpush1.bf16.msra.mxu0 %v224_v6  ;;  %218 = vmatpush1.bf16.msra.mxu1 %v224_v6 }
   0xc   :  { %205 = vmatmul.mubr.msk.bf16.vlgmr.msra.gmra.mxu0 %vm59_vm1, %v225_v7  ;;  %206 = vmatmul.mubr.msk.bf16.vlgmr.msra.gmra.mxu1 %vm59_vm1, %v226_v8 }
  0xcc   :  { %v107_v16 = vpop.f32.mrf.mxu0  ;;  %v117_v17 = vpop.f32.mrf.mxu1 }
  0xcd   :  { %v108_v18 = vadd.f32 %v107_v16, %v27_v14  ;;  %v118_v19 = vadd.f32 %v117_v17, %v27_v14 }
  0xce   :  { %v109_v20 = vpop.f32.mrf.mxu0  ;;  %v119_v21 = vpop.f32.mrf.mxu1 }
  0xcf   :  { %v126_v22 = vadd.f32 3.0, %v108_v18  ;;  %v130_v23 = vadd.f32 3.0, %v118_v19  ;;  %v110_v24 = vadd.f32 %v109_v20, %v31_v15  ;;  %v120_v25 = vadd.f32 %v119_v21, %v31_v15 }
  0xd0   :  { %v111_v26 = vpop.f32.mrf.mxu0  ;;  %v121_v27 = vpop.f32.mrf.mxu1 }
  0xd1   :  { %v134_v28 = vmax.f32 %v126_v22, 0.0  ;;  %v138_v29 = vmax.f32 %v130_v23, 0.0  ;;  %v127_v30 = vadd.f32 3.0, %v110_v24  ;;  %v131_v31 = vadd.f32 3.0, %v120_v25 }
  0xd2   :  { %v112_v32 = vadd.f32 %v111_v26, %v27_v14  ;;  %v122_v33 = vadd.f32 %v121_v27, %v27_v14  ;;  %v113_v34 = vpop.f32.mrf.mxu0  ;;  %v123_v35 = vpop.f32.mrf.mxu1 }
  0xd3   :  { %v142_v36 = vmin.f32 %v134_v28, 6.0  ;;  %v146_v37 = vmin.f32 %v138_v29, 6.0  ;;  %v135_v38 = vmax.f32 %v127_v30, 0.0  ;;  %v139_v39 = vmax.f32 %v131_v31, 0.0 }
  0xd4   :  { %v128_v40 = vadd.f32 3.0, %v112_v32  ;;  %v132_v41 = vadd.f32 3.0, %v122_v33  ;;  %v114_v42 = vadd.f32 %v113_v34, %v31_v15  ;;  %v124_v43 = vadd.f32 %v123_v35, %v31_v15 }
  0xd5   :  { %v150_v44 = vmul.f32 %v142_v36, %v108_v18  ;;  %v154_v45 = vmul.f32 %v146_v37, %v118_v19  ;;  %v143_v46 = vmin.f32 %v135_v38, 6.0  ;;  %v147_v47 = vmin.f32 %v139_v39, 6.0 }
  0xd6   :  { %v136_v48 = vmax.f32 %v128_v40, 0.0  ;;  %v140_v49 = vmax.f32 %v132_v41, 0.0  ;;  %v129_v50 = vadd.f32 3.0, %v114_v42  ;;  %v133_v51 = vadd.f32 3.0, %v124_v43 }
  0xd7   :  { %v158_v52 = vmul.f32 0.16666667, %v150_v44  ;;  %v151_v53 = vmul.f32 %v143_v46, %v110_v24  ;;  %v155_v54 = vmul.f32 %v147_v47, %v120_v25  ;;  %v162_v59 = vmul.f32 0.16666667, %v154_v45 }
  0xd8   :  { %v144_v55 = vmin.f32 %v136_v48, 6.0  ;;  %v148_v56 = vmin.f32 %v140_v49, 6.0  ;;  %v137_v57 = vmax.f32 %v129_v50, 0.0  ;;  %v141_v58 = vmax.f32 %v133_v51, 0.0 }
  0xd9   :  { %v159_v60 = vmul.f32 0.16666667, %v151_v53  ;;  %v163_v61 = vmul.f32 0.16666667, %v155_v54 }
  0xda   :  { %v152_v62 = vmul.f32 %v144_v55, %v112_v32  ;;  %v156_v63 = vmul.f32 %v148_v56, %v122_v33  ;;  %v145_v0 = vmin.f32 %v137_v57, 6.0  ;;  %v149_v1 = vmin.f32 %v141_v58, 6.0 }
  0xdb   :  { %v211_v2 = vpack.c.bf16 %v159_v60, %v158_v52  ;;  %v213_v3 = vpack.c.bf16 %v163_v61, %v162_v59 }
  0xdc   :  { %v153_v4 = vmul.f32 %v145_v0, %v114_v42  ;;  %v157_v5 = vmul.f32 %v149_v1, %v124_v43  ;;  %v160_v6 = vmul.f32 0.16666667, %v152_v62  ;;  %v164_v7 = vmul.f32 0.16666667, %v156_v63 }
  0xdd   :  { %190 = vst [vmem:[%s281_s3] sm:$0xff] %v211_v2  ;;  %192 = vst [vmem:[%s281_s3 + $0x10] sm:$0xff] %v213_v3 }
  0xde   :  { %v161_v8 = vmul.f32 0.16666667, %v153_v4  ;;  %v165_v9 = vmul.f32 0.16666667, %v157_v5 }
  0xe0   :  { %v212_v10 = vpack.c.bf16 %v161_v8, %v160_v6  ;;  %v214_v11 = vpack.c.bf16 %v165_v9, %v164_v7 }
  0xe2   :  { %191 = vst [vmem:[%s281_s3 + $0x8] sm:$0xff] %v212_v10  ;;  %193 = vst [vmem:[%s281_s3 + $0x18] sm:$0xff] %v214_v11 }

// kernel: mobilenet_v3_forward.19
= control target key start
LH: loop header
LB: loop body
LE: loop exit
PB: predicated region body
PF: predicated region fallthrough
CT: control target
= control target key end

     0   :  { %s1506_s15 = smov 0   ;;  %s1508_s16 = smov 0   ;;  %s1731_s0 = inlined_call_operand.vmem [shape: bf16[2,1,8,8,128], index: 0, kind: input, shape index: {}]   ;;  %s1732_s1 = inlined_call_operand.vmem [shape: f32[25,1,128], index: 1, kind: input, shape index: {}]   ;;  %s1733_s2 = inlined_call_operand.vmem [shape: f32[1,128], index: 2, kind: input, shape index: {}]   ;;  %s1734_s3 = inlined_call_operand.vmem [shape: bf16[2,4,4,128], index: 3, kind: output, shape index: {0}]   ;;  %s1735_s4 = inlined_call_operand.vmem [shape: f32[2,1,1,128], index: 4, kind: output, shape index: {1}]  }
   0x1   :  { %s1510_s17 = smov 0  }
   0x2 LB: > { %s27_s18 = sadd.s32 1, %s1475_s16  ;;  %p1294_p0 = scmp.ge.s32.totalorder %s1479_s17, 1  ;;  %s1479_s17 = sphi %s1510_s17, %s15_s17   ;;  %s1475_s16 = sphi %s1508_s16, %s1737_s16   ;;  %s1471_s15 = sphi %s1506_s15, %s1736_s15  }
   0x3   : > { %p29_p1 = scmp.ge.s32.totalorder %s27_s18, 2  ;;  %p181_p2 = scmp.lt.s32.totalorder %s1479_s17, 3 }
   0x5   : > { %s1739_s18 = smov (%p29_p1, %s27_s18), 0  ;;  %p182_p3 = pnand %p1294_p0, %p181_p2 }
   0x6   : > { %p217_p4 = scmp.lt.s32.totalorder (!%p182_p3), %s1471_s15, 1 }
   0x7   : > { %185 = sbr.rel (%p182_p3) target bundleno = 145 (0x91), region = 32 }
   0xc   : > { %s1741_s15 = smov (!%p217_p4, %s1471_s15), 1  ;;  %v1299_v0 = vld [vmem:[%s1732_s1] ss:$0 sm:$0xff]  ;;  %v1301_v1 = vld [vmem:[%s1732_s1 + $0x1] ss:$0 sm:$0xff]  ;;  %vm1141_vm0 = vcmask 1043456  }
   0xd   : > { %s1431_s19 = sshll.u32 %s1741_s15, 5  ;;  %v1303_v28 = vld [vmem:[%s1732_s1 + $0x2] ss:$0 sm:$0xff]  ;;  %v1305_v43 = vld [vmem:[%s1732_s1 + $0x3] ss:$0 sm:$0xff]  ;;  %s1432_s6 = sshll.u32 %s1741_s15, 3 }
   0xe   : > { %s1530_s22 = scalar_lea.vmem %s1731_s0, %s1431_s19  ;;  %s230_s9 = scalar_lea.vmem %s1734_s3, %s1432_s6 }
   0xf   : > { %v241_v2 = vld [vmem:[%s1530_s22] sm:$0x3]  ;;  %v242_v3 = vld [vmem:[%s1530_s22 + $0x4] sm:$0x3]  ;;  %v243_v4 = vld [vmem:[%s1530_s22 + $0x8] sm:$0x3]  ;;  %s237_s12 = scalar_lea.vmem %s1735_s4, %s1741_s15 }
  0x10   : > { %v244_v5 = vld [vmem:[%s1530_s22 + $0xc] sm:$0x3]  ;;  %v245_v6 = vunpack.c.l.bf16 %v241_v2  ;;  %v246_v7 = vunpack.c.l.bf16 %v242_v3  ;;  %v247_v8 = vunpack.c.l.bf16 %v243_v4  ;;  %v264_v9 = vld [vmem:[%s1530_s22] sm:$0x7]  ;;  %v265_v10 = vld [vmem:[%s1530_s22 + $0x4] sm:$0x7] }
  0x11   : > { %v248_v11 = vunpack.c.l.bf16 %v244_v5  ;;  %v266_v12 = vld [vmem:[%s1530_s22 + $0x8] sm:$0x7]  ;;  %v267_v13 = vld [vmem:[%s1530_s22 + $0xc] sm:$0x7]  ;;  %v268_v14 = vunpack.c.l.bf16 %v264_v9  ;;  %v269_v15 = vunpack.c.l.bf16 %v265_v10  ;;  %v300_v16 = vld [vmem:[%s1530_s22] sm:$0x6] }
  0x12   : > { %v256_v17 = vmul.f32 %v1299_v0, %v245_v6  ;;  %v257_v18 = vmul.f32 %v1299_v0, %v246_v7  ;;  %v258_v19 = vmul.f32 %v1299_v0, %v247_v8  ;;  %v270_v20 = vunpack.c.l.bf16 %v266_v12  ;;  %v301_v21 = vld [vmem:[%s1530_s22 + $0x4] sm:$0x6]  ;;  %v302_v22 = vld [vmem:[%s1530_s22 + $0x8] sm:$0x6]  ;;  %v303_v23 = vld [vmem:[%s1530_s22 + $0xc] sm:$0x6] }
  0x13   : > { %v259_v24 = vmul.f32 %v1299_v0, %v248_v11  ;;  %v271_v25 = vunpack.c.l.bf16 %v267_v13  ;;  %v280_v26 = vmul.f32 %v1301_v1, %v268_v14  ;;  %v281_v27 = vmul.f32 %v1301_v1, %v269_v15  ;;  %v336_v41 = vld [vmem:[%s1530_s22] sm:$0xe]  ;;  %v337_v42 = vld [vmem:[%s1530_s22 + $0x4] sm:$0xe]  ;;  %v338_v48 = vld [vmem:[%s1530_s22 + $0x8] sm:$0xe] }
  0x14   : > { %v282_v29 = vmul.f32 %v1301_v1, %v270_v20  ;;  %v304_v30 = vunpack.c.l.bf16 %v300_v16  ;;  %v305_v31 = vunpack.c.l.bf16 %v301_v21  ;;  %v306_v32 = vunpack.c.l.bf16 %v302_v22  ;;  %v339_v49 = vld [vmem:[%s1530_s22 + $0xc] sm:$0xe]  ;;  %v372_v54 = vld [vmem:[%s1530_s22] sm:$0xc]  ;;  %v373_v59 = vld [vmem:[%s1530_s22 + $0x4] sm:$0xc] }
  0x15   : > { %v283_v33 = vmul.f32 %v1301_v1, %v271_v25  ;;  %v288_v34 = vrot.slane %v280_v26, 1  ;;  %v289_v35 = vrot.slane %v281_v27, 1  ;;  %v307_v36 = vunpack.c.l.bf16 %v303_v23  ;;  %v374_v60 = vld [vmem:[%s1530_s22 + $0x8] sm:$0xc]  ;;  %v375_v1 = vld [vmem:[%s1530_s22 + $0xc] sm:$0xc] }
  0x16   : > { %v290_v37 = vrot.slane %v282_v29, 1  ;;  %v316_v38 = vmul.f32 %v1303_v28, %v304_v30  ;;  %v317_v39 = vmul.f32 %v1303_v28, %v305_v31  ;;  %v318_v40 = vmul.f32 %v1303_v28, %v306_v32  ;;  %v1307_v6 = vld [vmem:[%s1732_s1 + $0x4] ss:$0 sm:$0xff]  ;;  %v1309_v20 = vld [vmem:[%s1530_s22 + $0x8] sm:$0x3] }
  0x17   : > { %v291_v44 = vrot.slane %v283_v33, 1  ;;  %v296_v45 = vadd.f32 %v288_v34, %v256_v17  ;;  %v297_v46 = vadd.f32 %v289_v35, %v257_v18  ;;  %v319_v47 = vmul.f32 %v1303_v28, %v307_v36  ;;  %v1313_v21 = vld [vmem:[%s1732_s1 + $0x5] ss:$0 sm:$0xff]  ;;  %v1310_v26 = vld [vmem:[%s1530_s22 + $0xc] sm:$0x3] }
  0x18   : > { %v298_v50 = vadd.f32 %v290_v37, %v258_v19  ;;  %v324_v51 = vrot.slane %v316_v38, 2  ;;  %v325_v52 = vrot.slane %v317_v39, 2  ;;  %v326_v53 = vrot.slane %v318_v40, 2  ;;  %v1308_v19 = vld [vmem:[%s1530_s22 + $0x4] sm:$0x3] }
  0x19   : > { %v299_v55 = vadd.f32 %v291_v44, %v259_v24  ;;  %v327_v56 = vrot.slane %v319_v47, 2  ;;  %v340_v57 = vunpack.c.l.bf16 %v336_v41  ;;  %v341_v58 = vunpack.c.l.bf16 %v337_v42  ;;  %v1311_v27 = vld [vmem:[%s1530_s22 + $0x10] sm:$0x3]  ;;  %v1314_v32 = vld [vmem:[%s1530_s22 + $0x4] sm:$0x7] }
  0x1a   : > { %v332_v61 = vadd.f32 %v324_v51, %v296_v45  ;;  %v333_v62 = vadd.f32 %v325_v52, %v297_v46  ;;  %v334_v63 = vadd.f32 %v326_v53, %v298_v50  ;;  %v342_v0 = vunpack.c.l.bf16 %v338_v48  ;;  %v1315_v37 = vld [vmem:[%s1530_s22 + $0x8] sm:$0x7]  ;;  %v1316_v38 = vld [vmem:[%s1530_s22 + $0xc] sm:$0x7]  ;;  %v1319_v48 = vld [vmem:[%s1732_s1 + $0x6] ss:$0 sm:$0xff] }
  0x1b   : > { %v335_v2 = vadd.f32 %v327_v56, %v299_v55  ;;  %v343_v3 = vunpack.c.l.bf16 %v339_v49  ;;  %v352_v4 = vmul.f32 %v1305_v43, %v340_v57  ;;  %v353_v5 = vmul.f32 %v1305_v43, %v341_v58  ;;  %v1320_v53 = vld [vmem:[%s1530_s22 + $0x4] sm:$0x6] }
  0x1c   : > { %v354_v7 = vmul.f32 %v1305_v43, %v342_v0  ;;  %v376_v8 = vunpack.c.l.bf16 %v372_v54  ;;  %v377_v9 = vunpack.c.l.bf16 %v373_v59  ;;  %v378_v10 = vunpack.c.l.bf16 %v374_v60  ;;  %v1321_v54 = vld [vmem:[%s1530_s22 + $0x8] sm:$0x6]  ;;  %v1322_v59 = vld [vmem:[%s1530_s22 + $0xc] sm:$0x6]  ;;  %v1323_v0 = vld [vmem:[%s1530_s22 + $0x10] sm:$0x6] }
  0x1d   : > { %v355_v11 = vmul.f32 %v1305_v43, %v343_v3  ;;  %v360_v12 = vrot.slane %v352_v4, 3  ;;  %v361_v13 = vrot.slane %v353_v5, 3  ;;  %v379_v14 = vunpack.c.l.bf16 %v375_v1  ;;  %v1317_v43 = vld [vmem:[%s1530_s22 + $0x10] sm:$0x7]  ;;  %v1325_v1 = vld [vmem:[%s1732_s1 + $0x7] ss:$0 sm:$0xff] }
  0x1e   : > { %v362_v15 = vrot.slane %v354_v7, 3  ;;  %v388_v16 = vmul.f32 %v1307_v6, %v376_v8  ;;  %v389_v17 = vmul.f32 %v1307_v6, %v377_v9  ;;  %v390_v18 = vmul.f32 %v1307_v6, %v378_v10  ;;  %v1326_v10 = vld [vmem:[%s1530_s22 + $0x4] sm:$0xe] }
  0x1f   : > { %v363_v22 = vrot.slane %v355_v11, 3  ;;  %v368_v23 = vadd.f32 %v360_v12, %v332_v61  ;;  %v369_v24 = vadd.f32 %v361_v13, %v333_v62  ;;  %v391_v25 = vmul.f32 %v1307_v6, %v379_v14 }
  0x20   : > { %v370_v28 = vadd.f32 %v362_v15, %v334_v63  ;;  %v396_v29 = vrot.slane %v388_v16, 4  ;;  %v397_v30 = vrot.slane %v389_v17, 4  ;;  %v398_v31 = vrot.slane %v390_v18, 4  ;;  %v1327_v15 = vld [vmem:[%s1530_s22 + $0x8] sm:$0xe] }
  0x21   : > { %v371_v33 = vadd.f32 %v363_v22, %v335_v2  ;;  %v399_v34 = vrot.slane %v391_v25, 4  ;;  %v415_v35 = vunpack.c.l.bf16 %v1308_v19  ;;  %v416_v36 = vunpack.c.l.bf16 %v1309_v20  ;;  %v1328_v16 = vld [vmem:[%s1530_s22 + $0xc] sm:$0xe] }
  0x22   : > { %v404_v39 = vadd.f32 %v396_v29, %v368_v23  ;;  %v405_v40 = vadd.f32 %v397_v30, %v369_v24  ;;  %v406_v41 = vadd.f32 %v398_v31, %v370_v28  ;;  %v417_v42 = vunpack.c.l.bf16 %v1310_v26  ;;  %v1331_v26 = vld [vmem:[%s1732_s1 + $0x8] ss:$0 sm:$0xff]  ;;  %v1332_v31 = vld [vmem:[%s1530_s22 + $0x4] sm:$0xc] }
  0x23   : > { %v407_v44 = vadd.f32 %v399_v34, %v371_v33  ;;  %v418_v45 = vunpack.c.l.bf16 %v1311_v27  ;;  %v427_v46 = vmul.f32 %v1313_v21, %v415_v35  ;;  %v428_v47 = vmul.f32 %v1313_v21, %v416_v36 }
  0x24   : > { %v429_v49 = vmul.f32 %v1313_v21, %v417_v42  ;;  %v439_v50 = vunpack.c.l.bf16 %v1314_v32  ;;  %v440_v51 = vunpack.c.l.bf16 %v1315_v37  ;;  %v441_v52 = vunpack.c.l.bf16 %v1316_v38  ;;  %v1333_v32 = vld [vmem:[%s1530_s22 + $0x8] sm:$0xc]  ;;  %v1334_v37 = vld [vmem:[%s1530_s22 + $0xc] sm:$0xc]  ;;  %v1335_v42 = vld [vmem:[%s1530_s22 + $0x10] sm:$0xc] }
  0x25   : > { %v430_v55 = vmul.f32 %v1313_v21, %v418_v45  ;;  %v431_v56 = vadd.f32 %v427_v46, %v404_v39  ;;  %v432_v57 = vadd.f32 %v428_v47, %v405_v40  ;;  %v442_v58 = vunpack.c.l.bf16 %v1317_v43  ;;  %v1329_v21 = vld [vmem:[%s1530_s22 + $0x10] sm:$0xe]  ;;  %v1337_v43 = vld [vmem:[%s1732_s1 + $0x9] ss:$0 sm:$0xff] }
  0x26   : > { %v433_v60 = vadd.f32 %v429_v49, %v406_v41  ;;  %v451_v61 = vmul.f32 %v1319_v48, %v439_v50  ;;  %v452_v62 = vmul.f32 %v1319_v48, %v440_v51  ;;  %v453_v63 = vmul.f32 %v1319_v48, %v441_v52  ;;  %v1338_v52 = vld [vmem:[%s1530_s22 + $0x8] sm:$0x3] }
  0x27   : > { %v434_v2 = vadd.f32 %v430_v55, %v407_v44  ;;  %v454_v3 = vmul.f32 %v1319_v48, %v442_v58  ;;  %v475_v4 = vunpack.c.l.bf16 %v1320_v53  ;;  %v476_v5 = vunpack.c.l.bf16 %v1321_v54  ;;  %v1340_v58 = vld [vmem:[%s1530_s22 + $0x10] sm:$0x3] }
  0x28   : > { %v459_v6 = vrot.slane %v451_v61, 1  ;;  %v460_v7 = vrot.slane %v452_v62, 1  ;;  %v461_v8 = vrot.slane %v453_v63, 1  ;;  %v477_v9 = vunpack.c.l.bf16 %v1322_v59  ;;  %v1341_v63 = vld [vmem:[%s1530_s22 + $0x14] sm:$0x3] }
  0x29   : > { %v462_v11 = vrot.slane %v454_v3, 1  ;;  %v478_v12 = vunpack.c.l.bf16 %v1323_v0  ;;  %v487_v13 = vmul.f32 %v1325_v1, %v475_v4  ;;  %v488_v14 = vmul.f32 %v1325_v1, %v476_v5  ;;  %v1343_v4 = vld [vmem:[%s1732_s1 + $0xa] ss:$0 sm:$0xff] }
  0x2a   : > { %v467_v17 = vadd.f32 %v459_v6, %v431_v56  ;;  %v468_v18 = vadd.f32 %v460_v7, %v432_v57  ;;  %v469_v19 = vadd.f32 %v461_v8, %v433_v60  ;;  %v489_v20 = vmul.f32 %v1325_v1, %v477_v9  ;;  %v1339_v57 = vld [vmem:[%s1530_s22 + $0xc] sm:$0x3]  ;;  %v1344_v9 = vld [vmem:[%s1530_s22 + $0x8] sm:$0x7] }
  0x2b   : > { %v470_v22 = vadd.f32 %v462_v11, %v434_v2  ;;  %v490_v23 = vmul.f32 %v1325_v1, %v478_v12  ;;  %v495_v24 = vrot.slane %v487_v13, 2  ;;  %v496_v25 = vrot.slane %v488_v14, 2 }
  0x2c   : > { %v497_v27 = vrot.slane %v489_v20, 2  ;;  %v511_v28 = vunpack.c.l.bf16 %v1326_v10  ;;  %v512_v29 = vunpack.c.l.bf16 %v1327_v15  ;;  %v513_v30 = vunpack.c.l.bf16 %v1328_v16  ;;  %v1345_v10 = vld [vmem:[%s1530_s22 + $0xc] sm:$0x7]  ;;  %v1346_v15 = vld [vmem:[%s1530_s22 + $0x10] sm:$0x7] }
  0x2d   : > { %v498_v33 = vrot.slane %v490_v23, 2  ;;  %v503_v34 = vadd.f32 %v495_v24, %v467_v17  ;;  %v504_v35 = vadd.f32 %v496_v25, %v468_v18  ;;  %v514_v36 = vunpack.c.l.bf16 %v1329_v21  ;;  %v1347_v20 = vld [vmem:[%s1530_s22 + $0x14] sm:$0x7]  ;;  %v1349_v21 = vld [vmem:[%s1732_s1 + $0xb] ss:$0 sm:$0xff] }
  0x2e   : > { %v505_v38 = vadd.f32 %v497_v27, %v469_v19  ;;  %v523_v39 = vmul.f32 %v1331_v26, %v511_v28  ;;  %v524_v40 = vmul.f32 %v1331_v26, %v512_v29  ;;  %v525_v41 = vmul.f32 %v1331_v26, %v513_v30  ;;  %v1351_v27 = vld [vmem:[%s1530_s22 + $0xc] sm:$0x6]  ;;  %v1352_v28 = vld [vmem:[%s1530_s22 + $0x10] sm:$0x6] }
  0x2f   : > { %v506_v44 = vadd.f32 %v498_v33, %v470_v22  ;;  %v526_v45 = vmul.f32 %v1331_v26, %v514_v36  ;;  %v547_v46 = vunpack.c.l.bf16 %v1332_v31  ;;  %v548_v47 = vunpack.c.l.bf16 %v1333_v32  ;;  %v1350_v26 = vld [vmem:[%s1530_s22 + $0x8] sm:$0x6]  ;;  %v1353_v33 = vld [vmem:[%s1530_s22 + $0x14] sm:$0x6] }
  0x30   : > { %v531_v48 = vrot.slane %v523_v39, 3  ;;  %v532_v49 = vrot.slane %v524_v40, 3  ;;  %v533_v50 = vrot.slane %v525_v41, 3  ;;  %v549_v51 = vunpack.c.l.bf16 %v1334_v37 }
  0x31   : > { %v534_v53 = vrot.slane %v526_v45, 3  ;;  %v550_v54 = vunpack.c.l.bf16 %v1335_v42  ;;  %v559_v55 = vmul.f32 %v1337_v43, %v547_v46  ;;  %v560_v56 = vmul.f32 %v1337_v43, %v548_v47 }
  0x32   : > { %v539_v59 = vadd.f32 %v531_v48, %v503_v34  ;;  %v540_v60 = vadd.f32 %v532_v49, %v504_v35  ;;  %v541_v61 = vadd.f32 %v533_v50, %v505_v38  ;;  %v561_v62 = vmul.f32 %v1337_v43, %v549_v51  ;;  %v1355_v38 = vld [vmem:[%s1732_s1 + $0xc] ss:$0 sm:$0xff]  ;;  %v1356_v51 = vld [vmem:[%s1530_s22 + $0x8] sm:$0xe] }
  0x33   : > { %v542_v0 = vadd.f32 %v534_v53, %v506_v44  ;;  %v562_v1 = vmul.f32 %v1337_v43, %v550_v54  ;;  %v567_v2 = vrot.slane %v559_v55, 4  ;;  %v568_v3 = vrot.slane %v560_v56, 4  ;;  %v1361_v53 = vld [vmem:[%s1732_s1 + $0xd] ss:$0 sm:$0xff] }
  0x34   : > { %v569_v5 = vrot.slane %v561_v62, 4  ;;  %v586_v6 = vunpack.c.l.bf16 %v1338_v52  ;;  %v587_v7 = vunpack.c.l.bf16 %v1339_v57  ;;  %v588_v8 = vunpack.c.l.bf16 %v1340_v58  ;;  %v1357_v52 = vld [vmem:[%s1530_s22 + $0xc] sm:$0xe]  ;;  %v1358_v58 = vld [vmem:[%s1530_s22 + $0x10] sm:$0xe] }
  0x35   : > { %v570_v11 = vrot.slane %v562_v1, 4  ;;  %v575_v12 = vadd.f32 %v567_v2, %v539_v59  ;;  %v576_v13 = vadd.f32 %v568_v3, %v540_v60  ;;  %v589_v14 = vunpack.c.l.bf16 %v1341_v63  ;;  %v1359_v59 = vld [vmem:[%s1530_s22 + $0x14] sm:$0xe] }
  0x36   : > { %v577_v16 = vadd.f32 %v569_v5, %v541_v61  ;;  %v598_v17 = vmul.f32 %v1343_v4, %v586_v6  ;;  %v599_v18 = vmul.f32 %v1343_v4, %v587_v7  ;;  %v600_v19 = vmul.f32 %v1343_v4, %v588_v8  ;;  %v1363_v5 = vld [vmem:[%s1530_s22 + $0xc] sm:$0xc]  ;;  %v1364_v6 = vld [vmem:[%s1530_s22 + $0x10] sm:$0xc] }
  0x37   : > { %v578_v22 = vadd.f32 %v570_v11, %v542_v0  ;;  %v601_v23 = vmul.f32 %v1343_v4, %v589_v14  ;;  %v610_v24 = vunpack.c.l.bf16 %v1344_v9  ;;  %v611_v25 = vunpack.c.l.bf16 %v1345_v10  ;;  %v1362_v0 = vld [vmem:[%s1530_s22 + $0x8] sm:$0xc]  ;;  %v1365_v11 = vld [vmem:[%s1530_s22 + $0x14] sm:$0xc] }
  0x38   : > { %v602_v29 = vadd.f32 %v598_v17, %v575_v12  ;;  %v603_v30 = vadd.f32 %v599_v18, %v576_v13  ;;  %v604_v31 = vadd.f32 %v600_v19, %v577_v16  ;;  %v612_v32 = vunpack.c.l.bf16 %v1346_v15  ;;  %v1367_v16 = vld [vmem:[%s1732_s1 + $0xe] ss:$0 sm:$0xff] }
  0x39   : > { %v605_v34 = vadd.f32 %v601_v23, %v578_v22  ;;  %v613_v35 = vunpack.c.l.bf16 %v1347_v20  ;;  %v622_v36 = vmul.f32 %v1349_v21, %v610_v24  ;;  %v623_v37 = vmul.f32 %v1349_v21, %v611_v25  ;;  %v1368_v25 = vld [vmem:[%s1530_s22 + $0xc] sm:$0x3] }
  0x3a   : > { %v624_v39 = vmul.f32 %v1349_v21, %v612_v32  ;;  %v646_v40 = vunpack.c.l.bf16 %v1350_v26  ;;  %v647_v41 = vunpack.c.l.bf16 %v1351_v27  ;;  %v648_v42 = vunpack.c.l.bf16 %v1352_v28 }
  0x3b   : > { %v625_v43 = vmul.f32 %v1349_v21, %v613_v35  ;;  %v630_v44 = vrot.slane %v622_v36, 1  ;;  %v631_v45 = vrot.slane %v623_v37, 1  ;;  %v649_v46 = vunpack.c.l.bf16 %v1353_v33  ;;  %v1371_v36 = vld [vmem:[%s1530_s22 + $0x18] sm:$0x3]  ;;  %v1373_v37 = vld [vmem:[%s1732_s1 + $0xf] ss:$0 sm:$0xff] }
  0x3c   : > { %v632_v47 = vrot.slane %v624_v39, 1  ;;  %v658_v48 = vmul.f32 %v1355_v38, %v646_v40  ;;  %v659_v49 = vmul.f32 %v1355_v38, %v647_v41  ;;  %v660_v50 = vmul.f32 %v1355_v38, %v648_v42  ;;  %v1374_v42 = vld [vmem:[%s1530_s22 + $0xc] sm:$0x7] }
  0x3d   : > { %v633_v54 = vrot.slane %v625_v43, 1  ;;  %v638_v55 = vadd.f32 %v630_v44, %v602_v29  ;;  %v639_v56 = vadd.f32 %v631_v45, %v603_v30  ;;  %v661_v57 = vmul.f32 %v1355_v38, %v649_v46  ;;  %v1369_v30 = vld [vmem:[%s1530_s22 + $0x10] sm:$0x3] }
  0x3e   : > { %v640_v60 = vadd.f32 %v632_v47, %v604_v31  ;;  %v666_v61 = vrot.slane %v658_v48, 2  ;;  %v667_v62 = vrot.slane %v659_v49, 2  ;;  %v668_v63 = vrot.slane %v660_v50, 2  ;;  %v1370_v31 = vld [vmem:[%s1530_s22 + $0x14] sm:$0x3] }
  0x3f   : > { %v641_v1 = vadd.f32 %v633_v54, %v605_v34  ;;  %v669_v2 = vrot.slane %v661_v57, 2  ;;  %v682_v3 = vunpack.c.l.bf16 %v1356_v51  ;;  %v683_v4 = vunpack.c.l.bf16 %v1357_v52  ;;  %v1375_v47 = vld [vmem:[%s1530_s22 + $0x10] sm:$0x7]  ;;  %v1376_v48 = vld [vmem:[%s1530_s22 + $0x14] sm:$0x7] }
  0x40   : > { %v674_v7 = vadd.f32 %v666_v61, %v638_v55  ;;  %v675_v8 = vadd.f32 %v667_v62, %v639_v56  ;;  %v676_v9 = vadd.f32 %v668_v63, %v640_v60  ;;  %v684_v10 = vunpack.c.l.bf16 %v1358_v58  ;;  %v1379_v58 = vld [vmem:[%s1732_s1 + $0x10] ss:$0 sm:$0xff]  ;;  %v1380_v63 = vld [vmem:[%s1530_s22 + $0xc] sm:$0x6] }
  0x41   : > { %v677_v12 = vadd.f32 %v669_v2, %v641_v1  ;;  %v685_v13 = vunpack.c.l.bf16 %v1359_v59  ;;  %v694_v14 = vmul.f32 %v1361_v53, %v682_v3  ;;  %v695_v15 = vmul.f32 %v1361_v53, %v683_v4 }
  0x42   : > { %v696_v17 = vmul.f32 %v1361_v53, %v684_v10  ;;  %v718_v18 = vunpack.c.l.bf16 %v1362_v0  ;;  %v719_v19 = vunpack.c.l.bf16 %v1363_v5  ;;  %v720_v20 = vunpack.c.l.bf16 %v1364_v6  ;;  %v1381_v0 = vld [vmem:[%s1530_s22 + $0x10] sm:$0x6]  ;;  %v1382_v5 = vld [vmem:[%s1530_s22 + $0x14] sm:$0x6]  ;;  %v1383_v10 = vld [vmem:[%s1530_s22 + $0x18] sm:$0x6] }
  0x43   : > { %v697_v21 = vmul.f32 %v1361_v53, %v685_v13  ;;  %v702_v22 = vrot.slane %v694_v14, 3  ;;  %v703_v23 = vrot.slane %v695_v15, 3  ;;  %v721_v24 = vunpack.c.l.bf16 %v1365_v11  ;;  %v1377_v53 = vld [vmem:[%s1530_s22 + $0x18] sm:$0x7]  ;;  %v1385_v11 = vld [vmem:[%s1732_s1 + $0x11] ss:$0 sm:$0xff] }
  0x44   : > { %v704_v26 = vrot.slane %v696_v17, 3  ;;  %v730_v27 = vmul.f32 %v1367_v16, %v718_v18  ;;  %v731_v28 = vmul.f32 %v1367_v16, %v719_v19  ;;  %v732_v29 = vmul.f32 %v1367_v16, %v720_v20  ;;  %v1386_v20 = vld [vmem:[%s1530_s22 + $0xc] sm:$0xe] }
  0x45   : > { %v705_v32 = vrot.slane %v697_v21, 3  ;;  %v710_v33 = vadd.f32 %v702_v22, %v674_v7  ;;  %v711_v34 = vadd.f32 %v703_v23, %v675_v8  ;;  %v733_v35 = vmul.f32 %v1367_v16, %v721_v24 }
  0x46   : > { %v712_v38 = vadd.f32 %v704_v26, %v676_v9  ;;  %v738_v39 = vrot.slane %v730_v27, 4  ;;  %v739_v40 = vrot.slane %v731_v28, 4  ;;  %v740_v41 = vrot.slane %v732_v29, 4  ;;  %v1388_v26 = vld [vmem:[%s1530_s22 + $0x14] sm:$0xe] }
  0x47   : > { %v713_v43 = vadd.f32 %v705_v32, %v677_v12  ;;  %v741_v44 = vrot.slane %v733_v35, 4  ;;  %v757_v45 = vunpack.c.l.bf16 %v1368_v25  ;;  %v758_v46 = vunpack.c.l.bf16 %v1369_v30  ;;  %v1387_v25 = vld [vmem:[%s1530_s22 + $0x10] sm:$0xe] }
  0x48   : > { %v746_v49 = vadd.f32 %v738_v39, %v710_v33  ;;  %v747_v50 = vadd.f32 %v739_v40, %v711_v34  ;;  %v748_v51 = vadd.f32 %v740_v41, %v712_v38  ;;  %v759_v52 = vunpack.c.l.bf16 %v1370_v31  ;;  %v1389_v31 = vld [vmem:[%s1530_s22 + $0x18] sm:$0xe]  ;;  %v1392_v41 = vld [vmem:[%s1530_s22 + $0xc] sm:$0xc] }
  0x49   : > { %v749_v54 = vadd.f32 %v741_v44, %v713_v43  ;;  %v760_v55 = vunpack.c.l.bf16 %v1371_v36  ;;  %v769_v56 = vmul.f32 %v1373_v37, %v757_v45  ;;  %v770_v57 = vmul.f32 %v1373_v37, %v758_v46  ;;  %v1391_v36 = vld [vmem:[%s1732_s1 + $0x12] ss:$0 sm:$0xff] }
  0x4a   : > { %v771_v59 = vmul.f32 %v1373_v37, %v759_v52  ;;  %v781_v60 = vunpack.c.l.bf16 %v1374_v42  ;;  %v782_v61 = vunpack.c.l.bf16 %v1375_v47  ;;  %v783_v62 = vunpack.c.l.bf16 %v1376_v48  ;;  %v1393_v42 = vld [vmem:[%s1530_s22 + $0x10] sm:$0xc]  ;;  %v1394_v47 = vld [vmem:[%s1530_s22 + $0x14] sm:$0xc]  ;;  %v1395_v52 = vld [vmem:[%s1530_s22 + $0x18] sm:$0xc] }
  0x4b   : > { %v772_v1 = vmul.f32 %v1373_v37, %v760_v55  ;;  %v773_v2 = vadd.f32 %v769_v56, %v746_v49  ;;  %v774_v3 = vadd.f32 %v770_v57, %v747_v50  ;;  %v784_v4 = vunpack.c.l.bf16 %v1377_v53  ;;  %v1397_v53 = vld [vmem:[%s1732_s1 + $0x13] ss:$0 sm:$0xff] }
  0x4c   : > { %v775_v6 = vadd.f32 %v771_v59, %v748_v51  ;;  %v793_v7 = vmul.f32 %v1379_v58, %v781_v60  ;;  %v794_v8 = vmul.f32 %v1379_v58, %v782_v61  ;;  %v795_v9 = vmul.f32 %v1379_v58, %v783_v62  ;;  %v1398_v62 = vld [vmem:[%s1530_s22 + $0x10] sm:$0x3] }
  0x4d   : > { %v776_v12 = vadd.f32 %v772_v1, %v749_v54  ;;  %v796_v13 = vmul.f32 %v1379_v58, %v784_v4  ;;  %v817_v14 = vunpack.c.l.bf16 %v1380_v63  ;;  %v818_v15 = vunpack.c.l.bf16 %v1381_v0  ;;  %v1400_v4 = vld [vmem:[%s1530_s22 + $0x18] sm:$0x3] }
  0x4e   : > { %v801_v16 = vrot.slane %v793_v7, 1  ;;  %v802_v17 = vrot.slane %v794_v8, 1  ;;  %v803_v18 = vrot.slane %v795_v9, 1  ;;  %v819_v19 = vunpack.c.l.bf16 %v1382_v5  ;;  %v1401_v9 = vld [vmem:[%s1530_s22 + $0x1c] sm:$0x3] }
  0x4f   : > { %v804_v21 = vrot.slane %v796_v13, 1  ;;  %v820_v22 = vunpack.c.l.bf16 %v1383_v10  ;;  %v829_v23 = vmul.f32 %v1385_v11, %v817_v14  ;;  %v830_v24 = vmul.f32 %v1385_v11, %v818_v15  ;;  %v1403_v14 = vld [vmem:[%s1732_s1 + $0x14] ss:$0 sm:$0xff] }
  0x50   : > { %v809_v27 = vadd.f32 %v801_v16, %v773_v2  ;;  %v810_v28 = vadd.f32 %v802_v17, %v774_v3  ;;  %v811_v29 = vadd.f32 %v803_v18, %v775_v6  ;;  %v831_v30 = vmul.f32 %v1385_v11, %v819_v19  ;;  %v1399_v3 = vld [vmem:[%s1530_s22 + $0x14] sm:$0x3]  ;;  %v1404_v19 = vld [vmem:[%s1530_s22 + $0x10] sm:$0x7] }
  0x51   : > { %v812_v32 = vadd.f32 %v804_v21, %v776_v12  ;;  %v832_v33 = vmul.f32 %v1385_v11, %v820_v22  ;;  %v837_v34 = vrot.slane %v829_v23, 2  ;;  %v838_v35 = vrot.slane %v830_v24, 2 }
  0x52   : > { %v839_v37 = vrot.slane %v831_v30, 2  ;;  %v853_v38 = vunpack.c.l.bf16 %v1386_v20  ;;  %v854_v39 = vunpack.c.l.bf16 %v1387_v25  ;;  %v855_v40 = vunpack.c.l.bf16 %v1388_v26  ;;  %v1405_v20 = vld [vmem:[%s1530_s22 + $0x14] sm:$0x7]  ;;  %v1406_v25 = vld [vmem:[%s1530_s22 + $0x18] sm:$0x7] }
  0x53   : > { %v840_v43 = vrot.slane %v832_v33, 2  ;;  %v845_v44 = vadd.f32 %v837_v34, %v809_v27  ;;  %v846_v45 = vadd.f32 %v838_v35, %v810_v28  ;;  %v856_v46 = vunpack.c.l.bf16 %v1389_v31  ;;  %v1407_v30 = vld [vmem:[%s1530_s22 + $0x1c] sm:$0x7]  ;;  %v1409_v31 = vld [vmem:[%s1732_s1 + $0x15] ss:$0 sm:$0xff] }
  0x54   : > { %v847_v48 = vadd.f32 %v839_v37, %v811_v29  ;;  %v865_v49 = vmul.f32 %v1391_v36, %v853_v38  ;;  %v866_v50 = vmul.f32 %v1391_v36, %v854_v39  ;;  %v867_v51 = vmul.f32 %v1391_v36, %v855_v40  ;;  %v1411_v37 = vld [vmem:[%s1530_s22 + $0x14] sm:$0x6]  ;;  %v1412_v38 = vld [vmem:[%s1530_s22 + $0x18] sm:$0x6] }
  0x55   : > { %v848_v54 = vadd.f32 %v840_v43, %v812_v32  ;;  %v868_v55 = vmul.f32 %v1391_v36, %v856_v46  ;;  %v889_v56 = vunpack.c.l.bf16 %v1392_v41  ;;  %v890_v57 = vunpack.c.l.bf16 %v1393_v42  ;;  %v1410_v36 = vld [vmem:[%s1530_s22 + $0x10] sm:$0x6]  ;;  %v1413_v43 = vld [vmem:[%s1530_s22 + $0x1c] sm:$0x6] }
  0x56   : > { %v873_v58 = vrot.slane %v865_v49, 3  ;;  %v874_v59 = vrot.slane %v866_v50, 3  ;;  %v875_v60 = vrot.slane %v867_v51, 3  ;;  %v891_v61 = vunpack.c.l.bf16 %v1394_v47 }
  0x57   : > { %v876_v63 = vrot.slane %v868_v55, 3  ;;  %v892_v0 = vunpack.c.l.bf16 %v1395_v52  ;;  %v901_v1 = vmul.f32 %v1397_v53, %v889_v56  ;;  %v902_v2 = vmul.f32 %v1397_v53, %v890_v57  ;;  %v1416_v57 = vld [vmem:[%s1530_s22 + $0x10] sm:$0xe] }
  0x58   : > { %v881_v5 = vadd.f32 %v873_v58, %v845_v44  ;;  %v882_v6 = vadd.f32 %v874_v59, %v846_v45  ;;  %v883_v7 = vadd.f32 %v875_v60, %v847_v48  ;;  %v903_v8 = vmul.f32 %v1397_v53, %v891_v61  ;;  %v1415_v48 = vld [vmem:[%s1732_s1 + $0x16] ss:$0 sm:$0xff] }
  0x59   : > { %v884_v10 = vadd.f32 %v876_v63, %v848_v54  ;;  %v904_v11 = vmul.f32 %v1397_v53, %v892_v0  ;;  %v909_v12 = vrot.slane %v901_v1, 4  ;;  %v910_v13 = vrot.slane %v902_v2, 4  ;;  %v1418_v63 = vld [vmem:[%s1530_s22 + $0x18] sm:$0xe] }
  0x5a   : > { %v911_v15 = vrot.slane %v903_v8, 4  ;;  %v928_v16 = vunpack.c.l.bf16 %v1398_v62  ;;  %v929_v17 = vunpack.c.l.bf16 %v1399_v3  ;;  %v930_v18 = vunpack.c.l.bf16 %v1400_v4  ;;  %v1417_v62 = vld [vmem:[%s1530_s22 + $0x14] sm:$0xe]  ;;  %v1419_v4 = vld [vmem:[%s1530_s22 + $0x1c] sm:$0xe] }
  0x5b   : > { %v912_v21 = vrot.slane %v904_v11, 4  ;;  %v917_v22 = vadd.f32 %v909_v12, %v881_v5  ;;  %v918_v23 = vadd.f32 %v910_v13, %v882_v6  ;;  %v931_v24 = vunpack.c.l.bf16 %v1401_v9  ;;  %v1421_v5 = vld [vmem:[%s1732_s1 + $0x17] ss:$0 sm:$0xff] }
  0x5c   : > { %v919_v26 = vadd.f32 %v911_v15, %v883_v7  ;;  %v940_v27 = vmul.f32 %v1403_v14, %v928_v16  ;;  %v941_v28 = vmul.f32 %v1403_v14, %v929_v17  ;;  %v942_v29 = vmul.f32 %v1403_v14, %v930_v18  ;;  %v1423_v15 = vld [vmem:[%s1530_s22 + $0x14] sm:$0xc]  ;;  %v1424_v16 = vld [vmem:[%s1530_s22 + $0x18] sm:$0xc] }
  0x5d   : > { %v920_v32 = vadd.f32 %v912_v21, %v884_v10  ;;  %v943_v33 = vmul.f32 %v1403_v14, %v931_v24  ;;  %v952_v34 = vunpack.c.l.bf16 %v1404_v19  ;;  %v953_v35 = vunpack.c.l.bf16 %v1405_v20  ;;  %v1422_v10 = vld [vmem:[%s1530_s22 + $0x10] sm:$0xc]  ;;  %v1425_v21 = vld [vmem:[%s1530_s22 + $0x1c] sm:$0xc] }
  0x5e   : > { %v944_v39 = vadd.f32 %v940_v27, %v917_v22  ;;  %v945_v40 = vadd.f32 %v941_v28, %v918_v23  ;;  %v946_v41 = vadd.f32 %v942_v29, %v919_v26  ;;  %v954_v42 = vunpack.c.l.bf16 %v1406_v25  ;;  %v1427_v26 = vld [vmem:[%s1732_s1 + $0x18] ss:$0 sm:$0xff] }
  0x5f   : > { %v947_v44 = vadd.f32 %v943_v33, %v920_v32  ;;  %v955_v45 = vunpack.c.l.bf16 %v1407_v30  ;;  %v964_v46 = vmul.f32 %v1409_v31, %v952_v34  ;;  %v965_v47 = vmul.f32 %v1409_v31, %v953_v35 }
  0x60   : > { %v966_v49 = vmul.f32 %v1409_v31, %v954_v42  ;;  %v988_v50 = vunpack.c.l.bf16 %v1410_v36  ;;  %v989_v51 = vunpack.c.l.bf16 %v1411_v37  ;;  %v990_v52 = vunpack.c.l.bf16 %v1412_v38 }
  0x61   : > { %v967_v53 = vmul.f32 %v1409_v31, %v955_v45  ;;  %v972_v54 = vrot.slane %v964_v46, 1  ;;  %v973_v55 = vrot.slane %v965_v47, 1  ;;  %v991_v56 = vunpack.c.l.bf16 %v1413_v43 }
  0x62   : > { %v974_v58 = vrot.slane %v966_v49, 1  ;;  %v1000_v59 = vmul.f32 %v1415_v48, %v988_v50  ;;  %v1001_v60 = vmul.f32 %v1415_v48, %v989_v51  ;;  %v1002_v61 = vmul.f32 %v1415_v48, %v990_v52  ;;  %v1428_v49 = vld [vmem:[%s1733_s2] ss:$0 sm:$0xff] }
  0x63   : > { %v975_v0 = vrot.slane %v967_v53, 1  ;;  %v980_v1 = vadd.f32 %v972_v54, %v944_v39  ;;  %v981_v2 = vadd.f32 %v973_v55, %v945_v40  ;;  %v1003_v3 = vmul.f32 %v1415_v48, %v991_v56 }
  0x64   : > { %v982_v6 = vadd.f32 %v974_v58, %v946_v41  ;;  %v1008_v7 = vrot.slane %v1000_v59, 2  ;;  %v1009_v8 = vrot.slane %v1001_v60, 2  ;;  %v1010_v9 = vrot.slane %v1002_v61, 2 }
  0x65   : > { %v983_v11 = vadd.f32 %v975_v0, %v947_v44  ;;  %v1011_v12 = vrot.slane %v1003_v3, 2  ;;  %v1024_v13 = vunpack.c.l.bf16 %v1416_v57  ;;  %v1025_v14 = vunpack.c.l.bf16 %v1417_v62 }
  0x66   : > { %v1016_v17 = vadd.f32 %v1008_v7, %v980_v1  ;;  %v1017_v18 = vadd.f32 %v1009_v8, %v981_v2  ;;  %v1018_v19 = vadd.f32 %v1010_v9, %v982_v6  ;;  %v1026_v20 = vunpack.c.l.bf16 %v1418_v63 }
  0x67   : > { %v1019_v22 = vadd.f32 %v1011_v12, %v983_v11  ;;  %v1027_v23 = vunpack.c.l.bf16 %v1419_v4  ;;  %v1036_v24 = vmul.f32 %v1421_v5, %v1024_v13  ;;  %v1037_v25 = vmul.f32 %v1421_v5, %v1025_v14 }
  0x68   : > { %v1038_v27 = vmul.f32 %v1421_v5, %v1026_v20  ;;  %v1060_v28 = vunpack.c.l.bf16 %v1422_v10  ;;  %v1061_v29 = vunpack.c.l.bf16 %v1423_v15  ;;  %v1062_v30 = vunpack.c.l.bf16 %v1424_v16 }
  0x69   : > { %v1039_v31 = vmul.f32 %v1421_v5, %v1027_v23  ;;  %v1044_v32 = vrot.slane %v1036_v24, 3  ;;  %v1045_v33 = vrot.slane %v1037_v25, 3  ;;  %v1063_v34 = vunpack.c.l.bf16 %v1425_v21 }
  0x6a   : > { %v1046_v35 = vrot.slane %v1038_v27, 3  ;;  %v1072_v36 = vmul.f32 %v1427_v26, %v1060_v28  ;;  %v1073_v37 = vmul.f32 %v1427_v26, %v1061_v29  ;;  %v1074_v38 = vmul.f32 %v1427_v26, %v1062_v30 }
  0x6b   : > { %v1047_v39 = vrot.slane %v1039_v31, 3  ;;  %v1052_v40 = vadd.f32 %v1044_v32, %v1016_v17  ;;  %v1053_v41 = vadd.f32 %v1045_v33, %v1017_v18  ;;  %v1075_v42 = vmul.f32 %v1427_v26, %v1063_v34 }
  0x6c   : > { %v1054_v43 = vadd.f32 %v1046_v35, %v1018_v19  ;;  %v1080_v44 = vrot.slane %v1072_v36, 4  ;;  %v1081_v45 = vrot.slane %v1073_v37, 4  ;;  %v1082_v46 = vrot.slane %v1074_v38, 4 }
  0x6d   : > { %v1055_v47 = vadd.f32 %v1047_v39, %v1019_v22  ;;  %v1083_v48 = vrot.slane %v1075_v42, 4 }
  0x6e   : > { %v1088_v50 = vadd.f32 %v1080_v44, %v1052_v40  ;;  %v1089_v51 = vadd.f32 %v1081_v45, %v1053_v41  ;;  %v1090_v52 = vadd.f32 %v1082_v46, %v1054_v43 }
  0x6f   : > { %v1091_v53 = vadd.f32 %v1083_v48, %v1055_v47 }
  0x70   : > { %v1099_v54 = vadd.f32 %v1428_v49, %v1088_v50  ;;  %v1100_v55 = vadd.f32 %v1428_v49, %v1089_v51  ;;  %v1101_v56 = vadd.f32 %v1428_v49, %v1090_v52 }
  0x71   : > { %v1102_v57 = vadd.f32 %v1428_v49, %v1091_v53 }
  0x72   : > { %v1103_v58 = vadd.f32 3.0, %v1099_v54  ;;  %v1104_v59 = vadd.f32 3.0, %v1100_v55  ;;  %v1105_v60 = vadd.f32 3.0, %v1101_v56 }
  0x73   : > { %v1106_v61 = vadd.f32 3.0, %v1102_v57 }
  0x74   : > { %v1107_v62 = vmax.f32 %v1103_v58, 0.0  ;;  %v1108_v63 = vmax.f32 %v1104_v59, 0.0  ;;  %v1109_v0 = vmax.f32 %v1105_v60, 0.0 }
  0x75   : > { %v1110_v1 = vmax.f32 %v1106_v61, 0.0 }
  0x76   : > { %v1111_v2 = vmin.f32 %v1107_v62, 6.0  ;;  %v1112_v3 = vmin.f32 %v1108_v63, 6.0  ;;  %v1113_v4 = vmin.f32 %v1109_v0, 6.0 }
  0x77   : > { %v1114_v5 = vmin.f32 %v1110_v1, 6.0 }
  0x78   : > { %v1115_v6 = vmul.f32 %v1111_v2, %v1099_v54  ;;  %v1116_v7 = vmul.f32 %v1112_v3, %v1100_v55  ;;  %v1117_v8 = vmul.f32 %v1113_v4, %v1101_v56 }
  0x79   : > { %v1118_v9 = vmul.f32 %v1114_v5, %v1102_v57 }
  0x7a   : > { %v1119_v10 = vmul.f32 0.16666667, %v1115_v6  ;;  %v1120_v11 = vmul.f32 0.16666667, %v1116_v7  ;;  %v1121_v12 = vmul.f32 0.16666667, %v1117_v8 }
  0x7b   : > { %v1122_v13 = vmul.f32 0.16666667, %v1118_v9 }
  0x7c   : > { %v1123_v14 = vpack.c.bf16 %v1119_v10, %v1119_v10  ;;  %v1124_v15 = vpack.c.bf16 %v1120_v11, %v1120_v11  ;;  %v1125_v16 = vpack.c.bf16 %v1121_v12, %v1121_v12  ;;  %v1142_v17 = vsel %vm1141_vm0, %v1119_v10, 0.0 }
  0x7d   : > { %v1126_v18 = vpack.c.bf16 %v1122_v13, %v1122_v13  ;;  %v1143_v19 = vsel %vm1141_vm0, %v1120_v11, 0.0  ;;  %v1145_v20 = vsel %vm1141_vm0, %v1121_v12, 0.0  ;;  %v1147_v22 = vsel %vm1141_vm0, %v1122_v13, 0.0 }
  0x7e   : > { %1127 = vst [vmem:[%s230_s9] sm:$0x3] %v1123_v14  ;;  %1128 = vst [vmem:[%s230_s9 + $0x2] sm:$0x3] %v1124_v15  ;;  %v1144_v21 = vadd.f32 %v1143_v19, %v1142_v17 }
  0x7f   : > { %1129 = vst [vmem:[%s230_s9 + $0x4] sm:$0x3] %v1125_v16  ;;  %1130 = vst [vmem:[%s230_s9 + $0x6] sm:$0x3] %v1126_v18 }
  0x80   : > { %v1146_v23 = vadd.f32 %v1145_v20, %v1144_v21 }
  0x82   : > { %v1148_v24 = vadd.f32 %v1147_v22, %v1146_v23 }
  0x84   : > { %v1149_v25 = vrot.slane %v1148_v24, 4 }
  0x86   : > { %v1150_v26 = vadd.f32 %v1149_v25, %v1148_v24 }
  0x88   : > { %v1151_v27 = vrot.slane %v1150_v26, 2 }
  0x8a   : > { %v1152_v28 = vadd.f32 %v1151_v27, %v1150_v26 }
  0x8c   : > { %v1153_v29 = vrot.slane %v1152_v28, 1 }
  0x8e   : > { %v1154_v30 = vadd.f32 %v1153_v29, %v1152_v28 }
  0x90   : > { %1155 = vst [vmem:[%s237_s12] sm:$0x1] %v1154_v30 }
  0x91 PF: > { %s15_s17 = sadd.s32 1, %s1479_s17   ;;  %s1736_s15 = smov %s1475_s16 }
  0x92   : > { %p12_p5 = scmp.ge.s32.totalorder %s15_s17, 4   ;;  %s1737_s16 = smov %s1739_s18 }
  0x94   :  { %14 = sbr.rel (!%p12_p5) target bundleno = 2 (0x2), region = 103 }

// kernel: mobilenet_v3_forward.23
= control target key start
LH: loop header
LB: loop body
LE: loop exit
PB: predicated region body
PF: predicated region fallthrough
CT: control target
= control target key end

     0   :  { %v519_v3 = vmov 0.0   ;;  %s654_s0 = inlined_call_operand.vmem [shape: bf16[2,16,256], index: 0, kind: input, shape index: {}]   ;;  %s655_s1 = inlined_call_operand.vmem [shape: bf16[256,128], index: 1, kind: input, shape index: {}]   ;;  %s656_s2 = inlined_call_operand.vmem [shape: f32[1,128], index: 2, kind: input, shape index: {}]   ;;  %s657_s3 = inlined_call_operand.vmem [shape: bf16[128,10], index: 3, kind: input, shape index: {}]   ;;  %s658_s4 = inlined_call_operand.vmem [shape: f32[1,10], index: 4, kind: input, shape index: {}]   ;;  %s659_s5 = inlined_call_operand.hbm [shape: f32[2,10], index: 5, kind: output, shape index: {}]  }
   0x1   :  { %v473_v0 = vld [vmem:[%s655_s1 + $0x78] sm:$0xff]   ;;  %v475_v2 = vld [vmem:[%s655_s1 + $0x70] sm:$0xff]   ;;  %450 = vmatprep.subr.bf16.mxu1 %v519_v3  ;;  %v477_v5 = vld [vmem:[%s655_s1 + $0x68] sm:$0xff]  }
   0x2   :  { %v474_v1 = vld [vmem:[%s655_s1 + $0x38] sm:$0xff]   ;;  %419 = vmatprep.subr.bf16.mxu0 %v473_v0  ;;  %v476_v4 = vld [vmem:[%s655_s1 + $0x30] sm:$0xff]   ;;  %v478_v6 = vld [vmem:[%s655_s1 + $0x28] sm:$0xff]  }
   0x3   :  { %420 = vmatpush3.bf16.msra.mxu0 %v474_v1  ;;  %v479_v7 = vld [vmem:[%s655_s1 + $0x60] sm:$0xff]   ;;  %v481_v9 = vld [vmem:[%s655_s1 + $0x58] sm:$0xff]   ;;  %v483_v11 = vld [vmem:[%s655_s1 + $0x50] sm:$0xff]  }
   0x4   :  { %421 = vmatprep.subr.bf16.mxu0 %v475_v2  ;;  %v480_v8 = vld [vmem:[%s655_s1 + $0x20] sm:$0xff]   ;;  %v482_v10 = vld [vmem:[%s655_s1 + $0x18] sm:$0xff]   ;;  %v23_v13 = vld [vmem:[%s654_s0 + $0x8] sm:$0xff] }
   0x5   :  { %v22_v12 = vld [vmem:[%s654_s0] sm:$0xff]  ;;  %v24_v14 = vld [vmem:[%s654_s0 + $0x10] sm:$0xff]  ;;  %v25_v16 = vld [vmem:[%s654_s0 + $0x18] sm:$0xff]  ;;  %v28_v19 = vunpack.c.l.bf16 %v23_v13  ;;  %v29_v20 = vunpack.c.h.bf16 %v23_v13 }
   0x6   :  { %v484_v15 = vld [vmem:[%s655_s1 + $0x10] sm:$0xff]   ;;  %v26_v17 = vunpack.c.l.bf16 %v22_v12  ;;  %v27_v18 = vunpack.c.h.bf16 %v22_v12  ;;  %v30_v21 = vunpack.c.l.bf16 %v24_v14  ;;  %v31_v22 = vunpack.c.h.bf16 %v24_v14  ;;  %v489_v25 = vld [vmem:[%s657_s3 + $0x38] sm:$0xff]   ;;  %v485_v26 = vld [vmem:[%s655_s1 + $0x48] sm:$0xff]  }
   0x7   :  { %422 = vmatpush3.bf16.msra.mxu0 %v476_v4  ;;  %v32_v23 = vunpack.c.l.bf16 %v25_v16  ;;  %v33_v24 = vunpack.c.h.bf16 %v25_v16  ;;  %451 = vmatpush3.bf16.msra.mxu1 %v489_v25  ;;  %v490_v31 = vld [vmem:[%s657_s3 + $0x30] sm:$0xff]   ;;  %v486_v32 = vld [vmem:[%s655_s1 + $0x8] sm:$0xff]   ;;  %v487_v35 = vld [vmem:[%s655_s1 + $0x40] sm:$0xff]  }
   0x8   :  { %423 = vmatprep.subr.bf16.mxu0 %v477_v5  ;;  %v41_v27 = vadd.f32 %v29_v20, %v27_v18  ;;  %v34_v28 = vadd.f32 %v28_v19, %v26_v17  ;;  %452 = vmatprep.subr.bf16.mxu1 %v519_v3  ;;  %v491_v42 = vld [vmem:[%s657_s3 + $0x28] sm:$0xff]  }
   0x9   :  { %v55_v29 = vadd.f32 %v33_v24, %v31_v22  ;;  %v48_v30 = vadd.f32 %v32_v23, %v30_v21 }
   0xa   :  { %v42_v33 = vrot.slane %v41_v27, 4  ;;  %v35_v34 = vrot.slane %v34_v28, 4 }
   0xb   :  { %424 = vmatpush3.bf16.msra.mxu0 %v478_v6  ;;  %v56_v36 = vrot.slane %v55_v29, 4  ;;  %v49_v37 = vrot.slane %v48_v30, 4  ;;  %453 = vmatpush3.bf16.msra.mxu1 %v490_v31 }
   0xc   :  { %425 = vmatprep.subr.bf16.mxu0 %v479_v7  ;;  %v43_v38 = vadd.f32 %v42_v33, %v41_v27  ;;  %v36_v39 = vadd.f32 %v35_v34, %v34_v28 }
   0xd   :  { %v57_v40 = vadd.f32 %v56_v36, %v55_v29  ;;  %v50_v41 = vadd.f32 %v49_v37, %v48_v30 }
   0xf   :  { %426 = vmatpush3.bf16.msra.mxu0 %v480_v8 }
  0x10   :  { %427 = vmatprep.subr.bf16.mxu0 %v481_v9 }
  0x13   :  { %428 = vmatpush3.bf16.msra.mxu0 %v482_v10 }
  0x14   :  { %429 = vmatprep.subr.bf16.mxu0 %v483_v11 }
  0x17   :  { %430 = vmatpush3.bf16.msra.mxu0 %v484_v15 }
  0x18   :  { %431 = vmatprep.subr.bf16.mxu0 %v485_v26 }
  0x19   :  { %10 = vsyncpa [#allocation3], 0  ;;  %v44_v43 = vrot.slane %v43_v38, 2  ;;  %v37_v44 = vrot.slane %v36_v39, 2  ;;  %454 = vmatprep.subr.bf16.mxu1 %v519_v3  ;;  %v58_v45 = vrot.slane %v57_v40, 2  ;;  %v51_v46 = vrot.slane %v50_v41, 2 }
  0x1a   :  { %v488_v47 = vld [vmem:[%s655_s1] sm:$0xff]   ;;  %455 = vmatpush3.bf16.msra.mxu1 %v491_v42  ;;  %vm117_vm0 = vcmask 1041409   ;;  %v493_v14 = vld [vmem:[%s657_s3 + $0x18] sm:$0xff]   ;;  %v494_v15 = vld [vmem:[%s657_s3 + $0x10] sm:$0xff]   ;;  %vm520_vm1 = vmmov 0   ;;  %s521_s25 = smov [#allocation2]  }
  0x1b   :  { %432 = vmatpush3.bf16.msra.mxu0 %v486_v32  ;;  %v45_v48 = vadd.f32 %v44_v43, %v43_v38  ;;  %v38_v49 = vadd.f32 %v37_v44, %v36_v39  ;;  %v59_v50 = vadd.f32 %v58_v45, %v57_v40  ;;  %v52_v51 = vadd.f32 %v51_v46, %v50_v41  ;;  %v492_v13 = vld [vmem:[%s657_s3 + $0x20] sm:$0xff]   ;;  %v495_v16 = vld [vmem:[%s657_s3 + $0x8] sm:$0xff]   ;;  %s385_s26 = sshll.u32 %s521_s25, 4  ;;  %s386_s26 = int_to_ptr.vmem [resolvable:$true] %s385_s26 }
  0x1c   :  { %433 = vmatprep.subr.bf16.mxu0 %v487_v35  ;;  %456 = vmatprep.subr.bf16.mxu1 %v519_v3  ;;  %v496_v17 = vld [vmem:[%s657_s3] sm:$0xff]   ;;  %vm377_vm2 = vcmask 74752   ;;  %p502_p1 = scmp.lt.s32.totalorder %s386_s26, %s386_s26 }
  0x1d   :  { %v46_v52 = vrot.slane %v45_v48, 1  ;;  %v39_v53 = vrot.slane %v38_v49, 1  ;;  %v60_v54 = vrot.slane %v59_v50, 1  ;;  %v53_v55 = vrot.slane %v52_v51, 1  ;;  %466 = vmatprep.mubr.msk.bf16.mxu1 %vm520_vm1, %v519_v3  ;;  %v393_v19 = vld [vmem:[%s656_s2] ss:$0 sm:$0xff] }
  0x1e   :  { %457 = vmatpush3.bf16.msra.mxu1 %v492_v13  ;;  %s497_s2 = scalar_lea.vmem %s386_s26, 32 }
  0x1f   :  { %434 = vmatpush3.bf16.msra.mxu0 %v488_v47  ;;  %v47_v56 = vadd.f32 %v46_v52, %v45_v48  ;;  %v40_v57 = vadd.f32 %v39_v53, %v38_v49  ;;  %v61_v58 = vadd.f32 %v60_v54, %v59_v50  ;;  %v54_v59 = vadd.f32 %v53_v55, %v52_v51  ;;  %p498_p0 = scmp.ne.s32.totalorder %s386_s26, %s497_s2  ;;  %p503_p2 = scmp.lt.s32.totalorder %s497_s2, %s497_s2 }
  0x20   :  { %458 = vmatprep.subr.bf16.mxu1 %v519_v3 }
  0x21   :  { %v63_v60 = vmul.f32 0.0625, %v47_v56  ;;  %v62_v61 = vmul.f32 0.0625, %v40_v57  ;;  %v65_v62 = vmul.f32 0.0625, %v61_v58  ;;  %v64_v63 = vmul.f32 0.0625, %v54_v59  ;;  %p504_p3 = por %p503_p2, %p502_p1 }
  0x22   :  { %459 = vmatpush3.bf16.msra.mxu1 %v493_v14 }
  0x23   :  { %v67_v0 = vpack.c.bf16 %v63_v60, %v63_v60  ;;  %v66_v1 = vpack.c.bf16 %v62_v61, %v62_v61  ;;  %v69_v2 = vpack.c.bf16 %v65_v62, %v65_v62  ;;  %v68_v4 = vpack.c.bf16 %v64_v63, %v64_v63  ;;  %460 = vmatprep.subr.bf16.mxu1 %v519_v3  ;;  %p505_p4 = pnand %p504_p3, %p498_p0 }
  0x25   :  { %v114_v5 = vunpack.c.l.b16 %v67_v0  ;;  %v113_v6 = vunpack.c.l.b16 %v66_v1  ;;  %v116_v7 = vunpack.c.l.b16 %v69_v2  ;;  %v115_v8 = vunpack.c.l.b16 %v68_v4 }
  0x26   :  { %461 = vmatpush3.bf16.msra.mxu1 %v494_v15 }
  0x27   :  { %v119_v9 = vsel %vm117_vm0, %v116_v7, %v114_v5  ;;  %v118_v10 = vsel %vm117_vm0, %v115_v8, %v113_v6  ;;  %462 = vmatprep.subr.bf16.mxu1 %v519_v3 }
  0x28   :  { %v121_v11 = vpack.c.b16 %v119_v9, %v119_v9  ;;  %v120_v12 = vpack.c.b16 %v118_v10, %v118_v10 }
  0x2a   :  { %252 = vmatprep.mubr.bf16.mxu0 %v121_v11  ;;  %463 = vmatpush3.bf16.msra.mxu1 %v495_v16 }
  0x2b   :  { %253 = vmatmul.mubr.bf16.vlgmr.msra.gmra.mxu0 %v120_v12  ;;  %464 = vmatprep.subr.bf16.mxu1 %v519_v3  ;;  %v410_v3 = vld [vmem:[%s658_s4] ss:$0 sm:$0xff] }
  0x2e   :  { %465 = vmatpush3.bf16.msra.mxu1 %v496_v17 }
  0xeb   :  { %v435_v18 = vpop.f32.mrf.mxu0 }
  0xed   :  { %v436_v20 = vpop.f32.mrf.mxu0 }
  0xee   :  { %v437_v21 = vadd.f32 %v436_v20, %v435_v18 }
  0xef   :  { %v438_v22 = vpop.f32.mrf.mxu0 }
  0xf0   :  { %v255_v23 = vadd.f32 %v437_v21, %v393_v19 }
  0xf1   :  { %v439_v24 = vpop.f32.mrf.mxu0 }
  0xf2   :  { %v260_v25 = vadd.f32 3.0, %v255_v23 }
  0xf4   :  { %v261_v26 = vmax.f32 %v260_v25, 0.0 }
  0xf6   :  { %v262_v27 = vmin.f32 %v261_v26, 6.0 }
  0xf8   :  { %v263_v28 = vmul.f32 %v262_v27, %v255_v23 }
  0xfa   :  { %v264_v29 = vmul.f32 0.16666667, %v263_v28 }
  0xfc   :  { %v265_v30 = vpack.c.bf16 %v264_v29, %v264_v29 }
  0xfe   :  { %467 = vmatmul.mubr.bf16.vlgmr.msra.gmra.mxu1 %v265_v30 }
 0x1be   :  { %v371_v31 = vpop.f32.mrf.mxu1 }
 0x1bf   :  { %v372_v32 = vadd.f32 %v410_v3, %v371_v31 }
 0x1c0   :  { %v468_v33 = vpop.f32.mrf.mxu1 }
 0x1c1   :  { %378 = vst.msk [vmem:[#allocation2] sm:$0x3] %vm377_vm2, %v372_v32 }
 0x1c2   :  { %v374_v34 = vpop.f32.mrf.mxu1 }
 0x1c3   :  { %508 = shalt.err (!%p505_p4)
}
 0x1c4   :  { %388 = dma.vmem_to_hbm [thread:$0]  %s386_s26, 32, %s659_s5, [#allocation3]   ;;  %v469_v35 = vpop.f32.mrf.mxu1 }
 0x1c5   :  { %517 = dma.done.wait [#allocation3], 32  }
 0x1c6   :  { %518 = vsyncadd [#allocation3], 4294967264 }
 0x1c7   :  { %392 = vsyncpa [#allocation3], 1 }

</bundles_post_ra>
